<compile_context>
chip_gen: v6e
topology: v6e:2x2x1
jax: 0.10.0
libtpu: 0.0.40
codegen_flags: <defaults>
</compile_context>

<pallas_src>
import functools
import math

import jax
import jax.numpy as jnp
from jax.experimental import pallas as pl
from jax.experimental.pallas import tpu as pltpu


def _rup(a, m):
    return ((a + m - 1) // m) * m


# ---------------------------------------------------------------------------
# Fused grouped-kxk-conv + pointwise-1x1-conv kernel (one row strip, one group)
# ---------------------------------------------------------------------------
def _fused_kernel(x_ref, w1_ref, w2_ref, b2_ref, o_ref, *, taps, mos, cg, concat_taps):
    g = pl.program_id(2)
    w1 = w1_ref[g]                                   # (k*k*Cg, Cg) bf16, VMEM-resident

    if concat_taps:
        # Lane-aligned groups (Cg % 128 == 0): build the tap-concatenated operand in VMEM
        # (never in HBM) and run the grouped conv as ONE long-K MXU matmul.  Tap
        # accumulation stays inside the MXU (no per-tap f32 RMW through vld/vst).
        a = jnp.concatenate([x_ref[pl.ds(t, mos), :] for t in taps], axis=1)
        y = jnp.dot(a, w1, preferred_element_type=jnp.float32)             # (MOs, Cg) f32
    else:
        # Small-Cg fallback (stem / tests): per-tap K=Cg dots, f32 accumulation.
        y = jnp.dot(x_ref[pl.ds(taps[0], mos), :], w1[0:cg, :],
                    preferred_element_type=jnp.float32)
        for i in range(1, len(taps)):
            y += jnp.dot(x_ref[pl.ds(taps[i], mos), :], w1[i * cg:(i + 1) * cg, :],
                         preferred_element_type=jnp.float32)

    # Fused pointwise 1x1 conv: partial sum over this group's input channels.
    part = jnp.dot(y.astype(jnp.bfloat16), w2_ref[g],
                   preferred_element_type=jnp.float32)                      # (MOs, Cout_p)

    # Accumulate directly into the output block (resident across the g axis — no scratch).
    @pl.when(g == 0)
    def _():
        o_ref[...] = part + b2_ref[...]              # conv bias (b1 already folded into b2)

    @pl.when(g > 0)
    def _():
        o_ref[...] += part


def depthwise_pointwise_conv(x_nchw, params, *, target_strip_rows=1024):
    """Forward pass of the PyTorch module. x is NCHW f32; returns NCHW f32."""
    w1, b1 = params['w1'], params['b1']              # (Cin, Cg, k, k), (Cin,)
    w2, b2 = params['w2'], params['b2']              # (Cout, Cin, 1, 1), (Cout,)
    k, pad, groups = params['k'], params['padding'], params['groups']

    N, Cin, H, W = x_nchw.shape
    Cout = w2.shape[0]
    Cg = Cin // groups
    Hp, Wp = H + 2 * pad, W + 2 * pad
    Ho, Wo = Hp - k + 1, Wp - k + 1
    Cout_p = _rup(max(Cout, 128), 128)               # lane-dense output channels

    # ---- row-strip geometry: bounds VMEM independent of H*W -----------------
    g8 = 8 // math.gcd(Wp, 8)                        # strip_h granule so strip_h*Wp % 8 == 0
    strip_h = _rup(max(1, -(-target_strip_rows // Wp)), g8)
    strip_h = min(strip_h, _rup(Ho, g8))
    R = -(-Ho // strip_h)                            # number of row strips
    Ho_ext = R * strip_h                             # output image rows incl. junk tail
    Hp_ext = Ho_ext + k - 1                          # padded input rows needed (>= Hp)
    MOs = strip_h * Wp                               # computed flattened rows per strip
    Ls = _rup((strip_h + k - 1) * Wp + (k - 1), 8)   # strip input rows (+ tap overhang)

    # ---- activations: bf16 FIRST, NCHW -> NHWC, zero-pad, split groups, ------
    # ---- pre-haloed row strips (adjacent strips share k-1 padded image rows) --
    x = jnp.transpose(x_nchw.astype(jnp.bfloat16), (0, 2, 3, 1))           # (N,H,W,Cin)
    x = jnp.pad(x, ((0, 0), (pad, Hp_ext - H - pad), (pad, pad), (0, 0)))  # (N,Hp_ext,Wp,Cin)
    x = x.reshape(N, Hp_ext, Wp, groups, Cg)
    x = jnp.transpose(x, (3, 0, 1, 2, 4))                                  # (G,N,Hp_ext,Wp,Cg)
    xs = jnp.stack([x[:, :, r * strip_h: r * strip_h + strip_h + k - 1]
                    for r in range(R)], axis=2)                            # (G,N,R,sh+k-1,Wp,Cg)
    xs = xs.reshape(groups, N, R, (strip_h + k - 1) * Wp, Cg)
    xs = jnp.pad(xs, ((0, 0), (0, 0), (0, 0),
                      (0, Ls - (strip_h + k - 1) * Wp), (0, 0)))           # (G,N,R,Ls,Cg)

    # ---- conv1 weight (Cin,Cg,k,k): group-major, tap-concatenated (k*k*Cg, Cg) ----
    w1g = w1.reshape(groups, Cg, Cg, k, k)                       # (G, co, ci, kh, kw)
    w1g = jnp.transpose(w1g, (0, 3, 4, 2, 1))                    # (G, kh, kw, ci, co)
    w1g = w1g.reshape(groups, k * k * Cg, Cg).astype(jnp.bfloat16)

    # ---- conv2 weight (Cout,Cin,1,1): fold conv1 bias (exact), pad lanes ----
    w2m = w2.reshape(Cout, Cin).astype(jnp.float32)
    b2_eff = b2.astype(jnp.float32) + w2m @ b1.astype(jnp.float32)
    w2g = jnp.transpose(w2m, (1, 0)).reshape(groups, Cg, Cout)
    w2g = jnp.pad(w2g, ((0, 0), (0, 0), (0, Cout_p - Cout))).astype(jnp.bfloat16)
    b2p = jnp.pad(b2_eff, (0, Cout_p - Cout)).reshape(1, Cout_p)

    taps = tuple(di * Wp + dj for di in range(k) for dj in range(k))
    kern = functools.partial(_fused_kernel, taps=taps, mos=MOs, cg=Cg,
                             concat_taps=(Cg % 128 == 0))

    out = pl.pallas_call(
        kern,
        out_shape=jax.ShapeDtypeStruct((N, R, MOs, Cout_p), jnp.float32),
        grid_spec=pltpu.PrefetchScalarGridSpec(
            num_scalar_prefetch=0,
            grid=(N, R, groups),
            in_specs=[
                # per-(group, image, strip) haloed activation slab
                pl.BlockSpec((None, None, None, Ls, Cg), lambda n, r, g: (g, n, r, 0, 0)),
                # weights + bias: VMEM-resident for all groups (constant index_map)
                pl.BlockSpec((groups, k * k * Cg, Cg), lambda n, r, g: (0, 0, 0)),
                pl.BlockSpec((groups, Cg, Cout_p), lambda n, r, g: (0, 0, 0)),
                pl.BlockSpec((1, Cout_p), lambda n, r, g: (0, 0)),
            ],
            out_specs=pl.BlockSpec((None, None, MOs, Cout_p),
                                   lambda n, r, g: (n, r, 0, 0))),
        compiler_params=pltpu.CompilerParams(
            dimension_semantics=("parallel", "parallel", "arbitrary"),
            vmem_limit_bytes=48 * 1024 * 1024),
    )(xs, w1g, w2g, b2p)

    # (N, R, strip_h*Wp, Cout_p) -> (N, Ho, Wo, Cout) -> NCHW
    y = out.reshape(N, R, strip_h, Wp, Cout_p)[:, :, :, :Wo, :Cout]
    y = y.reshape(N, Ho_ext, Wo, Cout)[:, :Ho]
    return jnp.transpose(y, (0, 3, 1, 2))


# ---------------------------------------------------------------------------
# Deterministic parameter construction (shapes follow the PyTorch __init__)
# ---------------------------------------------------------------------------
def init_params(key, in_ch, out_ch, kernel_size, padding, channels_per_seg=128):
    if in_ch == 3 and channels_per_seg != 1:
        C = 3
    else:
        C = min(in_ch, channels_per_seg)
    groups = in_ch // C
    Cg = in_ch // groups
    k1, k2, k3, k4 = jax.random.split(key, 4)
    fan1 = Cg * kernel_size * kernel_size
    w1 = jax.random.normal(k1, (in_ch, Cg, kernel_size, kernel_size), jnp.float32) / jnp.sqrt(fan1)
    b1 = 0.1 * jax.random.normal(k2, (in_ch,), jnp.float32)
    w2 = jax.random.normal(k3, (out_ch, in_ch, 1, 1), jnp.float32) / jnp.sqrt(in_ch)
    b2 = 0.1 * jax.random.normal(k4, (out_ch,), jnp.float32)
    return dict(w1=w1, b1=b1, w2=w2, b2=b2,
                k=kernel_size, padding=padding, groups=groups)


# ---------------------------------------------------------------------------
# Pure-JAX reference (matches the PyTorch module in f32)
# ---------------------------------------------------------------------------
def _ref_forward(x, p):
    y = jax.lax.conv_general_dilated(
        x, p['w1'], window_strides=(1, 1),
        padding=[(p['padding'], p['padding'])] * 2,
        dimension_numbers=('NCHW', 'OIHW', 'NCHW'),
        feature_group_count=p['groups'])
    y = y + p['b1'][None, :, None, None]
    z = jax.lax.conv_general_dilated(
        y, p['w2'], window_strides=(1, 1), padding='VALID',
        dimension_numbers=('NCHW', 'OIHW', 'NCHW'))
    return z + p['b2'][None, :, None, None]


if __name__ == "__main__":
    key = jax.random.PRNGKey(0)

    # bf16 operands with f32 accumulation -> ~1e-2 relative error; 0.06 is the documented
    # (intentionally loose) tolerance for this design.
    def run_case(case_key, N, in_ch, H, W, out_ch, ksize, padding, cps, **kw):
        kx, kp = jax.random.split(case_key)
        params = init_params(kp, in_ch, out_ch, ksize, padding, channels_per_seg=cps)
        x = jax.random.normal(kx, (N, in_ch, H, W), jnp.float32)
        out = jax.block_until_ready(depthwise_pointwise_conv(x, params, **kw))
        Ho = H + 2 * padding - ksize + 1
        Wo = W + 2 * padding - ksize + 1
        assert out.shape == (N, out_ch, Ho, Wo), out.shape
        assert bool(jnp.all(jnp.isfinite(out)))
        ref = _ref_forward(x, params)
        rel = float(jnp.max(jnp.abs(out - ref)) / jnp.maximum(jnp.max(jnp.abs(ref)), 1.0))
        assert rel < 0.06, f"max relative error {rel}"

    k1, k2, k3 = jax.random.split(key, 3)
    # Grouped path with small Cg (per-tap fallback), single row strip.
    run_case(k1, N=2, in_ch=8, H=16, W=16, out_ch=16, ksize=3, padding=1, cps=4)
    # Same config but forced multi-strip tiling (exercises the haloed row strips).
    run_case(k2, N=2, in_ch=8, H=16, W=16, out_ch=16, ksize=3, padding=1, cps=4,
             target_strip_rows=72)
    # Lane-aligned groups (Cg=128): tap-concatenated long-K MXU path.
    run_case(k3, N=1, in_ch=256, H=8, W=8, out_ch=32, ksize=3, padding=1, cps=128)

    print("KERNEL_OK")
</pallas_src>

<mosaic_0001>
module attributes {stable_mosaic.version = 11 : i64} {
  func.func @_fused_kernel(%arg0: i32, %arg1: i32, %arg2: i32, %arg3: memref<1x1x1x328x4xbf16, #tpu.memory_space<vmem>>, %arg4: memref<2x36x4xbf16, #tpu.memory_space<vmem>>, %arg5: memref<2x4x128xbf16, #tpu.memory_space<vmem>>, %arg6: memref<1x128xf32, #tpu.memory_space<vmem>>, %arg7: memref<1x1x288x128xf32, #tpu.memory_space<vmem>>) attributes {dimension_semantics = [#tpu.dimension_semantics<parallel>, #tpu.dimension_semantics<parallel>, #tpu.dimension_semantics<arbitrary>], iteration_bounds = array<i64: 2, 1, 2>, scalar_prefetch = 0 : i64, scratch_operands = 0 : i64, tpu.core_type = #tpu.core_type<tc>, window_params = [{transform_indices = @transform_0, window_bounds = array<i64: 1, 1, 1, 328, 4>}, {pipeline_mode = #tpu.pipeline_mode<synchronous>, transform_indices = @transform_1, window_bounds = array<i64: 2, 36, 4>}, {pipeline_mode = #tpu.pipeline_mode<synchronous>, transform_indices = @transform_2, window_bounds = array<i64: 2, 4, 128>}, {pipeline_mode = #tpu.pipeline_mode<synchronous>, transform_indices = @transform_3, window_bounds = array<i64: 1, 128>}, {transform_indices = @transform_4, window_bounds = array<i64: 1, 1, 288, 128>}]} {
    %0 = arith.index_cast %arg2 : i32 to index
    %c0 = arith.constant 0 : index
    %c0_0 = arith.constant 0 : index
    %1 = vector.load %arg4[%0, %c0, %c0_0] : memref<2x36x4xbf16, #tpu.memory_space<vmem>>, vector<1x36x4xbf16>
    %2 = vector.shape_cast %1 : vector<1x36x4xbf16> to vector<36x4xbf16>
    %c0_1 = arith.constant 0 : index
    %c0_2 = arith.constant 0 : index
    %c0_3 = arith.constant 0 : index
    %c0_4 = arith.constant 0 : index
    %c0_5 = arith.constant 0 : index
    %3 = vector.load %arg3[%c0_1, %c0_2, %c0_3, %c0_4, %c0_5] : memref<1x1x1x328x4xbf16, #tpu.memory_space<vmem>>, vector<1x1x1x288x4xbf16>
    %4 = vector.shape_cast %3 : vector<1x1x1x288x4xbf16> to vector<288x4xbf16>
    %5 = vector.extract_strided_slice %2 {offsets = [0, 0], sizes = [4, 4], strides = [1, 1]} : vector<36x4xbf16> to vector<4x4xbf16>
    %cst = arith.constant dense<0.000000e+00> : vector<288x4xf32>
    %6 = tpu.matmul %4, %5, %cst {dimension_numbers = #tpu.dot_dimension_numbers<[1], [0], [0], [1], [0, 0, 1, 1], [], []>} : vector<288x4xbf16>, vector<4x4xbf16>, vector<288x4xf32> -> vector<288x4xf32>
    %c0_6 = arith.constant 0 : index
    %c0_7 = arith.constant 0 : index
    %c0_8 = arith.constant 0 : index
    %c1 = arith.constant 1 : index
    %c0_9 = arith.constant 0 : index
    %7 = vector.load %arg3[%c0_6, %c0_7, %c0_8, %c1, %c0_9] : memref<1x1x1x328x4xbf16, #tpu.memory_space<vmem>>, vector<1x1x1x288x4xbf16>
    %8 = vector.shape_cast %7 : vector<1x1x1x288x4xbf16> to vector<288x4xbf16>
    %9 = vector.extract_strided_slice %2 {offsets = [4, 0], sizes = [4, 4], strides = [1, 1]} : vector<36x4xbf16> to vector<4x4xbf16>
    %cst_10 = arith.constant dense<0.000000e+00> : vector<288x4xf32>
    %10 = tpu.matmul %8, %9, %cst_10 {dimension_numbers = #tpu.dot_dimension_numbers<[1], [0], [0], [1], [0, 0, 1, 1], [], []>} : vector<288x4xbf16>, vector<4x4xbf16>, vector<288x4xf32> -> vector<288x4xf32>
    %11 = arith.addf %6, %10 : vector<288x4xf32>
    %c0_11 = arith.constant 0 : index
    %c0_12 = arith.constant 0 : index
    %c0_13 = arith.constant 0 : index
    %c2 = arith.constant 2 : index
    %c0_14 = arith.constant 0 : index
    %12 = vector.load %arg3[%c0_11, %c0_12, %c0_13, %c2, %c0_14] : memref<1x1x1x328x4xbf16, #tpu.memory_space<vmem>>, vector<1x1x1x288x4xbf16>
    %13 = vector.shape_cast %12 : vector<1x1x1x288x4xbf16> to vector<288x4xbf16>
    %14 = vector.extract_strided_slice %2 {offsets = [8, 0], sizes = [4, 4], strides = [1, 1]} : vector<36x4xbf16> to vector<4x4xbf16>
    %cst_15 = arith.constant dense<0.000000e+00> : vector<288x4xf32>
    %15 = tpu.matmul %13, %14, %cst_15 {dimension_numbers = #tpu.dot_dimension_numbers<[1], [0], [0], [1], [0, 0, 1, 1], [], []>} : vector<288x4xbf16>, vector<4x4xbf16>, vector<288x4xf32> -> vector<288x4xf32>
    %16 = arith.addf %11, %15 : vector<288x4xf32>
    %c0_16 = arith.constant 0 : index
    %c0_17 = arith.constant 0 : index
    %c0_18 = arith.constant 0 : index
    %c18 = arith.constant 18 : index
    %c0_19 = arith.constant 0 : index
    %17 = vector.load %arg3[%c0_16, %c0_17, %c0_18, %c18, %c0_19] : memref<1x1x1x328x4xbf16, #tpu.memory_space<vmem>>, vector<1x1x1x288x4xbf16>
    %18 = vector.shape_cast %17 : vector<1x1x1x288x4xbf16> to vector<288x4xbf16>
    %19 = vector.extract_strided_slice %2 {offsets = [12, 0], sizes = [4, 4], strides = [1, 1]} : vector<36x4xbf16> to vector<4x4xbf16>
    %cst_20 = arith.constant dense<0.000000e+00> : vector<288x4xf32>
    %20 = tpu.matmul %18, %19, %cst_20 {dimension_numbers = #tpu.dot_dimension_numbers<[1], [0], [0], [1], [0, 0, 1, 1], [], []>} : vector<288x4xbf16>, vector<4x4xbf16>, vector<288x4xf32> -> vector<288x4xf32>
    %21 = arith.addf %16, %20 : vector<288x4xf32>
    %c0_21 = arith.constant 0 : index
    %c0_22 = arith.constant 0 : index
    %c0_23 = arith.constant 0 : index
    %c19 = arith.constant 19 : index
    %c0_24 = arith.constant 0 : index
    %22 = vector.load %arg3[%c0_21, %c0_22, %c0_23, %c19, %c0_24] : memref<1x1x1x328x4xbf16, #tpu.memory_space<vmem>>, vector<1x1x1x288x4xbf16>
    %23 = vector.shape_cast %22 : vector<1x1x1x288x4xbf16> to vector<288x4xbf16>
    %24 = vector.extract_strided_slice %2 {offsets = [16, 0], sizes = [4, 4], strides = [1, 1]} : vector<36x4xbf16> to vector<4x4xbf16>
    %cst_25 = arith.constant dense<0.000000e+00> : vector<288x4xf32>
    %25 = tpu.matmul %23, %24, %cst_25 {dimension_numbers = #tpu.dot_dimension_numbers<[1], [0], [0], [1], [0, 0, 1, 1], [], []>} : vector<288x4xbf16>, vector<4x4xbf16>, vector<288x4xf32> -> vector<288x4xf32>
    %26 = arith.addf %21, %25 : vector<288x4xf32>
    %c0_26 = arith.constant 0 : index
    %c0_27 = arith.constant 0 : index
    %c0_28 = arith.constant 0 : index
    %c20 = arith.constant 20 : index
    %c0_29 = arith.constant 0 : index
    %27 = vector.load %arg3[%c0_26, %c0_27, %c0_28, %c20, %c0_29] : memref<1x1x1x328x4xbf16, #tpu.memory_space<vmem>>, vector<1x1x1x288x4xbf16>
    %28 = vector.shape_cast %27 : vector<1x1x1x288x4xbf16> to vector<288x4xbf16>
    %29 = vector.extract_strided_slice %2 {offsets = [20, 0], sizes = [4, 4], strides = [1, 1]} : vector<36x4xbf16> to vector<4x4xbf16>
    %cst_30 = arith.constant dense<0.000000e+00> : vector<288x4xf32>
    %30 = tpu.matmul %28, %29, %cst_30 {dimension_numbers = #tpu.dot_dimension_numbers<[1], [0], [0], [1], [0, 0, 1, 1], [], []>} : vector<288x4xbf16>, vector<4x4xbf16>, vector<288x4xf32> -> vector<288x4xf32>
    %31 = arith.addf %26, %30 : vector<288x4xf32>
    %c0_31 = arith.constant 0 : index
    %c0_32 = arith.constant 0 : index
    %c0_33 = arith.constant 0 : index
    %c36 = arith.constant 36 : index
    %c0_34 = arith.constant 0 : index
    %32 = vector.load %arg3[%c0_31, %c0_32, %c0_33, %c36, %c0_34] : memref<1x1x1x328x4xbf16, #tpu.memory_space<vmem>>, vector<1x1x1x288x4xbf16>
    %33 = vector.shape_cast %32 : vector<1x1x1x288x4xbf16> to vector<288x4xbf16>
    %34 = vector.extract_strided_slice %2 {offsets = [24, 0], sizes = [4, 4], strides = [1, 1]} : vector<36x4xbf16> to vector<4x4xbf16>
    %cst_35 = arith.constant dense<0.000000e+00> : vector<288x4xf32>
    %35 = tpu.matmul %33, %34, %cst_35 {dimension_numbers = #tpu.dot_dimension_numbers<[1], [0], [0], [1], [0, 0, 1, 1], [], []>} : vector<288x4xbf16>, vector<4x4xbf16>, vector<288x4xf32> -> vector<288x4xf32>
    %36 = arith.addf %31, %35 : vector<288x4xf32>
    %c0_36 = arith.constant 0 : index
    %c0_37 = arith.constant 0 : index
    %c0_38 = arith.constant 0 : index
    %c37 = arith.constant 37 : index
    %c0_39 = arith.constant 0 : index
    %37 = vector.load %arg3[%c0_36, %c0_37, %c0_38, %c37, %c0_39] : memref<1x1x1x328x4xbf16, #tpu.memory_space<vmem>>, vector<1x1x1x288x4xbf16>
    %38 = vector.shape_cast %37 : vector<1x1x1x288x4xbf16> to vector<288x4xbf16>
    %39 = vector.extract_strided_slice %2 {offsets = [28, 0], sizes = [4, 4], strides = [1, 1]} : vector<36x4xbf16> to vector<4x4xbf16>
    %cst_40 = arith.constant dense<0.000000e+00> : vector<288x4xf32>
    %40 = tpu.matmul %38, %39, %cst_40 {dimension_numbers = #tpu.dot_dimension_numbers<[1], [0], [0], [1], [0, 0, 1, 1], [], []>} : vector<288x4xbf16>, vector<4x4xbf16>, vector<288x4xf32> -> vector<288x4xf32>
    %41 = arith.addf %36, %40 : vector<288x4xf32>
    %c0_41 = arith.constant 0 : index
    %c0_42 = arith.constant 0 : index
    %c0_43 = arith.constant 0 : index
    %c38 = arith.constant 38 : index
    %c0_44 = arith.constant 0 : index
    %42 = vector.load %arg3[%c0_41, %c0_42, %c0_43, %c38, %c0_44] : memref<1x1x1x328x4xbf16, #tpu.memory_space<vmem>>, vector<1x1x1x288x4xbf16>
    %43 = vector.shape_cast %42 : vector<1x1x1x288x4xbf16> to vector<288x4xbf16>
    %44 = vector.extract_strided_slice %2 {offsets = [32, 0], sizes = [4, 4], strides = [1, 1]} : vector<36x4xbf16> to vector<4x4xbf16>
    %cst_45 = arith.constant dense<0.000000e+00> : vector<288x4xf32>
    %45 = tpu.matmul %43, %44, %cst_45 {dimension_numbers = #tpu.dot_dimension_numbers<[1], [0], [0], [1], [0, 0, 1, 1], [], []>} : vector<288x4xbf16>, vector<4x4xbf16>, vector<288x4xf32> -> vector<288x4xf32>
    %46 = arith.addf %41, %45 : vector<288x4xf32>
    %47 = arith.truncf %46 : vector<288x4xf32> to vector<288x4xbf16>
    %48 = arith.index_cast %arg2 : i32 to index
    %c0_46 = arith.constant 0 : index
    %c0_47 = arith.constant 0 : index
    %49 = vector.load %arg5[%48, %c0_46, %c0_47] : memref<2x4x128xbf16, #tpu.memory_space<vmem>>, vector<1x4x128xbf16>
    %50 = vector.shape_cast %49 : vector<1x4x128xbf16> to vector<4x128xbf16>
    %cst_48 = arith.constant dense<0.000000e+00> : vector<288x128xf32>
    %51 = tpu.matmul %47, %50, %cst_48 {dimension_numbers = #tpu.dot_dimension_numbers<[1], [0], [0], [1], [0, 0, 1, 1], [], []>} : vector<288x4xbf16>, vector<4x128xbf16>, vector<288x128xf32> -> vector<288x128xf32>
    %c0_i32 = arith.constant 0 : i32
    %52 = arith.cmpi eq, %arg2, %c0_i32 : i32
    %53 = arith.extui %52 : i1 to i32
    %c0_i32_49 = arith.constant 0 : i32
    %54 = arith.cmpi ne, %53, %c0_i32_49 : i32
    scf.if %54 {
      %c0_52 = arith.constant 0 : index
      %c0_53 = arith.constant 0 : index
      %58 = vector.load %arg6[%c0_52, %c0_53] : memref<1x128xf32, #tpu.memory_space<vmem>>, vector<1x128xf32>
      %59 = vector.broadcast %58 : vector<1x128xf32> to vector<288x128xf32>
      %60 = arith.addf %51, %59 : vector<288x128xf32>
      %c0_54 = arith.constant 0 : index
      %c0_55 = arith.constant 0 : index
      %c0_56 = arith.constant 0 : index
      %c0_57 = arith.constant 0 : index
      %61 = vector.load %arg7[%c0_54, %c0_55, %c0_56, %c0_57] : memref<1x1x288x128xf32, #tpu.memory_space<vmem>>, vector<1x1x288x128xf32>
      %62 = vector.shape_cast %61 : vector<1x1x288x128xf32> to vector<288x128xf32>
      %63 = vector.shape_cast %60 : vector<288x128xf32> to vector<1x1x288x128xf32>
      tpu.vector_store %arg7[%c0_54, %c0_55, %c0_56, %c0_57], %63 {strides = array<i32>} : memref<1x1x288x128xf32, #tpu.memory_space<vmem>>, vector<1x1x288x128xf32>,
    } else {
    }
    %c0_i32_50 = arith.constant 0 : i32
    %55 = arith.cmpi sgt, %arg2, %c0_i32_50 : i32
    %56 = arith.extui %55 : i1 to i32
    %c0_i32_51 = arith.constant 0 : i32
    %57 = arith.cmpi ne, %56, %c0_i32_51 : i32
    scf.if %57 {
      %c0_52 = arith.constant 0 : index
      %c0_53 = arith.constant 0 : index
      %c0_54 = arith.constant 0 : index
      %c0_55 = arith.constant 0 : index
      %58 = vector.load %arg7[%c0_52, %c0_53, %c0_54, %c0_55] : memref<1x1x288x128xf32, #tpu.memory_space<vmem>>, vector<1x1x288x128xf32>
      %59 = vector.shape_cast %58 : vector<1x1x288x128xf32> to vector<288x128xf32>
      %60 = arith.addf %59, %51 : vector<288x128xf32>
      %c0_56 = arith.constant 0 : index
      %c0_57 = arith.constant 0 : index
      %c0_58 = arith.constant 0 : index
      %c0_59 = arith.constant 0 : index
      %61 = vector.load %arg7[%c0_56, %c0_57, %c0_58, %c0_59] : memref<1x1x288x128xf32, #tpu.memory_space<vmem>>, vector<1x1x288x128xf32>
      %62 = vector.shape_cast %61 : vector<1x1x288x128xf32> to vector<288x128xf32>
      %63 = vector.shape_cast %60 : vector<288x128xf32> to vector<1x1x288x128xf32>
      tpu.vector_store %arg7[%c0_56, %c0_57, %c0_58, %c0_59], %63 {strides = array<i32>} : memref<1x1x288x128xf32, #tpu.memory_space<vmem>>, vector<1x1x288x128xf32>,
    } else {
    }
    return
  }
  func.func @transform_0(%arg0: i32, %arg1: i32, %arg2: i32) -> (i32, i32, i32, i32, i32) {
    %c0_i32 = arith.constant 0 : i32
    %c0_i32_0 = arith.constant 0 : i32
    %c0_i32_1 = arith.constant 0 : i32
    return %arg2, %arg0, %arg1, %c0_i32, %c0_i32_0 : i32, i32, i32, i32, i32
  }
  func.func @transform_1(%arg0: i32, %arg1: i32, %arg2: i32) -> (i32, i32, i32) {
    %c0_i32 = arith.constant 0 : i32
    %c0_i32_0 = arith.constant 0 : i32
    %c0_i32_1 = arith.constant 0 : i32
    %c0_i32_2 = arith.constant 0 : i32
    return %c0_i32, %c0_i32_0, %c0_i32_1 : i32, i32, i32
  }
  func.func @transform_2(%arg0: i32, %arg1: i32, %arg2: i32) -> (i32, i32, i32) {
    %c0_i32 = arith.constant 0 : i32
    %c0_i32_0 = arith.constant 0 : i32
    %c0_i32_1 = arith.constant 0 : i32
    %c0_i32_2 = arith.constant 0 : i32
    return %c0_i32, %c0_i32_0, %c0_i32_1 : i32, i32, i32
  }
  func.func @transform_3(%arg0: i32, %arg1: i32, %arg2: i32) -> (i32, i32) {
    %c0_i32 = arith.constant 0 : i32
    %c0_i32_0 = arith.constant 0 : i32
    %c0_i32_1 = arith.constant 0 : i32
    return %c0_i32, %c0_i32_0 : i32, i32
  }
  func.func @transform_4(%arg0: i32, %arg1: i32, %arg2: i32) -> (i32, i32, i32, i32) {
    %c0_i32 = arith.constant 0 : i32
    %c0_i32_0 = arith.constant 0 : i32
    %c0_i32_1 = arith.constant 0 : i32
    return %arg0, %arg1, %c0_i32, %c0_i32_0 : i32, i32, i32, i32
  }
}

</mosaic_0001>

<bundles_post_ra>
// kernel: tpu_custom_call.1
= control target key start
LH: loop header
LB: loop body
LE: loop exit
PB: predicated region body
PF: predicated region fallthrough
CT: control target
= control target key end

     0   :  { %9 = vsyncpa [#allocation3], 0  ;;  %s7355_s0 = inlined_call_operand.vmem [shape: bf16[2,2,1,328,4], index: 0, kind: input, shape index: {}]   ;;  %s7356_s1 = inlined_call_operand.vmem [shape: bf16[2,36,4], index: 1, kind: input, shape index: {}]   ;;  %s7357_s2 = inlined_call_operand.vmem [shape: bf16[2,4,128], index: 2, kind: input, shape index: {}]   ;;  %s7358_s3 = inlined_call_operand.vmem [shape: f32[1,128], index: 3, kind: input, shape index: {}]   ;;  %s7359_s4 = inlined_call_operand.hbm [shape: f32[2,1,288,128], index: 4, kind: output, shape index: {}]  }
   0x1   :  { %11 = vsyncpa [#allocation3 + $0x1], 0  ;;  %s5371_s15 = smov 0   ;;  %s5373_s16 = smov 0  }
   0x2   :  { %s5375_s17 = smov 0   ;;  %s5377_s18 = smov 0  }
   0x3   :  { %s5379_s19 = smov 0   ;;  %s5381_s20 = smov 0  }
   0x4   :  { %s5383_s21 = smov 0   ;;  %s5385_s22 = smov 0  }
   0x5 LB: > { %s4265_s23 = sadd.s32 4294967295, %s5341_s22   ;;  %s4266_s24 = sadd.s32 4294967294, %s5341_s22   ;;  %s5341_s22 = sphi %s5385_s22, %s17_s22   ;;  %s5337_s21 = sphi %s5383_s21, %s7467_s21   ;;  %s5333_s20 = sphi %s5381_s20, %s7466_s20   ;;  %s5329_s19 = sphi %s5379_s19, %s7465_s19   ;;  %s5325_s18 = sphi %s5377_s18, %s7464_s18   ;;  %s5321_s17 = sphi %s5375_s17, %s7463_s17   ;;  %s5317_s16 = sphi %s5373_s16, %s7462_s16   ;;  %s5313_s15 = sphi %s5371_s15, %s7461_s15  }
   0x6   : > { %s29_s25 = sadd.s32 1, %s5333_s20  ;;  %s36_s26 = sadd.s32 1, %s5337_s21 }
   0x7   : > { %p30_p0 = scmp.ge.s32.totalorder %s29_s25, 2  ;;  %p148_p1 = scmp.ne.s32.totalorder %s5321_s17, %s5317_s16 }
   0x8   : > { %p149_p2 = scmp.eq.s32.totalorder %s4265_s23, 3  ;;  %p154_p4 = scmp.ne.s32.totalorder %s5317_s16, %s5313_s15 }
   0x9   : > { %s7469_s25 = smov (%p30_p0, %s29_s25), 0  ;;  %s7471_s26 = smov (!%p30_p0, %s36_s26), %s5337_s21 }
   0xa   : > { %p5420_p3 = por %p149_p2, %p148_p1  ;;  %p38_p5 = scmp.ge.s32.totalorder %s7471_s26, 2 }
   0xb   : > { %p155_p6 = scmp.eq.s32.totalorder %s4266_s24, 3  ;;  %p4269_p7 = scmp.ge.s32.totalorder %s5341_s22, 1 }
   0xc   : > { %p198_p8 = scmp.lt.s32.totalorder %s5341_s22, 5  ;;  %s7473_s26 = smov (%p38_p5, %s7471_s26), 0 }
   0xd   : > { %p5430_p9 = por %p155_p6, %p154_p4  ;;  %s133_s29 = ssub.s32 %s5337_s21, %s7473_s26 }
   0xe   : > { %p199_p10 = pnand %p4269_p7, %p198_p8  ;;  %s138_s30 = sadd.s32 1, %s5321_s17 }
   0xf   : > { %p136_p11 = scmp.eq.s32.totalorder %s133_s29, 0 }
  0x10   : > { %202 = sbr.rel (%p199_p10) target bundleno = 872 (0x368), region = 36 }
  0x11   : > { %s5438_s5 = scalar_select %p136_p11, %s5321_s17, %s138_s30  }
  0x15   : > { %s229_s6 = sand.u32 1, %s5317_s16   ;;  %s4525_s7 = smul.u32 20, %s5325_s18  ;;  %vm592_vm0 = vcmask 1041408   ;;  %vm537_vm1 = vcmask 31744   ;;  %vm384_vm2 = vsmask.f32 7424 }
  0x16   : > { %s5444_s8 = smul.u32 288, %s229_s6  ;;  %p232_p12 = scmp.lt.s32.totalorder %s5325_s18, 1  ;;  %vm993_vm3 = vcmask 1046528   ;;  %vm1746_vm4 = vsmask.f32 6400  ;;  %vm2191_vm5 = vcmask 1045504  }
  0x17   : > { %s5450_s11 = scalar_lea.vmem %s7356_s1, %s4525_s7  ;;  %p234_p13 = scmp.lt.s32.totalorder %s5329_s19, 1  ;;  %vm2944_vm6 = vsmask.f32 5376  ;;  %vm3393_vm7 = vcmask 1044480  }
  0x18   : > { %v249_v0 = vld [vmem:[%s5450_s11] sm:$0xf]  ;;  %v250_v1 = vld [vmem:[%s5450_s11 + $0x4] sm:$0xf]  ;;  %s233_s12 = scalar_select %p232_p12, %s5325_s18, 1 }
  0x19   : > { %v4291_v2 = vcombine.low %v249_v0, %v249_v0  ;;  %5097 = vmatprep.subr.msk.bf16.mxu1 %vm592_vm0, %v249_v0  ;;  %v810_v3 = vsel %vm592_vm0, %v249_v0, 0  ;;  %v4366_v4 = vcombine.low %v250_v1, %v250_v1  ;;  %s235_s13 = scalar_select %p234_p13, %s5329_s19, 1  ;;  %v5460_v7 = vld [vmem:[%s5450_s11 + $0x8] sm:$0xf]  ;;  %v1086_v33 = vsel %vm592_vm0, %v250_v1, 0 }
  0x1a   : > { %4755 = vmatpush3.bf16.msra.mxu1 %v810_v3  ;;  %s5108_s14 = smul.u32 82, %s233_s12  ;;  %v4405_v9 = vcombine.low %v5460_v7, %v5460_v7  ;;  %s4500_s10 = sshll.u32 %s5325_s18, 1 }
  0x1b   : > { %v536_v5 = vrot.slane %v4291_v2, 2  ;;  %v1471_v6 = vrot.slane %v4366_v4, 2  ;;  %s5107_s23 = smul.u32 41, %s235_s13  ;;  %s3720_s13 = scalar_lea.vmem %s7357_s2, %s4500_s10 }
  0x1c   : > { %v5481_v14 = vrot.slane %v4405_v9, 2  ;;  %p4519_p0 = scmp.ne.s32.totalorder %s5325_s18, 0 }
  0x1d   : > { %5096 = vmatprep.subr.msk.bf16.mxu0 %vm592_vm0, %v536_v5  ;;  %v594_v8 = vsel %vm592_vm0, %v536_v5, 0  ;;  %5099 = vmatprep.subr.msk.bf16.mxu1 %vm592_vm0, %v1471_v6  ;;  %s242_s24 = sadd.s32 %s5108_s14, %s5107_s23  ;;  %v1527_v16 = vsel %vm592_vm0, %v1471_v6, 0  ;;  %s7068_s14 = scalar_lea.vmem [#allocation2], %s5444_s8 }
  0x1e   : > { %4717 = vmatpush3.bf16.msra.mxu0 %v594_v8  ;;  %s4270_s29 = sshll.u32 %s242_s24, 2 }
  0x1f   : > { %5098 = vmatprep.subr.msk.bf16.mxu0 %vm592_vm0, %v250_v1  ;;  %s5471_s9 = scalar_lea.vmem %s7355_s0, %s4270_s29 }
  0x20   : > { %v254_v10 = vld [vmem:[%s5471_s9] sm:$0xf]  ;;  %v5475_v11 = vld [vmem:[%s5471_s9 + $0x4] sm:$0xf]  ;;  %v5479_v13 = vld [vmem:[%s5471_s9 + $0x8] sm:$0xff]  }
  0x21   : > { %v4272_v12 = vcombine.low %v254_v10, %v5475_v11  ;;  %v5484_v15 = vld [vmem:[%s5471_s9 + $0x10] sm:$0xff]   ;;  %v393_v19 = vshll.u32 %v5479_v13, 16  ;;  %v397_v20 = vshrl.u32 %v5479_v13, 16  ;;  %v5494_v22 = vld [vmem:[%s5471_s9 + $0x18] sm:$0xff]   ;;  %v5498_v24 = vld [vmem:[%s5471_s9 + $0x20] sm:$0xff]  }
  0x22   : > { %v401_v21 = vshll.u32 %v5484_v15, 16  ;;  %v405_v23 = vshrl.u32 %v5484_v15, 16  ;;  %v409_v28 = vshll.u32 %v5494_v22, 16  ;;  %v417_v31 = vshll.u32 %v5498_v24, 16  ;;  %v5507_v32 = vld [vmem:[%s5471_s9 + $0x28] sm:$0xff]   ;;  %v5518_v42 = vld [vmem:[%s5471_s9 + $0x30] sm:$0xff]  }
  0x23   : > { %v386_v17 = vshrl.u32 %v4272_v12, 16  ;;  %v388_v18 = vshll.u32 %v4272_v12, 16  ;;  %4756 = vmatprep.mubr.msk.bf16.mxu1 %vm537_vm1, %v4272_v12  ;;  %v395_v26 = vrot.slane %v393_v19, 1  ;;  %v413_v36 = vshrl.u32 %v5494_v22, 16  ;;  %v5522_v44 = vld [vmem:[%s5471_s9 + $0x38] sm:$0xff]   ;;  %v5534_v50 = vld [vmem:[%s5471_s9 + $0x40] sm:$0xff]  }
  0x24   : > { %4757 = vmatmul.mubr.msk.bf16.vlgmr.msra.gmra.mxu1 %vm537_vm1, %v5479_v13  ;;  %v403_v27 = vrot.slane %v401_v21, 1  ;;  %v411_v35 = vrot.slane %v409_v28, 1  ;;  %v421_v39 = vshrl.u32 %v5498_v24, 16  ;;  %v425_v40 = vshll.u32 %v5507_v32, 16  ;;  %v5538_v52 = vld [vmem:[%s5471_s9 + $0x48] sm:$0xff]   ;;  %v5543_v55 = vld [vmem:[%s5471_s9 + $0x50] sm:$0xff]  }
  0x25   : > { %v390_v25 = vrot.slane %v388_v18, 1  ;;  %4760 = vmatprep.mubr.msk.bf16.mxu1 %vm537_vm1, %v5484_v15  ;;  %4831 = vmatpush3.bf16.msra.mxu1 %v1527_v16  ;;  %v399_v30 = vor.u32 %v397_v20, %v395_v26  ;;  %v419_v43 = vrot.slane %v417_v31, 1  ;;  %v429_v48 = vshrl.u32 %v5507_v32, 16  ;;  %v5547_v57 = vld [vmem:[%s5471_s9 + $0x58] sm:$0xff]   ;;  %v5550_v59 = vld [vmem:[%s5471_s9 + $0x60] sm:$0xff]   ;;  %v5558_v2 = vld [vmem:[%s5471_s9 + $0x68] sm:$0xff]  }
  0x26   : > { %5101 = vmatprep.subr.msk.bf16.mxu1 %vm592_vm0, %v5481_v14  ;;  %v407_v34 = vor.u32 %v405_v23, %v403_v27  ;;  %v415_v45 = vor.u32 %v413_v36, %v411_v35  ;;  %v427_v47 = vrot.slane %v425_v40, 1  ;;  %v433_v49 = vshll.u32 %v5518_v42, 16  ;;  %v5565_v5 = vld [vmem:[%s5471_s9 + $0x70] sm:$0xff]  }
  0x27   : > { %v391_v29 = vor.u32 %v390_v25, %v386_v17  ;;  %v404_v38 = vsel %vm384_vm2, %v399_v30, %v403_v27  ;;  %v423_v46 = vor.u32 %v421_v39, %v419_v43  ;;  %v441_v51 = vshll.u32 %v5522_v44, 16  ;;  %v5575_v17 = vld [vmem:[%s5471_s9 + $0x78] sm:$0xff]   ;;  %v989_v27 = vld [vmem:[%s5471_s9] sm:$0xe]  ;;  %v5601_v39 = vld [vmem:[%s5471_s9 + $0x88] sm:$0xff]  }
  0x28   : > { %v412_v41 = vsel %vm384_vm2, %v407_v34, %v411_v35  ;;  %v420_v53 = vsel %vm384_vm2, %v415_v45, %v419_v43  ;;  %v437_v54 = vshrl.u32 %v5518_v42, 16  ;;  %v435_v58 = vrot.slane %v433_v49, 1 }
  0x29   : > { %v396_v37 = vsel %vm384_vm2, %v391_v29, %v395_v26  ;;  %v428_v56 = vsel %vm384_vm2, %v423_v46, %v427_v47  ;;  %v431_v60 = vor.u32 %v429_v48, %v427_v47  ;;  %v443_v61 = vrot.slane %v441_v51, 1 }
  0x2a   : > { %4718 = vmatprep.mubr.msk.bf16.mxu0 %vm537_vm1, %v396_v37  ;;  %v449_v62 = vshll.u32 %v5534_v50, 16  ;;  %v457_v63 = vshll.u32 %v5538_v52, 16  ;;  %v439_v0 = vor.u32 %v437_v54, %v435_v58  ;;  %v465_v1 = vshll.u32 %v5543_v55, 16 }
  0x2b   : > { %4719 = vmatmul.mubr.msk.bf16.vlgmr.msra.gmra.mxu0 %vm537_vm1, %v404_v38  ;;  %v445_v3 = vshrl.u32 %v5522_v44, 16  ;;  %v473_v4 = vshll.u32 %v5547_v57, 16  ;;  %v453_v6 = vshrl.u32 %v5534_v50, 16  ;;  %v481_v8 = vshll.u32 %v5550_v59, 16 }
  0x2c   : > { %4793 = vmatpush3.bf16.msra.mxu0 %v1086_v33  ;;  %4722 = vmatprep.mubr.msk.bf16.mxu0 %vm537_vm1, %v412_v41  ;;  %v436_v9 = vsel %vm384_vm2, %v431_v60, %v435_v58  ;;  %v451_v10 = vrot.slane %v449_v62, 1  ;;  %v461_v12 = vshrl.u32 %v5538_v52, 16  ;;  %v469_v16 = vshrl.u32 %v5543_v55, 16  ;;  %v5590_v33 = vld [vmem:[%s5471_s9 + $0x80] sm:$0xff]  }
  0x2d   : > { %4761 = vmatmul.mubr.msk.bf16.gmra.mxu1 %vm537_vm1, %v5494_v22  ;;  %5100 = vmatprep.subr.msk.bf16.mxu0 %vm592_vm0, %v5460_v7  ;;  %v444_v18 = vsel %vm384_vm2, %v439_v0, %v443_v61  ;;  %v459_v19 = vrot.slane %v457_v63, 1  ;;  %v467_v20 = vrot.slane %v465_v1, 1  ;;  %v489_v21 = vshll.u32 %v5558_v2, 16  ;;  %v5635_v63 = vld [vmem:[%s5471_s9 + $0x90] ss:$0 sps:$4 sm:$0x11]  }
  0x2e   : > { %4764 = vmatprep.mubr.msk.bf16.mxu1 %vm537_vm1, %v5498_v24  ;;  %v5579_v23 = vrot.slane %v473_v4, 1  ;;  %v477_v25 = vshrl.u32 %v5547_v57, 16  ;;  %v497_v26 = vshll.u32 %v5565_v5, 16  ;;  %v995_v28 = vrot.slane %v5479_v13, 1 }
  0x2f   : > { %v5585_v29 = vrot.slane %v481_v8, 1  ;;  %v485_v30 = vshrl.u32 %v5550_v59, 16  ;;  %v493_v31 = vshrl.u32 %v5558_v2, 16  ;;  %v4328_v34 = vcombine.low %v989_v27, %v5475_v11  ;;  %v1301_v8 = vld [vmem:[%s5471_s9 + $0x8] sm:$0xe] }
  0x30   : > { %v447_v35 = vor.u32 %v445_v3, %v443_v61  ;;  %v505_v36 = vshll.u32 %v5575_v17, 16  ;;  %v997_v37 = vrot.slane %v5484_v15, 1  ;;  %v5597_v13 = vrot.slane %v489_v21, 1 }
  0x31   : > { %v501_v38 = vshrl.u32 %v5565_v5, 16  ;;  %v994_v40 = vrot.slane %v4328_v34, 1  ;;  %v455_v11 = vor.u32 %v453_v6, %v451_v10  ;;  %v5605_v41 = vrot.slane %v497_v26, 1 }
  0x32   : > { %v509_v43 = vshrl.u32 %v5575_v17, 16  ;;  %v5609_v45 = vsel %vm993_vm3, %v995_v28, %v997_v37  ;;  %v999_v46 = vrot.slane %v5494_v22, 1  ;;  %v1001_v47 = vrot.slane %v5498_v24, 1 }
  0x33   : > { %4723 = vmatmul.mubr.msk.bf16.gmra.mxu0 %vm537_vm1, %v420_v53  ;;  %v5614_v15 = vsel %vm993_vm3, %v994_v40, %v995_v28  ;;  %v452_v48 = vsel %vm384_vm2, %v447_v35, %v451_v10  ;;  %v463_v49 = vor.u32 %v461_v12, %v459_v19  ;;  %v5619_v51 = vrot.slane %v505_v36, 1 }
  0x34   : > { %4726 = vmatprep.mubr.msk.bf16.mxu0 %vm537_vm1, %v428_v56  ;;  %v513_v53 = vshll.u32 %v5590_v33, 16  ;;  %v5623_v54 = vsel %vm993_vm3, %v997_v37, %v999_v46  ;;  %v5626_v56 = vsel %vm993_vm3, %v999_v46, %v1001_v47  ;;  %v1003_v58 = vrot.slane %v5507_v32, 1 }
  0x35   : > { %4765 = vmatmul.mubr.msk.bf16.gmra.mxu1 %vm537_vm1, %v5507_v32  ;;  %v1005_v60 = vrot.slane %v5518_v42, 1  ;;  %v460_v22 = vsel %vm384_vm2, %v455_v11, %v459_v19  ;;  %v1007_v24 = vrot.slane %v5522_v44, 1  ;;  %v1009_v61 = vrot.slane %v5534_v50, 1  ;;  %v5698_v11 = vld [vmem:[%s5471_s9 + $0x18] sm:$0xff]  }
  0x36   : > { %4768 = vmatprep.mubr.msk.bf16.mxu1 %vm537_vm1, %v5518_v42  ;;  %v521_v62 = vshll.u32 %v5601_v39, 16  ;;  %v5638_v0 = vsel %vm993_vm3, %v1001_v47, %v1003_v58  ;;  %v468_v3 = vsel %vm384_vm2, %v463_v49, %v467_v20  ;;  %v471_v4 = vor.u32 %v469_v16, %v467_v20 }
  0x37   : > { %v5641_v1 = vsel %vm993_vm3, %v1003_v58, %v1005_v60  ;;  %v5645_v32 = vsel %vm993_vm3, %v1005_v60, %v1007_v24  ;;  %v5648_v42 = vsel %vm993_vm3, %v1007_v24, %v1009_v61  ;;  %v479_v6 = vor.u32 %v477_v25, %v5579_v23 }
  0x38   : > { %v517_v10 = vshrl.u32 %v5590_v33, 16  ;;  %v1015_v19 = vrot.slane %v5547_v57, 1  ;;  %v487_v16 = vor.u32 %v485_v30, %v5585_v29  ;;  %v495_v20 = vor.u32 %v493_v31, %v5597_v13 }
  0x39   : > { %v1017_v21 = vrot.slane %v5550_v59, 1  ;;  %v503_v25 = vor.u32 %v501_v38, %v5605_v41  ;;  %v523_v26 = vrot.slane %v521_v62, 1  ;;  %v529_v27 = vshll.u32 %v5635_v63, 16  ;;  %v5729_v62 = vld [vmem:[%s5471_s9 + $0x30] sm:$0xff]  }
  0x3a   : > { %v515_v34 = vrot.slane %v513_v53, 1  ;;  %v1019_v31 = vrot.slane %v5558_v2, 1  ;;  %v1021_v35 = vrot.slane %v5565_v5, 1  ;;  %v476_v36 = vsel %vm384_vm2, %v471_v4, %v5579_v23  ;;  %v5712_v53 = vld [vmem:[%s5471_s9 + $0x28] sm:$0xff]  }
  0x3b   : > { %4727 = vmatmul.mubr.msk.bf16.gmra.mxu0 %vm537_vm1, %v436_v9  ;;  %v5657_v9 = vld [vmem:[%s5471_s9 + $0xc] sm:$0xf]  ;;  %v5684_v30 = vsel %vm993_vm3, %v1015_v19, %v1017_v21  ;;  %v484_v37 = vsel %vm384_vm2, %v479_v6, %v5585_v29  ;;  %v5694_v38 = vsel %vm592_vm0, %v5460_v7, 0  ;;  %v511_v46 = vor.u32 %v509_v43, %v5619_v51 }
  0x3c   : > { %4730 = vmatprep.mubr.msk.bf16.mxu0 %vm537_vm1, %v444_v18  ;;  %v4347_v40 = vcombine.low %v1301_v8, %v5657_v9  ;;  %v519_v47 = vor.u32 %v517_v10, %v515_v34  ;;  %v5705_v49 = vsel %vm993_vm3, %v1017_v21, %v1019_v31  ;;  %v5708_v23 = vsel %vm993_vm3, %v1019_v31, %v1021_v35 }
  0x3d   : > { %4769 = vmatmul.mubr.msk.bf16.gmra.mxu1 %vm537_vm1, %v5522_v44  ;;  %v1011_v44 = vrot.slane %v5538_v52, 1  ;;  %v531_v29 = vrot.slane %v529_v27, 1  ;;  %v1023_v58 = vrot.slane %v5575_v17, 1  ;;  %v1025_v43 = vrot.slane %v5590_v33, 1 }
  0x3e   : > { %4772 = vmatprep.mubr.msk.bf16.mxu1 %vm537_vm1, %v5534_v50  ;;  %v1013_v50 = vrot.slane %v5543_v55, 1  ;;  %v492_v60 = vsel %vm384_vm2, %v487_v16, %v5597_v13  ;;  %v5725_v24 = vsel %vm384_vm2, %v503_v25, %v5619_v51  ;;  %v5743_v51 = vsel %vm384_vm2, %v511_v46, %v515_v34  ;;  %v2187_v34 = vld [vmem:[%s5471_s9 + $0x8] sm:$0xc] }
  0x3f   : > { %v5663_v12 = vsel %vm993_vm3, %v1009_v61, %v1011_v44  ;;  %v5735_v13 = vsel %vm993_vm3, %v1021_v35, %v1023_v58  ;;  %v1029_v4 = vrot.slane %v5635_v63, 1  ;;  %v5767_v63 = vld [vmem:[%s5450_s11 + $0xc] sm:$0xf]  ;;  %v1751_v27 = vshll.u32 %v4347_v40, 16 }
  0x40   : > { %v5666_v18 = vsel %vm993_vm3, %v1011_v44, %v1013_v50  ;;  %v5678_v28 = vsel %vm993_vm3, %v1013_v50, %v1015_v19  ;;  %v1431_v44 = vrot.slane %v4347_v40, 1  ;;  %v1434_v50 = vrot.slane %v5698_v11, 1 }
  0x41   : > { %v1748_v19 = vshrl.u32 %v4347_v40, 16  ;;  %v1768_v40 = vshll.u32 %v5698_v11, 16 }
  0x43   : > { %4731 = vmatmul.mubr.msk.bf16.gmra.mxu0 %vm537_vm1, %v452_v48  ;;  %v5702_v48 = vld [vmem:[%s5471_s9 + $0x20] sm:$0xff]  }
  0x44   : > { %4734 = vmatprep.mubr.msk.bf16.mxu0 %vm537_vm1, %v460_v22  ;;  %v5721_v22 = vsel %vm384_vm2, %v495_v20, %v5605_v41  ;;  %v5738_v41 = vsel %vm993_vm3, %v1023_v58, %v1025_v43  ;;  %v7360_v8 = vrot.slane %v5702_v48, 1 }
  0x45   : > { %4773 = vmatmul.mubr.msk.bf16.gmra.mxu1 %vm537_vm1, %v5538_v52  ;;  %v525_v52 = vshrl.u32 %v5601_v39, 16 }
  0x46   : > { %4776 = vmatprep.mubr.msk.bf16.mxu1 %vm537_vm1, %v5543_v55  ;;  %v5681_v55 = vld [vmem:[%s5471_s9 + $0x10] sm:$0xff]   ;;  %v5785_v46 = vsel %vm993_vm3, %v1434_v50, %v7360_v8 }
  0x47   : > { %v527_v7 = vor.u32 %v525_v52, %v523_v26  ;;  %v1432_v61 = vrot.slane %v5681_v55, 1  ;;  %v5764_v52 = vsel %vm592_vm0, %v5481_v14, 0  ;;  %v1756_v31 = vshrl.u32 %v5681_v55, 16 }
  0x48   : > { %v1759_v35 = vshll.u32 %v5681_v55, 16  ;;  %v1765_v14 = vshrl.u32 %v5698_v11, 16 }
  0x49   : > { %v5751_v6 = vsel %vm384_vm2, %v527_v7, %v531_v29  ;;  %v5770_v21 = vsel %vm993_vm3, %v1431_v44, %v1432_v61  ;;  %v5773_v25 = vsel %vm993_vm3, %v1432_v61, %v1434_v50  ;;  %v1758_v7 = vrot.slane %v1756_v31, 1 }
  0x4a   : > { %v1761_v29 = vrot.slane %v1759_v35, 2  ;;  %v1770_v61 = vrot.slane %v1768_v40, 2  ;;  %v4404_v44 = vcombine.low %v2187_v34, %v5657_v9  ;;  %v2197_v40 = vrot.slane %v5702_v48, 2 }
  0x4b   : > { %4735 = vmatmul.mubr.msk.bf16.gmra.mxu0 %vm537_vm1, %v468_v3  ;;  %v5746_v3 = vsel %vm384_vm2, %v519_v47, %v523_v26  ;;  %v1750_v26 = vrot.slane %v1748_v19, 1  ;;  %v1753_v47 = vrot.slane %v1751_v27, 2  ;;  %v5800_v19 = vld [vmem:[%s5471_s9 + $0x38] sm:$0xff]  }
  0x4c   : > { %4738 = vmatprep.mubr.msk.bf16.mxu0 %vm537_vm1, %v476_v36  ;;  %v4462_v36 = vcombine.low %v5767_v63, %v5767_v63  ;;  %v1762_v50 = vor.u32 %v1761_v29, %v1758_v7  ;;  %v2192_v31 = vrot.slane %v4404_v44, 2  ;;  %v2199_v7 = vrot.slane %v5712_v53, 2 }
  0x4d   : > { %4777 = vmatmul.mubr.msk.bf16.gmra.mxu1 %vm537_vm1, %v5547_v57  ;;  %v1027_v57 = vrot.slane %v5601_v39, 1  ;;  %v1792_v29 = vshrl.u32 %v5729_v62, 16  ;;  %v1804_v44 = vshll.u32 %v5800_v19, 16 }
  0x4e   : > { %4780 = vmatprep.mubr.msk.bf16.mxu1 %vm537_vm1, %v5550_v59  ;;  %v5789_v58 = vrot.slane %v4462_v36, 2 }
  0x4f   : > { %v5757_v16 = vsel %vm993_vm3, %v1025_v43, %v1027_v57  ;;  %v5760_v20 = vsel %vm993_vm3, %v1027_v57, %v1029_v4  ;;  %v1767_v43 = vrot.slane %v1765_v14, 1  ;;  %v2193_v57 = vrot.slane %v5681_v55, 2 }
  0x50   : > { %v1774_v4 = vshrl.u32 %v5702_v48, 16  ;;  %v1786_v55 = vshll.u32 %v5712_v53, 16 }
  0x51   : > { %v1771_v27 = vor.u32 %v1770_v61, %v1767_v43  ;;  %v5815_v35 = vsel %vm2191_vm5, %v2192_v31, %v2193_v57  ;;  %v1801_v61 = vshrl.u32 %v5800_v19, 16  ;;  %v1794_v31 = vrot.slane %v1792_v29, 1 }
  0x52   : > { %v1776_v34 = vrot.slane %v1774_v4, 1 }
  0x53   : > { %4739 = vmatmul.mubr.msk.bf16.gmra.mxu0 %vm537_vm1, %v484_v37  ;;  %v1754_v37 = vor.u32 %v1753_v47, %v1750_v26  ;;  %v1783_v26 = vshrl.u32 %v5712_v53, 16  ;;  %v1788_v47 = vrot.slane %v1786_v55, 2  ;;  %v1806_v55 = vrot.slane %v1804_v44, 2 }
  0x54   : > { %4742 = vmatprep.mubr.msk.bf16.mxu0 %vm537_vm1, %v492_v60  ;;  %v2195_v60 = vrot.slane %v5698_v11, 2  ;;  %v5812_v11 = vsel %vm1746_vm4, %v1762_v50, %v1771_v27 }
  0x55   : > { %4781 = vmatmul.mubr.msk.bf16.gmra.mxu1 %vm537_vm1, %v5558_v2  ;;  %v1777_v2 = vshll.u32 %v5702_v48, 16  ;;  %v5805_v9 = vsel %vm1746_vm4, %v1754_v37, %v1762_v50  ;;  %v1785_v14 = vrot.slane %v1783_v26, 1  ;;  %v1795_v37 = vshll.u32 %v5729_v62, 16  ;;  %v5828_v50 = vld [vmem:[%s5471_s9 + $0x40] sm:$0xff]  }
  0x56   : > { %4784 = vmatprep.mubr.msk.bf16.mxu1 %vm537_vm1, %v5565_v5  ;;  %v5808_v5 = vsel %vm2191_vm5, %v2193_v57, %v2195_v60  ;;  %v5831_v4 = vsel %vm2191_vm5, %v2195_v60, %v2197_v40  ;;  %v5847_v60 = vld [vmem:[%s5471_s9 + $0x50] sm:$0xff]  }
  0x57   : > { %v1779_v36 = vrot.slane %v1777_v2, 2  ;;  %v1789_v57 = vor.u32 %v1788_v47, %v1785_v14  ;;  %v5839_v2 = vld [vmem:[%s5471_s9 + $0x48] sm:$0xff]   ;;  %v2201_v14 = vrot.slane %v5729_v62, 2  ;;  %v1810_v47 = vshrl.u32 %v5828_v50, 16 }
  0x58   : > { %v1822_v59 = vshll.u32 %v5839_v2, 16  ;;  %v2207_v10 = vrot.slane %v5839_v2, 2 }
  0x59   : > { %v1780_v43 = vor.u32 %v1779_v36, %v1776_v34  ;;  %v1803_v34 = vrot.slane %v1801_v61, 1  ;;  %v1819_v61 = vshrl.u32 %v5839_v2, 16  ;;  %v1812_v44 = vrot.slane %v1810_v47, 1 }
  0x5b   : > { %4743 = vmatmul.mubr.msk.bf16.gmra.mxu0 %vm537_vm1, %v5721_v22  ;;  %v5834_v22 = vsel %vm2191_vm5, %v2197_v40, %v2199_v7  ;;  %v5842_v26 = vsel %vm1746_vm4, %v1771_v27, %v1780_v43  ;;  %v5850_v36 = vsel %vm1746_vm4, %v1780_v43, %v1789_v57  ;;  %v5856_v40 = vld [vmem:[%s5471_s9 + $0x58] sm:$0xff]   ;;  %v1807_v29 = vor.u32 %v1806_v55, %v1803_v34 }
  0x5c   : > { %4746 = vmatprep.mubr.msk.bf16.mxu0 %vm537_vm1, %v5725_v24  ;;  %v1797_v24 = vrot.slane %v1795_v37, 2  ;;  %7370 = vst [vmem:[#allocation5_spill] sm:$0xff] %v5850_v36  ;;  %v1813_v37 = vshll.u32 %v5828_v50, 16  ;;  %v1821_v34 = vrot.slane %v1819_v61, 1  ;;  %v1824_v55 = vrot.slane %v1822_v59, 2  ;;  %v5884_v59 = vld [vmem:[%s5471_s9 + $0x60] sm:$0xff]  }
  0x5d   : > { %4785 = vmatmul.mubr.msk.bf16.gmra.mxu1 %vm537_vm1, %v5575_v17  ;;  %v2203_v17 = vrot.slane %v5800_v19, 2 }
  0x5e   : > { %4788 = vmatprep.mubr.msk.bf16.mxu1 %vm537_vm1, %v5590_v33  ;;  %v1798_v27 = vor.u32 %v1797_v24, %v1794_v31  ;;  %v5861_v33 = vsel %vm2191_vm5, %v2199_v7, %v2201_v14  ;;  %v1815_v24 = vrot.slane %v1813_v37, 2  ;;  %v2205_v7 = vrot.slane %v5828_v50, 2 }
  0x5f   : > { %v5864_v43 = vsel %vm2191_vm5, %v2201_v14, %v2203_v17  ;;  %v1828_v14 = vshrl.u32 %v5847_v60, 16  ;;  %v1840_v37 = vshll.u32 %v5856_v40, 16  ;;  %v1825_v61 = vor.u32 %v1824_v55, %v1821_v34 }
  0x60   : > { %7371 = vst [vmem:[#allocation6_spill] sm:$0xff] %v5864_v43  ;;  %v5868_v8 = vsel %vm1746_vm4, %v1789_v57, %v1798_v27  ;;  %v5871_v31 = vsel %vm1746_vm4, %v1798_v27, %v1807_v29  ;;  %v1816_v47 = vor.u32 %v1815_v24, %v1812_v44  ;;  %v1831_v57 = vshll.u32 %v5847_v60, 16  ;;  %v5895_v24 = vld [vmem:[%s5471_s9 + $0x68] sm:$0xff]  }
  0x61   : > { %7372 = vst [vmem:[#allocation7_spill] sm:$0xff] %v5868_v8  ;;  %7373 = vst [vmem:[#allocation8_spill] sm:$0xff] %v5871_v31  ;;  %v1837_v27 = vshrl.u32 %v5856_v40, 16  ;;  %v5887_v31 = vsel %vm2191_vm5, %v2203_v17, %v2205_v7  ;;  %v1830_v44 = vrot.slane %v1828_v14, 1  ;;  %v1842_v36 = vrot.slane %v1840_v37, 2  ;;  %v5903_v17 = vld [vmem:[%s5471_s9 + $0x70] sm:$0xff]  }
  0x62   : > { %7374 = vst [vmem:[#allocation9_spill] sm:$0xff] %v5887_v31  ;;  %v5898_v43 = vsel %vm1746_vm4, %v1807_v29, %v1816_v47  ;;  %v5906_v34 = vsel %vm1746_vm4, %v1816_v47, %v1825_v61  ;;  %v2209_v55 = vrot.slane %v5847_v60, 2  ;;  %v5912_v14 = vld [vmem:[%s5471_s9 + $0x78] sm:$0xff]   ;;  %v1855_v37 = vshrl.u32 %v5895_v24, 16 }
  0x63   : > { %4747 = vmatmul.mubr.msk.bf16.gmra.mxu0 %vm537_vm1, %v5743_v51  ;;  %v5890_v51 = vsel %vm2191_vm5, %v2205_v7, %v2207_v10  ;;  %7376 = vst [vmem:[#allocation11_spill] sm:$0xff] %v5898_v43  ;;  %v1839_v8 = vrot.slane %v1837_v27, 1  ;;  %7377 = vst [vmem:[#allocation12_spill] sm:$0xff] %v5906_v34  ;;  %v1846_v7 = vshrl.u32 %v5884_v59, 16  ;;  %v1849_v27 = vshll.u32 %v5884_v59, 16 }
  0x64   : > { %4750 = vmatprep.mubr.msk.bf16.mxu0 %vm537_vm1, %v5746_v3  ;;  %7375 = vst [vmem:[#allocation10_spill] sm:$0xff] %v5890_v51  ;;  %v1833_v3 = vrot.slane %v1831_v57, 2  ;;  %v1858_v51 = vshll.u32 %v5895_v24, 16 }
  0x65   : > { %4789 = vmatmul.mubr.msk.bf16.gmra.mxu1 %vm537_vm1, %v5601_v39  ;;  %v2211_v39 = vrot.slane %v5856_v40, 2  ;;  %v1843_v57 = vor.u32 %v1842_v36, %v1839_v8  ;;  %v1848_v34 = vrot.slane %v1846_v7, 1  ;;  %v1851_v8 = vrot.slane %v1849_v27, 2 }
  0x66   : > { %4832 = vmatprep.mubr.msk.bf16.mxu1 %vm537_vm1, %v5770_v21  ;;  %v1834_v29 = vor.u32 %v1833_v3, %v1830_v44  ;;  %v5917_v21 = vsel %vm2191_vm5, %v2207_v10, %v2209_v55  ;;  %v1857_v36 = vrot.slane %v1855_v37, 1  ;;  %v1860_v3 = vrot.slane %v1858_v51, 2  ;;  %v5940_v51 = vld [vmem:[%s5471_s9 + $0x80] sm:$0xff]  }
  0x67   : > { %7378 = vst [vmem:[#allocation13_spill] sm:$0xff] %v5917_v21  ;;  %v5920_v47 = vsel %vm2191_vm5, %v2209_v55, %v2211_v39  ;;  %v2213_v10 = vrot.slane %v5884_v59, 2  ;;  %v2215_v21 = vrot.slane %v5895_v24, 2  ;;  %v1864_v55 = vshrl.u32 %v5903_v17, 16 }
  0x68   : > { %7379 = vst [vmem:[#allocation14_spill] sm:$0xff] %v5920_v47  ;;  %v5924_v43 = vsel %vm1746_vm4, %v1825_v61, %v1834_v29  ;;  %v5927_v44 = vsel %vm1746_vm4, %v1834_v29, %v1843_v57  ;;  %v1852_v7 = vor.u32 %v1851_v8, %v1848_v34  ;;  %v1867_v61 = vshll.u32 %v5903_v17, 16  ;;  %v5951_v34 = vld [vmem:[%s5471_s9 + $0x88] sm:$0xff]  }
  0x69   : > { %7380 = vst [vmem:[#allocation15_spill] sm:$0xff] %v5924_v43  ;;  %7381 = vst [vmem:[#allocation16_spill] sm:$0xff] %v5927_v44  ;;  %v1873_v47 = vshrl.u32 %v5912_v14, 16  ;;  %v1876_v29 = vshll.u32 %v5912_v14, 16  ;;  %v1861_v27 = vor.u32 %v1860_v3, %v1857_v36  ;;  %v5943_v37 = vsel %vm2191_vm5, %v2211_v39, %v2213_v10 }
  0x6a   : > { %v5946_v44 = vsel %vm2191_vm5, %v2213_v10, %v2215_v21  ;;  %v5954_v8 = vsel %vm1746_vm4, %v1843_v57, %v1852_v7  ;;  %v1869_v43 = vrot.slane %v1867_v61, 2  ;;  %v2217_v36 = vrot.slane %v5903_v17, 2 }
  0x6b   : > { %4751 = vmatmul.mubr.msk.bf16.gmra.mxu0 %vm537_vm1, %v5751_v6  ;;  %7382 = vst [vmem:[#allocation17_spill] sm:$0xff] %v5946_v44  ;;  %v1866_v6 = vrot.slane %v1864_v55, 1  ;;  %v1878_v31 = vrot.slane %v1876_v29, 2  ;;  %v5960_v39 = vsel %vm1746_vm4, %v1852_v7, %v1861_v27  ;;  %v1882_v3 = vshrl.u32 %v5940_v51, 16  ;;  %v5977_v29 = vld [vmem:[%s5471_s9 + $0x90] sm:$0xff]  }
  0x6c   : > { %4794 = vmatprep.mubr.msk.bf16.mxu0 %vm537_vm1, %v5614_v15  ;;  %v1875_v15 = vrot.slane %v1873_v47, 1  ;;  %7383 = vst [vmem:[#allocation18_spill] sm:$0xff] %v5960_v39  ;;  %v1885_v47 = vshll.u32 %v5940_v51, 16  ;;  %v1891_v55 = vshrl.u32 %v5951_v34, 16  ;;  %v1894_v61 = vshll.u32 %v5951_v34, 16 }
  0x6d   : > { %4833 = vmatmul.mubr.msk.bf16.vlgmr.msra.gmra.mxu1 %vm537_vm1, %v5773_v25  ;;  %v2219_v25 = vrot.slane %v5912_v14, 2  ;;  %v1870_v57 = vor.u32 %v1869_v43, %v1866_v6  ;;  %v1884_v7 = vrot.slane %v1882_v3, 1  ;;  %v7386_v39 = vrot.slane %v5712_v53, 1  ;;  %v5993_v44 = vld [vmem:[%s5471_s9 + $0x98] ss:$0 sps:$4 sm:$0x33]  }
  0x6e   : > { %4836 = vmatprep.mubr.msk.bf16.mxu1 %vm537_vm1, %v5785_v46  ;;  %4907 = vmatpush3.bf16.msra.mxu1 %v5764_v52  ;;  %v1879_v10 = vor.u32 %v1878_v31, %v1875_v15  ;;  %v5970_v52 = vsel %vm2191_vm5, %v2215_v21, %v2217_v36  ;;  %v1887_v6 = vrot.slane %v1885_v47, 2  ;;  %v1893_v15 = vrot.slane %v1891_v55, 1 }
  0x6f   : > { %5103 = vmatprep.subr.msk.bf16.mxu1 %vm592_vm0, %v5789_v58  ;;  %7384 = vst [vmem:[#allocation19_spill] sm:$0xff] %v5970_v52  ;;  %v5973_v46 = vsel %vm2191_vm5, %v2217_v36, %v2219_v25  ;;  %v5980_v43 = vsel %vm1746_vm4, %v1861_v27, %v1870_v57  ;;  %v7387_v21 = vrot.slane %v5702_v48, 1  ;;  %v2221_v3 = vrot.slane %v5940_v51, 2 }
  0x70   : > { %7385 = vst [vmem:[#allocation20_spill] sm:$0xff] %v5973_v46  ;;  %v5983_v31 = vsel %vm1746_vm4, %v1870_v57, %v1879_v10  ;;  %v1896_v46 = vrot.slane %v1894_v61, 2  ;;  %v2223_v52 = vrot.slane %v5951_v34, 2  ;;  %v7388_v27 = vrot.slane %v5729_v62, 1 }
  0x71   : > { %v1439_v36 = vsel %vm993_vm3, %v7387_v21, %v7386_v39  ;;  %v7389_v57 = vmov %v7386_v39  ;;  %v1888_v55 = vor.u32 %v1887_v6, %v1884_v7  ;;  %v1900_v48 = vshrl.u32 %v5977_v29, 16 }
  0x72   : > { %v1441_v47 = vsel %vm993_vm3, %v7389_v57, %v7388_v27  ;;  %v1903_v39 = vshll.u32 %v5977_v29, 16  ;;  %v1897_v61 = vor.u32 %v1896_v46, %v1893_v15  ;;  %v6008_v21 = vsel %vm2191_vm5, %v2219_v25, %v2221_v3 }
  0x73   : > { %4795 = vmatmul.mubr.msk.bf16.vlgmr.msra.gmra.mxu0 %vm537_vm1, %v5609_v45  ;;  %v6011_v45 = vsel %vm2191_vm5, %v2221_v3, %v2223_v52  ;;  %v1909_v53 = vshrl.u32 %v5993_v44, 16  ;;  %v6018_v7 = vsel %vm1746_vm4, %v1879_v10, %v1888_v55  ;;  %v1442_v25 = vrot.slane %v5800_v19, 1 }
  0x74   : > { %4869 = vmatpush3.bf16.msra.mxu0 %v5694_v38  ;;  %4798 = vmatprep.mubr.msk.bf16.mxu0 %vm537_vm1, %v5623_v54  ;;  %v1902_v38 = vrot.slane %v1900_v48, 1  ;;  %v1905_v6 = vrot.slane %v1903_v39, 2  ;;  %v1912_v54 = vshll.u32 %v5993_v44, 16  ;;  %v6024_v46 = vsel %vm1746_vm4, %v1888_v55, %v1897_v61 }
  0x75   : > { %4837 = vmatmul.mubr.msk.bf16.gmra.mxu1 %vm537_vm1, %v1439_v36  ;;  %5102 = vmatprep.subr.msk.bf16.mxu0 %vm592_vm0, %v5767_v63  ;;  %v1911_v15 = vrot.slane %v1909_v53, 1  ;;  %v1444_v36 = vrot.slane %v5828_v50, 1  ;;  %v2225_v48 = vrot.slane %v5977_v29, 2  ;;  %v7390_v39 = vrot.slane %v5729_v62, 1 }
  0x76   : > { %4840 = vmatprep.mubr.msk.bf16.mxu1 %vm537_vm1, %v1441_v47  ;;  %v1906_v3 = vor.u32 %v1905_v6, %v1902_v38  ;;  %v1914_v27 = vrot.slane %v1912_v54, 2  ;;  %v1446_v62 = vrot.slane %v5839_v2, 1  ;;  %v1452_v2 = vrot.slane %v5884_v59, 1  ;;  %v7403_v38 = vld [vmem:[#allocation17_spill] sm:$0xff]  ;;  %v7404_v6 = vld [vmem:[#allocation19_spill] sm:$0xff] }
  0x77   : > { %v1443_v47 = vsel %vm993_vm3, %v7390_v39, %v1442_v25  ;;  %v1445_v19 = vsel %vm993_vm3, %v1442_v25, %v1444_v36  ;;  %v6043_v50 = vsel %vm2191_vm5, %v2223_v52, %v2225_v48  ;;  %v5224_v52 = vld [vmem:[%s5471_s9 + $0x98] ss:$0 sps:$4 sm:$0x11]   ;;  %v2503_v54 = vld [vmem:[%s5471_s9 + $0x10] sm:$0xc] }
  0x78   : > { %v6028_v57 = vsel %vm1746_vm4, %v1897_v61, %v1906_v3  ;;  %v1915_v10 = vor.u32 %v1914_v27, %v1911_v15  ;;  %v1447_v61 = vsel %vm993_vm3, %v1444_v36, %v1446_v62  ;;  %v6167_v25 = vld [vmem:[%s5471_s9 + $0x14] sm:$0xf]  ;;  %v7405_v15 = vld [vmem:[#allocation18_spill] sm:$0xff]  ;;  %v6175_v36 = vld [vmem:[%s5471_s9 + $0x18] sm:$0xff]  }
  0x7a   : > { %v6038_v55 = vsel %vm1746_vm4, %v1906_v3, %v1915_v10  ;;  %v7406_v3 = vld [vmem:[#allocation20_spill] sm:$0xff] }
  0x7b   : > { %4799 = vmatmul.mubr.msk.bf16.gmra.mxu0 %vm537_vm1, %v5626_v56  ;;  %v1448_v56 = vrot.slane %v5847_v60, 1 }
  0x7c   : > { %4802 = vmatprep.mubr.msk.bf16.mxu0 %vm537_vm1, %v5638_v0  ;;  %v1450_v0 = vrot.slane %v5856_v40, 1  ;;  %v1456_v40 = vrot.slane %v5903_v17, 1 }
  0x7d   : > { %4841 = vmatmul.mubr.msk.bf16.gmra.mxu1 %vm537_vm1, %v1443_v47  ;;  %v1449_v53 = vsel %vm993_vm3, %v1446_v62, %v1448_v56  ;;  %v2954_v47 = vshrl.u32 %v6175_v36, 16 }
  0x7e   : > { %4844 = vmatprep.mubr.msk.bf16.mxu1 %vm537_vm1, %v1445_v19  ;;  %v1451_v60 = vsel %vm993_vm3, %v1448_v56, %v1450_v0  ;;  %v2957_v19 = vshll.u32 %v6175_v36, 16 }
  0x83   : > { %4803 = vmatmul.mubr.msk.bf16.gmra.mxu0 %vm537_vm1, %v5641_v1  ;;  %v1453_v1 = vsel %vm993_vm3, %v1450_v0, %v1452_v2 }
  0x84   : > { %4806 = vmatprep.mubr.msk.bf16.mxu0 %vm537_vm1, %v5645_v32  ;;  %v1454_v32 = vrot.slane %v5895_v24, 1  ;;  %v1460_v24 = vrot.slane %v5940_v51, 1 }
  0x85   : > { %4845 = vmatmul.mubr.msk.bf16.gmra.mxu1 %vm537_vm1, %v1447_v61 }
  0x86   : > { %4848 = vmatprep.mubr.msk.bf16.mxu1 %vm537_vm1, %v1449_v53  ;;  %v1455_v59 = vsel %vm993_vm3, %v1452_v2, %v1454_v32  ;;  %v2956_v2 = vrot.slane %v2954_v47, 2  ;;  %v6247_v47 = vld [vmem:[%s5471_s9 + $0x40] sm:$0xff]  }
  0x8b   : > { %4807 = vmatmul.mubr.msk.bf16.gmra.mxu0 %vm537_vm1, %v5648_v42  ;;  %v1457_v42 = vsel %vm993_vm3, %v1454_v32, %v1456_v40 }
  0x8c   : > { %4810 = vmatprep.mubr.msk.bf16.mxu0 %vm537_vm1, %v5663_v12  ;;  %v1458_v12 = vrot.slane %v5912_v14, 1  ;;  %v1464_v14 = vrot.slane %v5977_v29, 1 }
  0x8d   : > { %4849 = vmatmul.mubr.msk.bf16.gmra.mxu1 %vm537_vm1, %v1451_v60  ;;  %v6193_v60 = vld [vmem:[%s5471_s9 + $0x28] sm:$0xff]  }
  0x8e   : > { %4852 = vmatprep.mubr.msk.bf16.mxu1 %vm537_vm1, %v1453_v1  ;;  %v1459_v17 = vsel %vm993_vm3, %v1456_v40, %v1458_v12 }
  0x93   : > { %4811 = vmatmul.mubr.msk.bf16.gmra.mxu0 %vm537_vm1, %v5666_v18  ;;  %v1461_v18 = vsel %vm993_vm3, %v1458_v12, %v1460_v24 }
  0x94   : > { %4814 = vmatprep.mubr.msk.bf16.mxu0 %vm537_vm1, %v5678_v28  ;;  %v1462_v28 = vrot.slane %v5951_v34, 1 }
  0x95   : > { %4853 = vmatmul.mubr.msk.bf16.gmra.mxu1 %vm537_vm1, %v1455_v59 }
  0x96   : > { %4856 = vmatprep.mubr.msk.bf16.mxu1 %vm537_vm1, %v1457_v42  ;;  %v1463_v51 = vsel %vm993_vm3, %v1460_v24, %v1462_v28 }
  0x9b   : > { %4815 = vmatmul.mubr.msk.bf16.gmra.mxu0 %vm537_vm1, %v5684_v30  ;;  %v1465_v30 = vsel %vm993_vm3, %v1462_v28, %v1464_v14  ;;  %v2972_v28 = vshrl.u32 %v6193_v60, 16 }
  0x9c   : > { %4818 = vmatprep.mubr.msk.bf16.mxu0 %vm537_vm1, %v5705_v49  ;;  %v1466_v49 = vrot.slane %v5224_v52, 1 }
  0x9d   : > { %4857 = vmatmul.mubr.msk.bf16.gmra.mxu1 %vm537_vm1, %v1459_v17 }
  0x9e   : > { %4860 = vmatprep.mubr.msk.bf16.mxu1 %vm537_vm1, %v1461_v18  ;;  %v1467_v34 = vsel %vm993_vm3, %v1464_v14, %v1466_v49 }
  0xa3   : > { %4819 = vmatmul.mubr.msk.bf16.gmra.mxu0 %vm537_vm1, %v5708_v23  ;;  %v3174_v23 = vsel %vm592_vm0, %v5789_v58, 0  ;;  %v7394_v58 = vld [vmem:[#allocation9_spill] sm:$0xff] }
  0xa4   : > { %4822 = vmatprep.mubr.msk.bf16.mxu0 %vm537_vm1, %v5735_v13  ;;  %v2725_v13 = vsel %vm592_vm0, %v5767_v63, 0  ;;  %v7393_v63 = vld [vmem:[#allocation6_spill] sm:$0xff] }
  0xa5   : > { %4861 = vmatmul.mubr.msk.bf16.gmra.mxu1 %vm537_vm1, %v1463_v51 }
  0xa6   : > { %4864 = vmatprep.mubr.msk.bf16.mxu1 %vm537_vm1, %v1465_v30 }
  0xab   : > { %4823 = vmatmul.mubr.msk.bf16.gmra.mxu0 %vm537_vm1, %v5738_v41  ;;  %v6121_v41 = vld [vmem:[%s5450_s11 + $0x10] sm:$0x3] }
  0xac   : > { %4826 = vmatprep.mubr.msk.bf16.mxu0 %vm537_vm1, %v5757_v16  ;;  %v7391_v16 = vld [vmem:[#allocation5_spill] sm:$0xff] }
  0xad   : > { %4865 = vmatmul.mubr.msk.bf16.gmra.mxu1 %vm537_vm1, %v1467_v34  ;;  %v6218_v34 = vld [vmem:[%s5471_s9 + $0x30] sm:$0xff]  }
  0xae   : > { %4908 = vmatprep.mubr.msk.bf16.mxu1 %vm537_vm1, %v5815_v35  ;;  %v7398_v35 = vld [vmem:[#allocation13_spill] sm:$0xff] }
  0xb3   : > { %4827 = vmatmul.mubr.msk.bf16.gmra.mxu0 %vm537_vm1, %v5760_v20  ;;  %v7392_v20 = vld [vmem:[#allocation7_spill] sm:$0xff] }
  0xb4   : > { %4870 = vmatprep.mubr.msk.bf16.mxu0 %vm537_vm1, %v5805_v9  ;;  %v7395_v9 = vld [vmem:[#allocation8_spill] sm:$0xff] }
  0xb5   : > { %4909 = vmatmul.mubr.msk.bf16.vlgmr.msra.gmra.mxu1 %vm537_vm1, %v5808_v5  ;;  %v7396_v5 = vld [vmem:[#allocation11_spill] sm:$0xff] }
  0xb6   : > { %4912 = vmatprep.mubr.msk.bf16.mxu1 %vm537_vm1, %v5831_v4  ;;  %4983 = vmatpush3.bf16.msra.mxu1 %v3174_v23  ;;  %v7399_v4 = vld [vmem:[#allocation12_spill] sm:$0xff] }
  0xbb   : > { %4871 = vmatmul.mubr.msk.bf16.vlgmr.msra.gmra.mxu0 %vm537_vm1, %v5812_v11  ;;  %v7397_v11 = vld [vmem:[#allocation10_spill] sm:$0xff] }
  0xbc   : > { %4945 = vmatpush3.bf16.msra.mxu0 %v2725_v13  ;;  %4874 = vmatprep.mubr.msk.bf16.mxu0 %vm537_vm1, %v5842_v26  ;;  %v7401_v26 = vld [vmem:[#allocation14_spill] sm:$0xff] }
  0xbd   : > { %4913 = vmatmul.mubr.msk.bf16.gmra.mxu1 %vm537_vm1, %v5834_v22  ;;  %5104 = vmatprep.subr.msk.bf16.mxu0 %vm592_vm0, %v6121_v41  ;;  %v7400_v22 = vld [vmem:[#allocation15_spill] sm:$0xff] }
  0xbe   : > { %4916 = vmatprep.mubr.msk.bf16.mxu1 %vm537_vm1, %v5861_v33  ;;  %v7402_v33 = vld [vmem:[#allocation16_spill] sm:$0xff] }
  0xc3   : > { %4875 = vmatmul.mubr.msk.bf16.gmra.mxu0 %vm537_vm1, %v7391_v16 }
  0xc4   : > { %4878 = vmatprep.mubr.msk.bf16.mxu0 %vm537_vm1, %v7392_v20  ;;  %v2974_v20 = vrot.slane %v2972_v28, 2 }
  0xc5   : > { %4917 = vmatmul.mubr.msk.bf16.gmra.mxu1 %vm537_vm1, %v7393_v63 }
  0xc6   : > { %4920 = vmatprep.mubr.msk.bf16.mxu1 %vm537_vm1, %v7394_v58  ;;  %v6224_v58 = vld [vmem:[%s5471_s9 + $0x38] sm:$0xff]  }
  0xcb   : > { %4879 = vmatmul.mubr.msk.bf16.gmra.mxu0 %vm537_vm1, %v7395_v9 }
  0xcc   : > { %4882 = vmatprep.mubr.msk.bf16.mxu0 %vm537_vm1, %v7396_v5 }
  0xcd   : > { %4921 = vmatmul.mubr.msk.bf16.gmra.mxu1 %vm537_vm1, %v7397_v11 }
  0xce   : > { %4924 = vmatprep.mubr.msk.bf16.mxu1 %vm537_vm1, %v7398_v35 }
  0xd3   : > { %4883 = vmatmul.mubr.msk.bf16.gmra.mxu0 %vm537_vm1, %v7399_v4  ;;  %v2981_v4 = vshrl.u32 %v6218_v34, 16 }
  0xd4   : > { %4886 = vmatprep.mubr.msk.bf16.mxu0 %vm537_vm1, %v7400_v22  ;;  %v2984_v22 = vshll.u32 %v6218_v34, 16 }
  0xd5   : > { %4925 = vmatmul.mubr.msk.bf16.gmra.mxu1 %vm537_vm1, %v7401_v26 }
  0xd6   : > { %4928 = vmatprep.mubr.msk.bf16.mxu1 %vm537_vm1, %v5943_v37  ;;  %v6172_v37 = vcombine.low %v2503_v54, %v6167_v25 }
  0xd8   : > { %v2946_v10 = vshrl.u32 %v6172_v37, 16  ;;  %v2949_v39 = vshll.u32 %v6172_v37, 16  ;;  %v2633_v5 = vrot.slane %v6172_v37, 2 }
  0xda   : > { %v2948_v53 = vrot.slane %v2946_v10, 2  ;;  %v2951_v0 = vrot.slane %v2949_v39, 3  ;;  %v2983_v10 = vrot.slane %v2981_v4, 2  ;;  %v2986_v39 = vrot.slane %v2984_v22, 3 }
  0xdb   : > { %4887 = vmatmul.mubr.msk.bf16.gmra.mxu0 %vm537_vm1, %v7402_v33 }
  0xdc   : > { %4890 = vmatprep.mubr.msk.bf16.mxu0 %vm537_vm1, %v5954_v8 }
  0xdd   : > { %4929 = vmatmul.mubr.msk.bf16.gmra.mxu1 %vm537_vm1, %v7403_v38  ;;  %v2990_v38 = vshrl.u32 %v6224_v58, 16 }
  0xde   : > { %4932 = vmatprep.mubr.msk.bf16.mxu1 %vm537_vm1, %v7404_v6  ;;  %v2993_v6 = vshll.u32 %v6224_v58, 16 }
  0xe3   : > { %4891 = vmatmul.mubr.msk.bf16.gmra.mxu0 %vm537_vm1, %v7405_v15 }
  0xe4   : > { %4894 = vmatprep.mubr.msk.bf16.mxu0 %vm537_vm1, %v5980_v43  ;;  %v4758_v8 = vpop.f32.mrf.mxu1  ;;  %v6188_v43 = vld [vmem:[%s5471_s9 + $0x20] sm:$0xff]  }
  0xe5   : > { %4933 = vmatmul.mubr.msk.bf16.gmra.mxu1 %vm537_vm1, %v7406_v3  ;;  %v2963_v42 = vshrl.u32 %v6188_v43, 16  ;;  %v2966_v12 = vshll.u32 %v6188_v43, 16 }
  0xe6   : > { %v846_v27 = vpop.f32.mrf.mxu1  ;;  %4936 = vmatprep.mubr.msk.bf16.mxu1 %vm537_vm1, %v6008_v21  ;;  %v2959_v21 = vrot.slane %v2957_v19, 3 }
  0xe7   : > { %v2965_v30 = vrot.slane %v2963_v42, 2  ;;  %v2968_v49 = vrot.slane %v2966_v12, 3  ;;  %v2987_v42 = vor.u32 %v2986_v39, %v2983_v10  ;;  %v2999_v12 = vshrl.u32 %v6247_v47, 16 }
  0xe8   : > { %v4759_v62 = vpop.f32.mrf.mxu1  ;;  %v2960_v18 = vor.u32 %v2959_v21, %v2956_v2  ;;  %v2636_v21 = vrot.slane %v6188_v43, 2 }
  0xe9   : > { %v2969_v35 = vor.u32 %v2968_v49, %v2965_v30  ;;  %v3486_v30 = vsel %vm592_vm0, %v6121_v41, 0  ;;  %v6283_v41 = vld [vmem:[%s5471_s9 + $0x58] sm:$0xff]  }
  0xea   : > { %v849_v56 = vpop.f32.mrf.mxu1 }
  0xeb   : > { %v4720_v61 = vpop.f32.mrf.mxu0  ;;  %4895 = vmatmul.mubr.msk.bf16.gmra.mxu0 %vm537_vm1, %v5983_v31  ;;  %v2227_v31 = vrot.slane %v5993_v44, 2 }
  0xec   : > { %v6195_v1 = vadd.f32 %v4758_v8, %v4720_v61  ;;  %4898 = vmatprep.mubr.msk.bf16.mxu0 %vm537_vm1, %v6018_v7  ;;  %v2952_v7 = vor.u32 %v2951_v0, %v2948_v53  ;;  %v2992_v61 = vrot.slane %v2990_v38, 2  ;;  %v2995_v53 = vrot.slane %v2993_v6, 3  ;;  %v6253_v0 = vld [vmem:[%s5471_s9 + $0x48] sm:$0xff]  }
  0xed   : > { %v630_v32 = vpop.f32.mrf.mxu0  ;;  %v4762_v40 = vpop.f32.mrf.mxu1  ;;  %4937 = vmatmul.mubr.msk.bf16.gmra.mxu1 %vm537_vm1, %v6011_v45  ;;  %v2975_v45 = vshll.u32 %v6193_v60, 16  ;;  %v2228_v52 = vsel %vm2191_vm5, %v2225_v48, %v2227_v31  ;;  %v2638_v31 = vrot.slane %v6193_v60, 2  ;;  %v3008_v28 = vshrl.u32 %v6253_v0, 16 }
  0xee   : > { %v6201_v59 = vadd.f32 %v846_v27, %v630_v32  ;;  %4940 = vmatprep.mubr.msk.bf16.mxu1 %vm537_vm1, %v6043_v50  ;;  %v2961_v16 = vsel %vm2944_vm6, %v2952_v7, %v2960_v18  ;;  %v2970_v27 = vsel %vm2944_vm6, %v2960_v18, %v2969_v35  ;;  %v2996_v18 = vor.u32 %v2995_v53, %v2992_v61 }
  0xef   : > { %v4721_v24 = vpop.f32.mrf.mxu0  ;;  %v862_v17 = vpop.f32.mrf.mxu1  ;;  %v2977_v63 = vrot.slane %v2975_v45, 3  ;;  %v3011_v45 = vshll.u32 %v6253_v0, 16  ;;  %v2642_v38 = vrot.slane %v6224_v58, 2 }
  0xf0   : > { %v6210_v14 = vadd.f32 %v4759_v62, %v4721_v24  ;;  %v3002_v24 = vshll.u32 %v6247_v47, 16 }
  0xf1   : > { %v633_v50 = vpop.f32.mrf.mxu0  ;;  %v4763_v51 = vpop.f32.mrf.mxu1  ;;  %v2978_v33 = vor.u32 %v2977_v63, %v2974_v20  ;;  %v3001_v20 = vrot.slane %v2999_v12, 2  ;;  %v3013_v4 = vrot.slane %v3011_v45, 3 }
  0xf2   : > { %v6212_v44 = vadd.f32 %v849_v56, %v633_v50  ;;  %v3004_v63 = vrot.slane %v3002_v24, 3 }
  0xf3   : > { %v4724_v23 = vpop.f32.mrf.mxu0  ;;  %4899 = vmatmul.mubr.msk.bf16.gmra.mxu0 %vm537_vm1, %v6024_v46  ;;  %v865_v13 = vpop.f32.mrf.mxu1  ;;  %v2634_v46 = vrot.slane %v6175_v36, 2  ;;  %v2979_v56 = vsel %vm2944_vm6, %v2969_v35, %v2978_v33  ;;  %v3010_v35 = vrot.slane %v3008_v28, 2 }
  0xf4   : > { %v6226_v9 = vadd.f32 %v4762_v40, %v4724_v23  ;;  %4902 = vmatprep.mubr.msk.bf16.mxu0 %vm537_vm1, %v6028_v57  ;;  %v2639_v23 = vsel %vm2191_vm5, %v2636_v21, %v2638_v31 }
  0xf5   : > { %v646_v29 = vpop.f32.mrf.mxu0  ;;  %v4766_v48 = vpop.f32.mrf.mxu1  ;;  %4941 = vmatmul.mubr.msk.bf16.gmra.mxu1 %vm537_vm1, %v2228_v52  ;;  %v2635_v8 = vsel %vm2191_vm5, %v2633_v5, %v2634_v46  ;;  %v3014_v39 = vor.u32 %v3013_v4, %v3010_v35 }
  0xf6   : > { %v6233_v11 = vadd.f32 %v862_v17, %v646_v29  ;;  %4984 = vmatprep.mubr.msk.bf16.mxu1 %vm537_vm1, %v2961_v16  ;;  %v2988_v16 = vsel %vm2944_vm6, %v2978_v33, %v2987_v42  ;;  %v6278_v29 = vld [vmem:[%s5471_s9 + $0x50] sm:$0xff]  }
  0xf7   : > { %v4725_v26 = vpop.f32.mrf.mxu0  ;;  %v878_v57 = vpop.f32.mrf.mxu1 }
  0xf8   : > { %v6240_v54 = vadd.f32 %v4763_v51, %v4725_v26  ;;  %v2637_v51 = vsel %vm2191_vm5, %v2634_v46, %v2636_v21  ;;  %v2997_v46 = vsel %vm2944_vm6, %v2987_v42, %v2996_v18  ;;  %v2640_v26 = vrot.slane %v6218_v34, 2 }
  0xf9   : > { %v649_v15 = vpop.f32.mrf.mxu0  ;;  %v4767_v37 = vpop.f32.mrf.mxu1 }
  0xfa   : > { %v6243_v3 = vadd.f32 %v865_v13, %v649_v15  ;;  %v3005_v15 = vor.u32 %v3004_v63, %v3001_v20  ;;  %v2641_v61 = vsel %vm2191_vm5, %v2638_v31, %v2640_v26 }
  0xfb   : > { %v4728_v19 = vpop.f32.mrf.mxu0  ;;  %4903 = vmatmul.mubr.msk.bf16.gmra.mxu0 %vm537_vm1, %v6038_v55  ;;  %v881_v62 = vpop.f32.mrf.mxu1 }
  0xfc   : > { %v6255_v2 = vadd.f32 %v4766_v48, %v4728_v19  ;;  %4946 = vmatprep.mubr.msk.bf16.mxu0 %vm537_vm1, %v2635_v8  ;;  %v3020_v8 = vshll.u32 %v6278_v29, 16  ;;  %v3026_v19 = vshrl.u32 %v6283_v41, 16  ;;  %v3006_v42 = vsel %vm2944_vm6, %v2996_v18, %v3005_v15 }
  0xfd   : > { %v662_v32 = vpop.f32.mrf.mxu0  ;;  %v4770_v40 = vpop.f32.mrf.mxu1  ;;  %4985 = vmatmul.mubr.msk.bf16.vlgmr.msra.gmra.mxu1 %vm537_vm1, %v2970_v27  ;;  %v3015_v45 = vsel %vm2944_vm6, %v3005_v15, %v3014_v39  ;;  %v2644_v18 = vrot.slane %v6247_v47, 2 }
  0xfe   : > { %v6261_v55 = vadd.f32 %v878_v57, %v662_v32  ;;  %4988 = vmatprep.mubr.msk.bf16.mxu1 %vm537_vm1, %v2979_v56  ;;  %v2643_v32 = vsel %vm2191_vm5, %v2640_v26, %v2642_v38  ;;  %v3022_v24 = vrot.slane %v3020_v8, 3 }
  0xff   : > { %v4729_v17 = vpop.f32.mrf.mxu0  ;;  %v894_v7 = vpop.f32.mrf.mxu1  ;;  %v2645_v15 = vsel %vm2191_vm5, %v2642_v38, %v2644_v18 }
 0x100   : > { %v6268_v50 = vadd.f32 %v4767_v37, %v4729_v17  ;;  %v3017_v37 = vshrl.u32 %v6278_v29, 16  ;;  %v6306_v17 = vld [vmem:[%s5471_s9 + $0x60] sm:$0xff]  }
 0x101   : > { %v665_v52 = vpop.f32.mrf.mxu0  ;;  %v4771_v49 = vpop.f32.mrf.mxu1  ;;  %7407 = vst [vmem:[#allocation5_spill] sm:$0xff] %v6306_v17 }
 0x102   : > { %v6274_v13 = vadd.f32 %v881_v62, %v665_v52  ;;  %v3029_v62 = vshll.u32 %v6283_v41, 16  ;;  %v3019_v12 = vrot.slane %v3017_v37, 2  ;;  %v6311_v52 = vld [vmem:[%s5471_s9 + $0x68] sm:$0xff]  }
 0x103   : > { %v4732_v48 = vpop.f32.mrf.mxu0  ;;  %4947 = vmatmul.mubr.msk.bf16.vlgmr.msra.gmra.mxu0 %vm537_vm1, %v2637_v51  ;;  %v897_v5 = vpop.f32.mrf.mxu1  ;;  %v3028_v51 = vrot.slane %v3026_v19, 2  ;;  %7408 = vst [vmem:[#allocation7_spill] sm:$0xff] %v6311_v52  ;;  %v3044_v26 = vshrl.u32 %v6311_v52, 16 }
 0x104   : > { %v6285_v22 = vadd.f32 %v4770_v40, %v4732_v48  ;;  %5021 = vmatpush3.bf16.msra.mxu0 %v3486_v30  ;;  %4950 = vmatprep.mubr.msk.bf16.mxu0 %vm537_vm1, %v2639_v23  ;;  %v3031_v31 = vrot.slane %v3029_v62, 3  ;;  %v3023_v63 = vor.u32 %v3022_v24, %v3019_v12  ;;  %v3035_v48 = vshrl.u32 %v6306_v17, 16  ;;  %v6339_v24 = vld [vmem:[%s5471_s9 + $0x78] sm:$0xff]  }
 0x105   : > { %v678_v57 = vpop.f32.mrf.mxu0  ;;  %v4774_v33 = vpop.f32.mrf.mxu1  ;;  %4989 = vmatmul.mubr.msk.bf16.gmra.mxu1 %vm537_vm1, %v2988_v16  ;;  %v2646_v16 = vrot.slane %v6253_v0, 2  ;;  %v3046_v12 = vrot.slane %v3044_v26, 2  ;;  %7410 = vst [vmem:[#allocation9_spill] sm:$0xff] %v6339_v24  ;;  %v3065_v26 = vshll.u32 %v6339_v24, 16 }
 0x106   : > { %v6291_v6 = vadd.f32 %v894_v7, %v678_v57  ;;  %4992 = vmatprep.mubr.msk.bf16.mxu1 %vm537_vm1, %v2997_v46  ;;  %v3032_v4 = vor.u32 %v3031_v31, %v3028_v51  ;;  %v3047_v57 = vshll.u32 %v6311_v52, 16  ;;  %v3024_v19 = vsel %vm2944_vm6, %v3014_v39, %v3023_v63 }
 0x107   : > { %v4733_v27 = vpop.f32.mrf.mxu0  ;;  %v910_v10 = vpop.f32.mrf.mxu1  ;;  %v3037_v62 = vrot.slane %v3035_v48, 2  ;;  %v2648_v39 = vrot.slane %v6278_v29, 2  ;;  %v2650_v51 = vrot.slane %v6283_v41, 2 }
 0x108   : > { %v6298_v56 = vadd.f32 %v4771_v49, %v4733_v27  ;;  %v2647_v27 = vsel %vm2191_vm5, %v2644_v18, %v2646_v16  ;;  %v3049_v38 = vrot.slane %v3047_v57, 3 }
 0x109   : > { %v681_v53 = vpop.f32.mrf.mxu0  ;;  %v4775_v21 = vpop.f32.mrf.mxu1 }
 0x10a   : > { %v6302_v40 = vadd.f32 %v897_v5, %v681_v53  ;;  %v3038_v5 = vshll.u32 %v6306_v17, 16  ;;  %v6334_v53 = vld [vmem:[%s5471_s9 + $0x70] sm:$0xff]  }
 0x10b   : > { %v4736_v7 = vpop.f32.mrf.mxu0  ;;  %4951 = vmatmul.mubr.msk.bf16.gmra.mxu0 %vm537_vm1, %v2641_v61  ;;  %v913_v28 = vpop.f32.mrf.mxu1  ;;  %7409 = vst [vmem:[#allocation6_spill] sm:$0xff] %v6334_v53 }
 0x10c   : > { %v6313_v30 = vadd.f32 %v4774_v33, %v4736_v7  ;;  %4954 = vmatprep.mubr.msk.bf16.mxu0 %vm537_vm1, %v2643_v32  ;;  %v3040_v61 = vrot.slane %v3038_v5, 3  ;;  %v3050_v5 = vor.u32 %v3049_v38, %v3046_v12 }
 0x10d   : > { %v694_v49 = vpop.f32.mrf.mxu0  ;;  %v4778_v23 = vpop.f32.mrf.mxu1  ;;  %4993 = vmatmul.mubr.msk.bf16.gmra.mxu1 %vm537_vm1, %v3006_v42  ;;  %v3033_v42 = vsel %vm2944_vm6, %v3023_v63, %v3032_v4 }
 0x10e   : > { %v6319_v20 = vadd.f32 %v910_v10, %v694_v49  ;;  %4996 = vmatprep.mubr.msk.bf16.mxu1 %vm537_vm1, %v3015_v45  ;;  %v3041_v18 = vor.u32 %v3040_v61, %v3037_v62  ;;  %v3053_v49 = vshrl.u32 %v6334_v53, 16 }
 0x10f   : > { %v4737_v46 = vpop.f32.mrf.mxu0  ;;  %v926_v35 = vpop.f32.mrf.mxu1 }
 0x110   : > { %v6326_v33 = vadd.f32 %v4775_v21, %v4737_v46  ;;  %v3062_v46 = vshrl.u32 %v6339_v24, 16  ;;  %v3042_v62 = vsel %vm2944_vm6, %v3032_v4, %v3041_v18  ;;  %v3055_v61 = vrot.slane %v3053_v49, 2 }
 0x111   : > { %v697_v37 = vpop.f32.mrf.mxu0  ;;  %v4779_v8 = vpop.f32.mrf.mxu1  ;;  %v3051_v38 = vsel %vm2944_vm6, %v3041_v18, %v3050_v5  ;;  %v2652_v4 = vrot.slane %v6306_v17, 2  ;;  %v2654_v49 = vrot.slane %v6311_v52, 2 }
 0x112   : > { %v6330_v10 = vadd.f32 %v913_v28, %v697_v37 }
 0x113   : > { %v4740_v32 = vpop.f32.mrf.mxu0  ;;  %4955 = vmatmul.mubr.msk.bf16.gmra.mxu0 %vm537_vm1, %v2645_v15  ;;  %v929_v21 = vpop.f32.mrf.mxu1 }
 0x114   : > { %v6341_v7 = vadd.f32 %v4778_v23, %v4740_v32  ;;  %4958 = vmatprep.mubr.msk.bf16.mxu0 %vm537_vm1, %v2647_v27  ;;  %v3056_v23 = vshll.u32 %v6334_v53, 16  ;;  %v2651_v27 = vsel %vm2191_vm5, %v2648_v39, %v2650_v51 }
 0x115   : > { %v710_v28 = vpop.f32.mrf.mxu0  ;;  %v4782_v45 = vpop.f32.mrf.mxu1  ;;  %4997 = vmatmul.mubr.msk.bf16.gmra.mxu1 %vm537_vm1, %v3024_v19 }
 0x116   : > { %v6347_v31 = vadd.f32 %v926_v35, %v710_v28  ;;  %5000 = vmatprep.mubr.msk.bf16.mxu1 %vm537_vm1, %v3033_v42  ;;  %v2649_v35 = vsel %vm2191_vm5, %v2646_v16, %v2648_v39  ;;  %v3058_v32 = vrot.slane %v3056_v23, 3  ;;  %v6362_v42 = vld [vmem:[%s5471_s9 + $0x80] sm:$0xff]   ;;  %v3064_v28 = vrot.slane %v3062_v46, 2 }
 0x117   : > { %v4741_v63 = vpop.f32.mrf.mxu0  ;;  %v942_v48 = vpop.f32.mrf.mxu1  ;;  %v3067_v16 = vrot.slane %v3065_v26, 3  ;;  %v3071_v46 = vshrl.u32 %v6362_v42, 16 }
 0x118   : > { %v6354_v57 = vadd.f32 %v4779_v8, %v4741_v63  ;;  %v6367_v63 = vld [vmem:[%s5471_s9 + $0x88] sm:$0xff]   ;;  %v3059_v18 = vor.u32 %v3058_v32, %v3055_v61  ;;  %v2655_v61 = vsel %vm2191_vm5, %v2652_v4, %v2654_v49 }
 0x119   : > { %v713_v15 = vpop.f32.mrf.mxu0  ;;  %v4783_v37 = vpop.f32.mrf.mxu1  ;;  %v3073_v52 = vrot.slane %v3071_v46, 2  ;;  %v2658_v46 = vrot.slane %v6339_v24, 2 }
 0x11a   : > { %7411 = vst [vmem:[#allocation8_spill] sm:$0xff] %v6354_v57  ;;  %v6358_v19 = vadd.f32 %v929_v21, %v713_v15  ;;  %v3068_v15 = vor.u32 %v3067_v16, %v3064_v28  ;;  %v6390_v28 = vld [vmem:[%s5471_s9 + $0x90] sm:$0xff]  }
 0x11b   : > { %v4744_v12 = vpop.f32.mrf.mxu0  ;;  %4959 = vmatmul.mubr.msk.bf16.gmra.mxu0 %vm537_vm1, %v2649_v35  ;;  %v945_v8 = vpop.f32.mrf.mxu1  ;;  %7416 = vst [vmem:[#allocation15_spill] sm:$0xff] %v6390_v28 }
 0x11c   : > { %7412 = vst [vmem:[#allocation11_spill] sm:$0xff] %v6358_v19  ;;  %v6369_v57 = vadd.f32 %v4782_v45, %v4744_v12  ;;  %4962 = vmatprep.mubr.msk.bf16.mxu0 %vm537_vm1, %v2651_v27  ;;  %v3074_v45 = vshll.u32 %v6362_v42, 16  ;;  %v3080_v27 = vshrl.u32 %v6367_v63, 16  ;;  %v3083_v12 = vshll.u32 %v6367_v63, 16 }
 0x11d   : > { %v726_v21 = vpop.f32.mrf.mxu0  ;;  %v4786_v39 = vpop.f32.mrf.mxu1  ;;  %5001 = vmatmul.mubr.msk.bf16.gmra.mxu1 %vm537_vm1, %v3042_v62 }
 0x11e   : > { %7413 = vst [vmem:[#allocation10_spill] sm:$0xff] %v6369_v57  ;;  %v6375_v23 = vadd.f32 %v942_v48, %v726_v21  ;;  %5004 = vmatprep.mubr.msk.bf16.mxu1 %vm537_vm1, %v3051_v38  ;;  %v2653_v48 = vsel %vm2191_vm5, %v2650_v51, %v2652_v4  ;;  %v3076_v17 = vrot.slane %v3074_v45, 3  ;;  %v3085_v51 = vrot.slane %v3083_v12, 3  ;;  %v6395_v57 = vld [vmem:[%s5471_s9 + $0x98] sm:$0xff]  }
 0x11f   : > { %v4745_v26 = vpop.f32.mrf.mxu0  ;;  %v958_v35 = vpop.f32.mrf.mxu1  ;;  %7417 = vst [vmem:[#allocation14_spill] sm:$0xff] %v6395_v57 }
 0x120   : > { %7414 = vst [vmem:[#allocation13_spill] sm:$0xff] %v6375_v23  ;;  %v6382_v62 = vadd.f32 %v4783_v37, %v4745_v26  ;;  %v3060_v23 = vsel %vm2944_vm6, %v3050_v5, %v3059_v18  ;;  %v3069_v26 = vsel %vm2944_vm6, %v3059_v18, %v3068_v15  ;;  %v2656_v5 = vrot.slane %v6334_v53, 2 }
 0x121   : > { %v729_v21 = vpop.f32.mrf.mxu0  ;;  %v4787_v38 = vpop.f32.mrf.mxu1  ;;  %v3077_v18 = vor.u32 %v3076_v17, %v3073_v52 }
 0x122   : > { %7415 = vst [vmem:[#allocation12_spill] sm:$0xff] %v6382_v62  ;;  %v6386_v32 = vadd.f32 %v945_v8, %v729_v21  ;;  %v3082_v62 = vrot.slane %v3080_v27, 2  ;;  %v3089_v27 = vshrl.u32 %v6390_v28, 16  ;;  %v2659_v17 = vsel %vm2191_vm5, %v2656_v5, %v2658_v46 }
 0x123   : > { %v4748_v16 = vpop.f32.mrf.mxu0  ;;  %4963 = vmatmul.mubr.msk.bf16.gmra.mxu0 %vm537_vm1, %v2653_v48  ;;  %v961_v37 = vpop.f32.mrf.mxu1 }
 0x124   : > { %v6397_v19 = vadd.f32 %v4786_v39, %v4748_v16  ;;  %4966 = vmatprep.mubr.msk.bf16.mxu0 %vm537_vm1, %v2655_v61  ;;  %v3092_v39 = vshll.u32 %v6390_v28, 16  ;;  %v3086_v21 = vor.u32 %v3085_v51, %v3082_v62  ;;  %v3098_v61 = vshrl.u32 %v6395_v57, 16 }
 0x125   : > { %v742_v8 = vpop.f32.mrf.mxu0  ;;  %v4790_v4 = vpop.f32.mrf.mxu1  ;;  %5005 = vmatmul.mubr.msk.bf16.gmra.mxu1 %vm537_vm1, %v3060_v23  ;;  %v3101_v16 = vshll.u32 %v6395_v57, 16  ;;  %v3091_v24 = vrot.slane %v3089_v27, 2  ;;  %v2662_v27 = vrot.slane %v6367_v63, 2 }
 0x126   : > { %7418 = vst [vmem:[#allocation16_spill] sm:$0xff] %v6397_v19  ;;  %v6403_v45 = vadd.f32 %v958_v35, %v742_v8  ;;  %5008 = vmatprep.mubr.msk.bf16.mxu1 %vm537_vm1, %v3069_v26  ;;  %v2657_v35 = vsel %vm2191_vm5, %v2654_v49, %v2656_v5  ;;  %v3078_v26 = vsel %vm2944_vm6, %v3068_v15, %v3077_v18  ;;  %v3094_v53 = vrot.slane %v3092_v39, 3  ;;  %v6418_v19 = vld [vmem:[%s5471_s9 + $0xa0] ss:$0 sps:$4 sm:$0x77]  }
 0x127   : > { %v4749_v12 = vpop.f32.mrf.mxu0  ;;  %v974_v48 = vpop.f32.mrf.mxu1  ;;  %7421 = vst [vmem:[#allocation18_spill] sm:$0xff] %v6418_v19  ;;  %v3100_v49 = vrot.slane %v3098_v61, 2 }
 0x128   : > { %7419 = vst [vmem:[#allocation17_spill] sm:$0xff] %v6403_v45  ;;  %v6410_v23 = vadd.f32 %v4787_v38, %v4749_v12  ;;  %v3087_v38 = vsel %vm2944_vm6, %v3077_v18, %v3086_v21  ;;  %v3103_v12 = vrot.slane %v3101_v16, 3  ;;  %v3107_v18 = vshrl.u32 %v6418_v19, 16 }
 0x129   : > { %v745_v8 = vpop.f32.mrf.mxu0  ;;  %v4791_v45 = vpop.f32.mrf.mxu1 }
 0x12a   : > { %7420 = vst [vmem:[#allocation19_spill] sm:$0xff] %v6410_v23  ;;  %v6414_v52 = vadd.f32 %v961_v37, %v745_v8  ;;  %v2660_v37 = vrot.slane %v6362_v42, 2  ;;  %v3104_v8 = vor.u32 %v3103_v12, %v3100_v49 }
 0x12b   : > { %v4752_v62 = vpop.f32.mrf.mxu0  ;;  %4967 = vmatmul.mubr.msk.bf16.gmra.mxu0 %vm537_vm1, %v2657_v35  ;;  %v6421_v51 = vpop.f32.mrf.mxu1  ;;  %v3095_v35 = vor.u32 %v3094_v53, %v3091_v24 }
 0x12c   : > { %7422 = vst [vmem:[#allocation20_spill] sm:$0xff] %v6421_v51  ;;  %v6424_v23 = vadd.f32 %v4790_v4, %v4752_v62  ;;  %4970 = vmatprep.mubr.msk.bf16.mxu0 %vm537_vm1, %v2659_v17  ;;  %v3110_v4 = vshll.u32 %v6418_v19, 16  ;;  %v2661_v62 = vsel %vm2191_vm5, %v2658_v46, %v2660_v37  ;;  %v2664_v46 = vrot.slane %v6390_v28, 2  ;;  %v5246_v28 = vld [vmem:[%s5471_s9 + $0xa0] ss:$0 sps:$4 sm:$0x33]  }
 0x12d   : > { %v758_v15 = vpop.f32.mrf.mxu0  ;;  %v4834_v5 = vpop.f32.mrf.mxu1  ;;  %5009 = vmatmul.mubr.msk.bf16.gmra.mxu1 %vm537_vm1, %v3078_v26 }
 0x12e   : > { %v6430_v39 = vadd.f32 %v974_v48, %v758_v15  ;;  %5012 = vmatprep.mubr.msk.bf16.mxu1 %vm537_vm1, %v3087_v38  ;;  %v2663_v48 = vsel %vm2191_vm5, %v2660_v37, %v2662_v27  ;;  %v3096_v15 = vsel %vm2944_vm6, %v3086_v21, %v3095_v35  ;;  %v3109_v38 = vrot.slane %v3107_v18, 2 }
 0x12f   : > { %v4753_v61 = vpop.f32.mrf.mxu0  ;;  %v1563_v16 = vpop.f32.mrf.mxu1  ;;  %v3112_v53 = vrot.slane %v3110_v4, 3  ;;  %v2666_v21 = vrot.slane %v6395_v57, 2 }
 0x130   : > { %v6435_v17 = vadd.f32 %v4791_v45, %v4753_v61  ;;  %v3105_v45 = vsel %vm2944_vm6, %v3095_v35, %v3104_v8  ;;  %v3389_v61 = vld [vmem:[%s5471_s9 + $0x10] sm:$0x8] }
 0x131   : > { %v6438_v51 = vpop.f32.mrf.mxu0  ;;  %v4835_v26 = vpop.f32.mrf.mxu1  ;;  %v3113_v35 = vor.u32 %v3112_v53, %v3109_v38  ;;  %v2667_v57 = vsel %vm2191_vm5, %v2664_v46, %v2666_v21 }
 0x132   : > { %7423 = vst [vmem:[#allocation21_spill] sm:$0xff] %v6435_v17 }
 0x133   : > { %v4796_v24 = vpop.f32.mrf.mxu0  ;;  %4971 = vmatmul.mubr.msk.bf16.gmra.mxu0 %vm537_vm1, %v2661_v62  ;;  %v6443_v19 = vpop.f32.mrf.mxu1  ;;  %v3114_v53 = vsel %vm2944_vm6, %v3104_v8, %v3113_v35 }
 0x134   : > { %7424 = vst [vmem:[#allocation22_spill] sm:$0xff] %v6443_v19  ;;  %v1267_v49 = vadd.f32 %v4796_v24, %v6195_v1  ;;  %4974 = vmatprep.mubr.msk.bf16.mxu0 %vm537_vm1, %v2663_v48  ;;  %v2665_v19 = vsel %vm2191_vm5, %v2662_v27, %v2664_v46 }
 0x135   : > { %v1122_v12 = vpop.f32.mrf.mxu0  ;;  %v4838_v37 = vpop.f32.mrf.mxu1  ;;  %5013 = vmatmul.mubr.msk.bf16.gmra.mxu1 %vm537_vm1, %v3096_v15 }
 0x136   : > { %v1265_v18 = vadd.f32 %v1122_v12, %v6201_v59  ;;  %v6452_v4 = vadd.f32 %v4834_v5, %v1267_v49  ;;  %5016 = vmatprep.mubr.msk.bf16.mxu1 %vm537_vm1, %v3105_v45  ;;  %v4481_v59 = vcombine.low %v3389_v61, %v6167_v25 }
 0x137   : > { %v4797_v1 = vpop.f32.mrf.mxu0  ;;  %v1579_v62 = vpop.f32.mrf.mxu1 }
 0x138   : > { %v1268_v48 = vadd.f32 %v4797_v1, %v6210_v14  ;;  %v6457_v24 = vadd.f32 %v1563_v16, %v1265_v18  ;;  %v2668_v16 = vrot.slane %v5246_v28, 2  ;;  %v3394_v25 = vrot.slane %v4481_v59, 3 }
 0x139   : > { %v1125_v15 = vpop.f32.mrf.mxu0  ;;  %v4839_v17 = vpop.f32.mrf.mxu1 }
 0x13a   : > { %v6464_v5 = vadd.f32 %v1125_v15, %v6212_v44  ;;  %v6466_v38 = vadd.f32 %v4835_v26, %v1268_v48  ;;  %v3395_v44 = vrot.slane %v6175_v36, 3  ;;  %v3399_v15 = vrot.slane %v6193_v60, 3 }
 0x13b   : > { %v4800_v45 = vpop.f32.mrf.mxu0  ;;  %4975 = vmatmul.mubr.msk.bf16.gmra.mxu0 %vm537_vm1, %v2665_v19  ;;  %v6470_v14 = vpop.f32.mrf.mxu1 }
 0x13c   : > { %v1271_v27 = vadd.f32 %v4800_v45, %v6226_v9  ;;  %4978 = vmatprep.mubr.msk.bf16.mxu0 %vm537_vm1, %v2667_v57  ;;  %v2669_v57 = vsel %vm2191_vm5, %v2666_v21, %v2668_v16  ;;  %v3396_v61 = vsel %vm3393_vm7, %v3394_v25, %v3395_v44  ;;  %v3397_v21 = vrot.slane %v6188_v43, 3 }
 0x13d   : > { %v1138_v49 = vpop.f32.mrf.mxu0  ;;  %v4842_v46 = vpop.f32.mrf.mxu1  ;;  %5017 = vmatmul.mubr.msk.bf16.gmra.mxu1 %vm537_vm1, %v3114_v53 }
 0x13e   : > { %v1269_v26 = vadd.f32 %v1138_v49, %v6233_v11  ;;  %v6477_v8 = vadd.f32 %v4838_v37, %v1271_v27  ;;  %v3400_v43 = vsel %vm3393_vm7, %v3397_v21, %v3399_v15 }
 0x13f   : > { %v4801_v19 = vpop.f32.mrf.mxu0  ;;  %v1595_v12 = vpop.f32.mrf.mxu1 }
 0x140   : > { %v1272_v18 = vadd.f32 %v4801_v19, %v6240_v54  ;;  %v6480_v9 = vadd.f32 %v1579_v62, %v1269_v26 }
 0x141   : > { %v1141_v28 = vpop.f32.mrf.mxu0  ;;  %v4843_v35 = vpop.f32.mrf.mxu1 }
 0x142   : > { %v6485_v1 = vadd.f32 %v1141_v28, %v6243_v3  ;;  %v6487_v36 = vadd.f32 %v4839_v17, %v1272_v18 }
 0x143   : > { %v4804_v11 = vpop.f32.mrf.mxu0  ;;  %4979 = vmatmul.mubr.msk.bf16.gmra.mxu0 %vm537_vm1, %v2669_v57  ;;  %v6490_v37 = vpop.f32.mrf.mxu1 }
 0x144   : > { %v1275_v54 = vadd.f32 %v4804_v11, %v6255_v2  ;;  %5022 = vmatprep.mubr.msk.bf16.mxu0 %vm537_vm1, %v3396_v61  ;;  %v3398_v2 = vsel %vm3393_vm7, %v3395_v44, %v3397_v21  ;;  %v3401_v44 = vrot.slane %v6218_v34, 3  ;;  %v3721_v61 = vld [vmem:[%s3720_s13] sm:$0x3] }
 0x145   : > { %v1154_v62 = vpop.f32.mrf.mxu0  ;;  %v4846_v48 = vpop.f32.mrf.mxu1  ;;  %5105 = vmatprep.subr.msk.bf16.mxu1 %vm592_vm0, %v3721_v61 }
 0x146   : > { %v1273_v3 = vadd.f32 %v1154_v62, %v6261_v55  ;;  %v6497_v59 = vadd.f32 %v4842_v46, %v1275_v54  ;;  %v3402_v34 = vsel %vm3393_vm7, %v3399_v15, %v3401_v44  ;;  %v3777_v54 = vsel %vm592_vm0, %v3721_v61, 0 }
 0x147   : > { %v4805_v17 = vpop.f32.mrf.mxu0  ;;  %v1611_v53 = vpop.f32.mrf.mxu1  ;;  %5059 = vmatpush3.bf16.msra.mxu1 %v3777_v54 }
 0x148   : > { %v1276_v45 = vadd.f32 %v4805_v17, %v6268_v50  ;;  %v6500_v27 = vadd.f32 %v1595_v12, %v1273_v3  ;;  %v3403_v12 = vrot.slane %v6224_v58, 3  ;;  %v3405_v3 = vrot.slane %v6247_v47, 3 }
 0x149   : > { %v1157_v16 = vpop.f32.mrf.mxu0  ;;  %v4847_v49 = vpop.f32.mrf.mxu1 }
 0x14a   : > { %v6505_v25 = vadd.f32 %v1157_v16, %v6274_v13  ;;  %v6507_v60 = vadd.f32 %v4843_v35, %v1276_v45  ;;  %v3407_v45 = vrot.slane %v6253_v0, 3 }
 0x14b   : > { %v4808_v55 = vpop.f32.mrf.mxu0  ;;  %5023 = vmatmul.mubr.msk.bf16.vlgmr.msra.gmra.mxu0 %vm537_vm1, %v3398_v2  ;;  %v6510_v46 = vpop.f32.mrf.mxu1 }
 0x14c   : > { %v1279_v50 = vadd.f32 %v4808_v55, %v6285_v22  ;;  %5026 = vmatprep.mubr.msk.bf16.mxu0 %vm537_vm1, %v3400_v43  ;;  %v3408_v47 = vsel %vm3393_vm7, %v3405_v3, %v3407_v45 }
 0x14d   : > { %v1170_v26 = vpop.f32.mrf.mxu0  ;;  %v4850_v19 = vpop.f32.mrf.mxu1 }
 0x14e   : > { %v1277_v13 = vadd.f32 %v1170_v26, %v6291_v6  ;;  %v6517_v18 = vadd.f32 %v4846_v48, %v1279_v50  ;;  %v3404_v6 = vsel %vm3393_vm7, %v3401_v44, %v3403_v12 }
 0x14f   : > { %v4809_v57 = vpop.f32.mrf.mxu0  ;;  %v1627_v28 = vpop.f32.mrf.mxu1 }
 0x150   : > { %v1280_v22 = vadd.f32 %v4809_v57, %v6298_v56  ;;  %v6524_v35 = vadd.f32 %v1611_v53, %v1277_v13 }
 0x151   : > { %v1173_v11 = vpop.f32.mrf.mxu0  ;;  %v4851_v58 = vpop.f32.mrf.mxu1 }
 0x152   : > { %v6531_v21 = vadd.f32 %v1173_v11, %v6302_v40  ;;  %v6533_v62 = vadd.f32 %v4847_v49, %v1280_v22  ;;  %v7425_v11 = vld [vmem:[#allocation8_spill] sm:$0xff] }
 0x153   : > { %v4812_v56 = vpop.f32.mrf.mxu0  ;;  %5027 = vmatmul.mubr.msk.bf16.gmra.mxu0 %vm537_vm1, %v3402_v34  ;;  %v6536_v48 = vpop.f32.mrf.mxu1 }
 0x154   : > { %v1283_v15 = vadd.f32 %v4812_v56, %v6313_v30  ;;  %5030 = vmatprep.mubr.msk.bf16.mxu0 %vm537_vm1, %v3404_v6  ;;  %v3406_v30 = vsel %vm3393_vm7, %v3403_v12, %v3405_v3  ;;  %v3409_v12 = vrot.slane %v6278_v29, 3 }
 0x155   : > { %v1186_v17 = vpop.f32.mrf.mxu0  ;;  %v4854_v53 = vpop.f32.mrf.mxu1 }
 0x156   : > { %v1281_v40 = vadd.f32 %v1186_v17, %v6319_v20  ;;  %v6543_v2 = vadd.f32 %v4850_v19, %v1283_v15  ;;  %v7426_v15 = vld [vmem:[#allocation11_spill] sm:$0xff] }
 0x157   : > { %v4813_v16 = vpop.f32.mrf.mxu0  ;;  %v1643_v49 = vpop.f32.mrf.mxu1 }
 0x158   : > { %v1284_v43 = vadd.f32 %v4813_v16, %v6326_v33  ;;  %v6546_v55 = vadd.f32 %v1627_v28, %v1281_v40  ;;  %v3411_v28 = vrot.slane %v6283_v41, 3  ;;  %v7428_v16 = vld [vmem:[#allocation5_spill] sm:$0xff] }
 0x159   : > { %v1189_v50 = vpop.f32.mrf.mxu0  ;;  %v4855_v44 = vpop.f32.mrf.mxu1 }
 0x15a   : > { %v6551_v26 = vadd.f32 %v1189_v50, %v6330_v10  ;;  %v6553_v0 = vadd.f32 %v4851_v58, %v1284_v43  ;;  %v3412_v29 = vsel %vm3393_vm7, %v3409_v12, %v3411_v28 }
 0x15b   : > { %v4816_v20 = vpop.f32.mrf.mxu0  ;;  %5031 = vmatmul.mubr.msk.bf16.gmra.mxu0 %vm537_vm1, %v3406_v30  ;;  %v6556_v19 = vpop.f32.mrf.mxu1  ;;  %v7429_v30 = vld [vmem:[#allocation7_spill] sm:$0xff] }
 0x15c   : > { %v1287_v33 = vadd.f32 %v4816_v20, %v6341_v7  ;;  %5034 = vmatprep.mubr.msk.bf16.mxu0 %vm537_vm1, %v3408_v47  ;;  %v3410_v7 = vsel %vm3393_vm7, %v3407_v45, %v3409_v12  ;;  %v3413_v45 = vrot.slane %v7428_v16, 3  ;;  %v3415_v50 = vrot.slane %v7429_v30, 3  ;;  %v7430_v47 = vld [vmem:[#allocation13_spill] sm:$0xff] }
 0x15d   : > { %v1202_v13 = vpop.f32.mrf.mxu0  ;;  %v4858_v57 = vpop.f32.mrf.mxu1  ;;  %v7435_v30 = vld [vmem:[#allocation9_spill] sm:$0xff] }
 0x15e   : > { %v1285_v10 = vadd.f32 %v1202_v13, %v6347_v31  ;;  %v6563_v22 = vadd.f32 %v4854_v53, %v1287_v33  ;;  %v7427_v53 = vld [vmem:[#allocation10_spill] sm:$0xff]  ;;  %v7431_v13 = vld [vmem:[#allocation12_spill] sm:$0xff] }
 0x15f   : > { %v4817_v34 = vpop.f32.mrf.mxu0  ;;  %v1659_v61 = vpop.f32.mrf.mxu1 }
 0x160   : > { %v1288_v58 = vadd.f32 %v4817_v34, %v7425_v11  ;;  %v6566_v6 = vadd.f32 %v1643_v49, %v1285_v10  ;;  %v3414_v11 = vsel %vm3393_vm7, %v3411_v28, %v3413_v45 }
 0x161   : > { %v1205_v54 = vpop.f32.mrf.mxu0  ;;  %v4859_v56 = vpop.f32.mrf.mxu1 }
 0x162   : > { %v6571_v3 = vadd.f32 %v1205_v54, %v7426_v15  ;;  %v6573_v41 = vadd.f32 %v4855_v44, %v1288_v58  ;;  %v3416_v54 = vsel %vm3393_vm7, %v3413_v45, %v3415_v50  ;;  %v3419_v45 = vrot.slane %v7435_v30, 3 }
 0x163   : > { %v4820_v31 = vpop.f32.mrf.mxu0  ;;  %5035 = vmatmul.mubr.msk.bf16.gmra.mxu0 %vm537_vm1, %v3410_v7  ;;  %v6576_v17 = vpop.f32.mrf.mxu1 }
 0x164   : > { %v1291_v40 = vadd.f32 %v4820_v31, %v7427_v53  ;;  %5038 = vmatprep.mubr.msk.bf16.mxu0 %vm537_vm1, %v3412_v29  ;;  %v7433_v53 = vld [vmem:[#allocation16_spill] sm:$0xff] }
 0x165   : > { %v1218_v49 = vpop.f32.mrf.mxu0  ;;  %v4862_v43 = vpop.f32.mrf.mxu1 }
 0x166   : > { %v1289_v20 = vadd.f32 %v1218_v49, %v7430_v47  ;;  %v6583_v33 = vadd.f32 %v4858_v57, %v1291_v40  ;;  %v7436_v47 = vld [vmem:[#allocation17_spill] sm:$0xff] }
 0x167   : > { %v4821_v44 = vpop.f32.mrf.mxu0  ;;  %v1675_v12 = vpop.f32.mrf.mxu1 }
 0x168   : > { %v1292_v10 = vadd.f32 %v4821_v44, %v7431_v13  ;;  %v6586_v34 = vadd.f32 %v1659_v61, %v1289_v20  ;;  %v7434_v61 = vld [vmem:[#allocation6_spill] sm:$0xff]  ;;  %v7437_v13 = vld [vmem:[#allocation19_spill] sm:$0xff] }
 0x169   : > { %v1221_v58 = vpop.f32.mrf.mxu0  ;;  %v4863_v7 = vpop.f32.mrf.mxu1  ;;  %v3417_v28 = vrot.slane %v7434_v61, 3 }
 0x16a   : > { %v6591_v29 = vadd.f32 %v1221_v58, %v6386_v32  ;;  %v6593_v15 = vadd.f32 %v4859_v56, %v1292_v10 }
 0x16b   : > { %v4824_v31 = vpop.f32.mrf.mxu0  ;;  %5039 = vmatmul.mubr.msk.bf16.gmra.mxu0 %vm537_vm1, %v3414_v11  ;;  %v6596_v57 = vpop.f32.mrf.mxu1  ;;  %v3418_v58 = vsel %vm3393_vm7, %v3415_v50, %v3417_v28 }
 0x16c   : > { %7432 = vst [vmem:[#allocation8_spill] sm:$0xff] %v6596_v57  ;;  %v1295_v40 = vadd.f32 %v4824_v31, %v7433_v53  ;;  %5042 = vmatprep.mubr.msk.bf16.mxu0 %vm537_vm1, %v3416_v54  ;;  %v3420_v53 = vsel %vm3393_vm7, %v3417_v28, %v3419_v45 }
 0x16d   : > { %v1234_v16 = vpop.f32.mrf.mxu0  ;;  %v4866_v49 = vpop.f32.mrf.mxu1 }
 0x16e   : > { %v1293_v32 = vadd.f32 %v1234_v16, %v7436_v47  ;;  %v6603_v20 = vadd.f32 %v4862_v43, %v1295_v40 }
 0x16f   : > { %v4825_v56 = vpop.f32.mrf.mxu0  ;;  %v1691_v44 = vpop.f32.mrf.mxu1 }
 0x170   : > { %v1296_v10 = vadd.f32 %v4825_v56, %v7437_v13  ;;  %v6606_v11 = vadd.f32 %v1675_v12, %v1293_v32  ;;  %v3421_v12 = vrot.slane %v6362_v42, 3  ;;  %v3423_v32 = vrot.slane %v6367_v63, 3  ;;  %v7439_v13 = vld [vmem:[#allocation20_spill] sm:$0xff] }
 0x171   : > { %v1237_v31 = vpop.f32.mrf.mxu0  ;;  %v4867_v54 = vpop.f32.mrf.mxu1 }
 0x172   : > { %v6611_v61 = vadd.f32 %v1237_v31, %v6414_v52  ;;  %v6613_v30 = vadd.f32 %v4863_v7, %v1296_v10  ;;  %v978_v10 = vadd.f32 %v7439_v13, %v6438_v51 }
 0x173   : > { %v4828_v16 = vpop.f32.mrf.mxu0  ;;  %5043 = vmatmul.mubr.msk.bf16.gmra.mxu0 %vm537_vm1, %v3418_v58  ;;  %v1694_v43 = vpop.f32.mrf.mxu1  ;;  %v7440_v58 = vld [vmem:[#allocation21_spill] sm:$0xff] }
 0x174   : > { %7438 = vst [vmem:[#allocation11_spill] sm:$0xff] %v6613_v30  ;;  %v1299_v40 = vadd.f32 %v4828_v16, %v6424_v23  ;;  %5046 = vmatprep.mubr.msk.bf16.mxu0 %vm537_vm1, %v3420_v53  ;;  %v3422_v53 = vsel %vm3393_vm7, %v3419_v45, %v3421_v12  ;;  %v3424_v30 = vsel %vm3393_vm7, %v3421_v12, %v3423_v32 }
 0x175   : > { %v1250_v50 = vpop.f32.mrf.mxu0  ;;  %v4910_v47 = vpop.f32.mrf.mxu1 }
 0x176   : > { %v1297_v28 = vadd.f32 %v1250_v50, %v6430_v39  ;;  %v6621_v52 = vadd.f32 %v4866_v49, %v1299_v40 }
 0x177   : > { %v4829_v7 = vpop.f32.mrf.mxu0  ;;  %v2324_v56 = vpop.f32.mrf.mxu1 }
 0x178   : > { %v1300_v31 = vadd.f32 %v4829_v7, %v7440_v58  ;;  %v6626_v23 = vadd.f32 %v1691_v44, %v1297_v28  ;;  %v7441_v44 = vld [vmem:[#allocation15_spill] sm:$0xff]  ;;  %v7442_v7 = vld [vmem:[#allocation14_spill] sm:$0xff] }
 0x179   : > { %v1253_v42 = vpop.f32.mrf.mxu0  ;;  %v4911_v16 = vpop.f32.mrf.mxu1  ;;  %v3425_v50 = vrot.slane %v7441_v44, 3  ;;  %v3427_v13 = vrot.slane %v7442_v7, 3 }
 0x17a   : > { %v1298_v63 = vadd.f32 %v1253_v42, %v978_v10  ;;  %v6630_v57 = vadd.f32 %v4867_v54, %v1300_v31  ;;  %v7443_v31 = vld [vmem:[#allocation22_spill] sm:$0xff] }
 0x17b   : > { %v4872_v39 = vpop.f32.mrf.mxu0  ;;  %5047 = vmatmul.mubr.msk.bf16.gmra.mxu0 %vm537_vm1, %v3422_v53  ;;  %v2327_v49 = vpop.f32.mrf.mxu1 }
 0x17c   : > { %v6633_v40 = vadd.f32 %v1694_v43, %v1298_v63  ;;  %v2153_v51 = vadd.f32 %v4872_v39, %v6452_v4  ;;  %5050 = vmatprep.mubr.msk.bf16.mxu0 %vm537_vm1, %v3424_v30  ;;  %v1707_v43 = vadd.f32 %v7443_v31, %v6464_v5  ;;  %v3426_v30 = vsel %vm3393_vm7, %v3423_v32, %v3425_v50 }
 0x17d   : > { %v2008_v45 = vpop.f32.mrf.mxu0  ;;  %v4914_v28 = vpop.f32.mrf.mxu1  ;;  %v3428_v39 = vsel %vm3393_vm7, %v3425_v50, %v3427_v13  ;;  %v1711_v31 = vadd.f32 %v6470_v14, %v6485_v1 }
 0x17e   : > { %v2151_v12 = vadd.f32 %v2008_v45, %v6457_v24  ;;  %v6640_v54 = vadd.f32 %v4910_v47, %v2153_v51 }
 0x17f   : > { %v4873_v10 = vpop.f32.mrf.mxu0  ;;  %v2340_v58 = vpop.f32.mrf.mxu1 }
 0x180   : > { %v2154_v53 = vadd.f32 %v4873_v10, %v6466_v38  ;;  %v6645_v4 = vadd.f32 %v2324_v56, %v2151_v12  ;;  %v7444_v38 = vld [vmem:[#allocation18_spill] sm:$0xff] }
 0x181   : > { %v2011_v42 = vpop.f32.mrf.mxu0  ;;  %v4915_v63 = vpop.f32.mrf.mxu1  ;;  %v3429_v56 = vrot.slane %v7444_v38, 3 }
 0x182   : > { %v2152_v44 = vadd.f32 %v2011_v42, %v1707_v43  ;;  %v6649_v7 = vadd.f32 %v4911_v16, %v2154_v53 }
 0x183   : > { %v4876_v24 = vpop.f32.mrf.mxu0  ;;  %5051 = vmatmul.mubr.msk.bf16.gmra.mxu0 %vm537_vm1, %v3426_v30  ;;  %v2343_v47 = vpop.f32.mrf.mxu1 }
 0x184   : > { %v2157_v51 = vadd.f32 %v4876_v24, %v6477_v8  ;;  %v6653_v5 = vadd.f32 %v2327_v49, %v2152_v44  ;;  %5054 = vmatprep.mubr.msk.bf16.mxu0 %vm537_vm1, %v3428_v39  ;;  %v3430_v49 = vsel %vm3393_vm7, %v3427_v13, %v3429_v56 }
 0x185   : > { %v2024_v32 = vpop.f32.mrf.mxu0  ;;  %v4918_v45 = vpop.f32.mrf.mxu1 }
 0x186   : > { %v2155_v12 = vadd.f32 %v2024_v32, %v6480_v9  ;;  %v6658_v50 = vadd.f32 %v4914_v28, %v2157_v51 }
 0x187   : > { %v4877_v16 = vpop.f32.mrf.mxu0  ;;  %v2356_v10 = vpop.f32.mrf.mxu1 }
 0x188   : > { %v2158_v43 = vadd.f32 %v4877_v16, %v6487_v36  ;;  %v6663_v8 = vadd.f32 %v2340_v58, %v2155_v12 }
 0x189   : > { %v2027_v53 = vpop.f32.mrf.mxu0  ;;  %v4919_v30 = vpop.f32.mrf.mxu1 }
 0x18a   : > { %v2156_v42 = vadd.f32 %v2027_v53, %v1711_v31  ;;  %v6666_v39 = vadd.f32 %v4915_v63, %v2158_v43  ;;  %v1715_v63 = vadd.f32 %v6490_v37, %v6505_v25 }
 0x18b   : > { %v4880_v44 = vpop.f32.mrf.mxu0  ;;  %5055 = vmatmul.mubr.msk.bf16.gmra.mxu0 %vm537_vm1, %v3430_v49  ;;  %v2359_v9 = vpop.f32.mrf.mxu1 }
 0x18c   : > { %v2161_v28 = vadd.f32 %v4880_v44, %v6497_v59  ;;  %v6670_v24 = vadd.f32 %v2343_v47, %v2156_v42 }
 0x18d   : > { %v2040_v14 = vpop.f32.mrf.mxu0  ;;  %v4922_v1 = vpop.f32.mrf.mxu1 }
 0x18e   : > { %v2159_v36 = vadd.f32 %v2040_v14, %v6500_v27  ;;  %v6673_v58 = vadd.f32 %v4918_v45, %v2161_v28 }
 0x18f   : > { %v4881_v13 = vpop.f32.mrf.mxu0  ;;  %v2372_v51 = vpop.f32.mrf.mxu1 }
 0x190   : > { %v2162_v38 = vadd.f32 %v4881_v13, %v6507_v60  ;;  %v6678_v56 = vadd.f32 %v2356_v10, %v2159_v36  ;;  %v1719_v10 = vadd.f32 %v6510_v46, %v6531_v21 }
 0x191   : > { %v2043_v32 = vpop.f32.mrf.mxu0  ;;  %v4923_v12 = vpop.f32.mrf.mxu1 }
 0x192   : > { %v2160_v59 = vadd.f32 %v2043_v32, %v1715_v63  ;;  %v6680_v47 = vadd.f32 %v4919_v30, %v2162_v38 }
 0x193   : > { %v4884_v16 = vpop.f32.mrf.mxu0  ;;  %v2375_v31 = vpop.f32.mrf.mxu1 }
 0x194   : > { %v2165_v27 = vadd.f32 %v4884_v16, %v6517_v18  ;;  %v6683_v45 = vadd.f32 %v2359_v9, %v2160_v59 }
 0x195   : > { %v2056_v43 = vpop.f32.mrf.mxu0  ;;  %v4926_v49 = vpop.f32.mrf.mxu1 }
 0x196   : > { %v2163_v53 = vadd.f32 %v2056_v43, %v6524_v35  ;;  %v6686_v37 = vadd.f32 %v4922_v1, %v2165_v27 }
 0x197   : > { %v4885_v25 = vpop.f32.mrf.mxu0  ;;  %v2388_v60 = vpop.f32.mrf.mxu1 }
 0x198   : > { %v2166_v30 = vadd.f32 %v4885_v25, %v6533_v62  ;;  %v6691_v42 = vadd.f32 %v2372_v51, %v2163_v53  ;;  %v1723_v51 = vadd.f32 %v6536_v48, %v6551_v26 }
 0x199   : > { %v2059_v44 = vpop.f32.mrf.mxu0  ;;  %v4927_v28 = vpop.f32.mrf.mxu1 }
 0x19a   : > { %v2164_v18 = vadd.f32 %v2059_v44, %v1719_v10  ;;  %v6693_v9 = vadd.f32 %v4923_v12, %v2166_v30 }
 0x19b   : > { %v4888_v14 = vpop.f32.mrf.mxu0  ;;  %v2391_v36 = vpop.f32.mrf.mxu1 }
 0x19c   : > { %v2169_v35 = vadd.f32 %v4888_v14, %v6543_v2  ;;  %v6696_v1 = vadd.f32 %v2375_v31, %v2164_v18 }
 0x19d   : > { %v2072_v13 = vpop.f32.mrf.mxu0  ;;  %v4930_v63 = vpop.f32.mrf.mxu1 }
 0x19e   : > { %v2167_v38 = vadd.f32 %v2072_v13, %v6546_v55  ;;  %v6699_v46 = vadd.f32 %v4926_v49, %v2169_v35 }
 0x19f   : > { %v4889_v21 = vpop.f32.mrf.mxu0  ;;  %v2404_v62 = vpop.f32.mrf.mxu1 }
 0x1a0   : > { %v2170_v32 = vadd.f32 %v4889_v21, %v6553_v0  ;;  %v6704_v12 = vadd.f32 %v2388_v60, %v2167_v38  ;;  %v1727_v60 = vadd.f32 %v6556_v19, %v6571_v3 }
 0x1a1   : > { %v2075_v59 = vpop.f32.mrf.mxu0  ;;  %v4931_v16 = vpop.f32.mrf.mxu1 }
 0x1a2   : > { %v2168_v2 = vadd.f32 %v2075_v59, %v1723_v51  ;;  %v6706_v31 = vadd.f32 %v4927_v28, %v2170_v32 }
 0x1a3   : > { %v4892_v27 = vpop.f32.mrf.mxu0  ;;  %v2407_v43 = vpop.f32.mrf.mxu1 }
 0x1a4   : > { %v2173_v55 = vadd.f32 %v4892_v27, %v6563_v22  ;;  %v6709_v49 = vadd.f32 %v2391_v36, %v2168_v2 }
 0x1a5   : > { %v2088_v53 = vpop.f32.mrf.mxu0  ;;  %v4934_v25 = vpop.f32.mrf.mxu1 }
 0x1a6   : > { %v2171_v10 = vadd.f32 %v2088_v53, %v6566_v6  ;;  %v6712_v48 = vadd.f32 %v4930_v63, %v2173_v55 }
 0x1a7   : > { %v4893_v26 = vpop.f32.mrf.mxu0  ;;  %v2420_v0 = vpop.f32.mrf.mxu1 }
 0x1a8   : > { %v2174_v30 = vadd.f32 %v4893_v26, %v6573_v41  ;;  %v6717_v44 = vadd.f32 %v2404_v62, %v2171_v10  ;;  %v1731_v62 = vadd.f32 %v6576_v17, %v6591_v29  ;;  %v7445_v26 = vld [vmem:[#allocation8_spill] sm:$0xff] }
 0x1a9   : > { %v2091_v28 = vpop.f32.mrf.mxu0  ;;  %v4935_v18 = vpop.f32.mrf.mxu1 }
 0x1aa   : > { %v2172_v22 = vadd.f32 %v2091_v28, %v1727_v60  ;;  %v6719_v14 = vadd.f32 %v4931_v16, %v2174_v30  ;;  %v7446_v60 = vld [vmem:[#allocation11_spill] sm:$0xff] }
 0x1ab   : > { %v4896_v36 = vpop.f32.mrf.mxu0  ;;  %v2423_v35 = vpop.f32.mrf.mxu1 }
 0x1ac   : > { %v2177_v6 = vadd.f32 %v4896_v36, %v6583_v33  ;;  %v6722_v13 = vadd.f32 %v2407_v43, %v2172_v22 }
 0x1ad   : > { %v2104_v63 = vpop.f32.mrf.mxu0  ;;  %v4938_v38 = vpop.f32.mrf.mxu1 }
 0x1ae   : > { %v2175_v21 = vadd.f32 %v2104_v63, %v6586_v34  ;;  %v6725_v19 = vadd.f32 %v4934_v25, %v2177_v6 }
 0x1af   : > { %v4897_v3 = vpop.f32.mrf.mxu0  ;;  %v2436_v41 = vpop.f32.mrf.mxu1 }
 0x1b0   : > { %v2178_v51 = vadd.f32 %v4897_v3, %v6593_v15  ;;  %v6730_v32 = vadd.f32 %v2420_v0, %v2175_v21  ;;  %v1735_v0 = vadd.f32 %v7445_v26, %v6611_v61 }
 0x1b1   : > { %v2107_v59 = vpop.f32.mrf.mxu0  ;;  %v4939_v16 = vpop.f32.mrf.mxu1 }
 0x1b2   : > { %v2176_v33 = vadd.f32 %v2107_v59, %v1731_v62  ;;  %v6732_v2 = vadd.f32 %v4935_v18, %v2178_v51 }
 0x1b3   : > { %v4900_v27 = vpop.f32.mrf.mxu0  ;;  %v2439_v43 = vpop.f32.mrf.mxu1 }
 0x1b4   : > { %v2181_v34 = vadd.f32 %v4900_v27, %v6603_v20  ;;  %v6735_v55 = vadd.f32 %v2423_v35, %v2176_v33 }
 0x1b5   : > { %v2120_v53 = vpop.f32.mrf.mxu0  ;;  %v4942_v25 = vpop.f32.mrf.mxu1 }
 0x1b6   : > { %v2179_v10 = vadd.f32 %v2120_v53, %v6606_v11  ;;  %v6738_v17 = vadd.f32 %v4938_v38, %v2181_v34 }
 0x1b7   : > { %v4901_v29 = vpop.f32.mrf.mxu0  ;;  %v2452_v15 = vpop.f32.mrf.mxu1 }
 0x1b8   : > { %v2182_v30 = vadd.f32 %v4901_v29, %v7446_v60  ;;  %v6743_v28 = vadd.f32 %v2436_v41, %v2179_v10 }
 0x1b9   : > { %v2123_v18 = vpop.f32.mrf.mxu0  ;;  %v4943_v22 = vpop.f32.mrf.mxu1 }
 0x1ba   : > { %v2180_v20 = vadd.f32 %v2123_v18, %v1735_v0  ;;  %v6745_v36 = vadd.f32 %v4939_v16, %v2182_v30 }
 0x1bb   : > { %v4904_v35 = vpop.f32.mrf.mxu0  ;;  %v2455_v38 = vpop.f32.mrf.mxu1 }
 0x1bc   : > { %v2185_v6 = vadd.f32 %v4904_v35, %v6621_v52  ;;  %v6748_v11 = vadd.f32 %v2439_v43, %v2180_v20 }
 0x1bd   : > { %v2136_v63 = vpop.f32.mrf.mxu0  ;;  %v6756_v59 = vpop.f32.mrf.mxu1 }
 0x1be   : > { %v2183_v21 = vadd.f32 %v2136_v63, %v6626_v23  ;;  %v6751_v3 = vadd.f32 %v4942_v25, %v2185_v6 }
 0x1bf   : > { %v4905_v61 = vpop.f32.mrf.mxu0  ;;  %v6766_v34 = vpop.f32.mrf.mxu1 }
 0x1c0   : > { %v2186_v41 = vadd.f32 %v4905_v61, %v6630_v57  ;;  %v6754_v62 = vadd.f32 %v2452_v15, %v2183_v21 }
 0x1c1   : > { %v2139_v51 = vpop.f32.mrf.mxu0 }
 0x1c2   : > { %v2184_v16 = vadd.f32 %v2139_v51, %v6633_v40  ;;  %v6759_v33 = vadd.f32 %v4943_v22, %v2186_v41  ;;  %v6774_v40 = vpop.f32.mrf.mxu1 }
 0x1c3   : > { %v4948_v52 = vpop.f32.mrf.mxu0 }
 0x1c4   : > { %v6761_v27 = vadd.f32 %v2455_v38, %v2184_v16  ;;  %v6764_v43 = vadd.f32 %v4948_v52, %v6640_v54  ;;  %v6782_v26 = vpop.f32.mrf.mxu1 }
 0x1c5   : > { %v2761_v23 = vpop.f32.mrf.mxu0 }
 0x1c6   : > { %v6769_v57 = vadd.f32 %v2761_v23, %v6645_v4  ;;  %v6790_v30 = vpop.f32.mrf.mxu1 }
 0x1c7   : > { %v4949_v53 = vpop.f32.mrf.mxu0 }
 0x1c8   : > { %v6772_v25 = vadd.f32 %v4949_v53, %v6649_v7  ;;  %v6798_v20 = vpop.f32.mrf.mxu1 }
 0x1c9   : > { %v2764_v10 = vpop.f32.mrf.mxu0 }
 0x1ca   : > { %v6777_v29 = vadd.f32 %v2764_v10, %v6653_v5  ;;  %v6806_v63 = vpop.f32.mrf.mxu1 }
 0x1cb   : > { %v4952_v15 = vpop.f32.mrf.mxu0 }
 0x1cc   : > { %v6780_v54 = vadd.f32 %v4952_v15, %v6658_v50  ;;  %v6814_v61 = vpop.f32.mrf.mxu1 }
 0x1cd   : > { %v2777_v0 = vpop.f32.mrf.mxu0 }
 0x1ce   : > { %v6785_v4 = vadd.f32 %v2777_v0, %v6663_v8  ;;  %v6822_v16 = vpop.f32.mrf.mxu1 }
 0x1cf   : > { %v4953_v60 = vpop.f32.mrf.mxu0 }
 0x1d0   : > { %v6788_v7 = vadd.f32 %v4953_v60, %v6666_v39  ;;  %v6830_v53 = vpop.f32.mrf.mxu1 }
 0x1d1   : > { %v2780_v18 = vpop.f32.mrf.mxu0 }
 0x1d2   : > { %v6793_v5 = vadd.f32 %v2780_v18, %v6670_v24  ;;  %v6838_v0 = vpop.f32.mrf.mxu1 }
 0x1d3   : > { %v4956_v22 = vpop.f32.mrf.mxu0 }
 0x1d4   : > { %v6796_v50 = vadd.f32 %v4956_v22, %v6673_v58  ;;  %v6846_v22 = vpop.f32.mrf.mxu1 }
 0x1d5   : > { %v2793_v35 = vpop.f32.mrf.mxu0 }
 0x1d6   : > { %v6801_v8 = vadd.f32 %v2793_v35, %v6678_v56 }
 0x1d7   : > { %v4957_v6 = vpop.f32.mrf.mxu0 }
 0x1d8   : > { %v6804_v39 = vadd.f32 %v4957_v6, %v6680_v47 }
 0x1d9   : > { %v2796_v38 = vpop.f32.mrf.mxu0 }
 0x1da   : > { %v6809_v24 = vadd.f32 %v2796_v38, %v6683_v45  ;;  %v6854_v38 = vpop.f32.mrf.mxu1 }
 0x1db   : > { %v4960_v21 = vpop.f32.mrf.mxu0 }
 0x1dc   : > { %v6812_v58 = vadd.f32 %v4960_v21, %v6686_v37 }
 0x1dd   : > { %v2809_v41 = vpop.f32.mrf.mxu0 }
 0x1de   : > { %v6817_v56 = vadd.f32 %v2809_v41, %v6691_v42 }
 0x1df   : > { %v4961_v51 = vpop.f32.mrf.mxu0 }
 0x1e0   : > { %v6820_v47 = vadd.f32 %v4961_v51, %v6693_v9  ;;  %v6862_v51 = vpop.f32.mrf.mxu1 }
 0x1e1   : > { %v2812_v52 = vpop.f32.mrf.mxu0 }
 0x1e2   : > { %v6825_v45 = vadd.f32 %v2812_v52, %v6696_v1 }
 0x1e3   : > { %v4964_v23 = vpop.f32.mrf.mxu0 }
 0x1e4   : > { %v6828_v37 = vadd.f32 %v4964_v23, %v6699_v46 }
 0x1e5   : > { %v2825_v10 = vpop.f32.mrf.mxu0 }
 0x1e6   : > { %v6833_v42 = vadd.f32 %v2825_v10, %v6704_v12  ;;  %v6870_v10 = vpop.f32.mrf.mxu1 }
 0x1e7   : > { %v4965_v15 = vpop.f32.mrf.mxu0 }
 0x1e8   : > { %v6836_v9 = vadd.f32 %v4965_v15, %v6706_v31 }
 0x1e9   : > { %v2828_v60 = vpop.f32.mrf.mxu0 }
 0x1ea   : > { %v6841_v1 = vadd.f32 %v2828_v60, %v6709_v49 }
 0x1eb   : > { %v4968_v18 = vpop.f32.mrf.mxu0 }
 0x1ec   : > { %v6844_v46 = vadd.f32 %v4968_v18, %v6712_v48  ;;  %v6878_v18 = vpop.f32.mrf.mxu1 }
 0x1ed   : > { %v2841_v35 = vpop.f32.mrf.mxu0 }
 0x1ee   : > { %v6849_v12 = vadd.f32 %v2841_v35, %v6717_v44 }
 0x1ef   : > { %v4969_v6 = vpop.f32.mrf.mxu0 }
 0x1f0   : > { %v6852_v31 = vadd.f32 %v4969_v6, %v6719_v14 }
 0x1f1   : > { %v2844_v21 = vpop.f32.mrf.mxu0 }
 0x1f2   : > { %v6857_v49 = vadd.f32 %v2844_v21, %v6722_v13  ;;  %v6886_v21 = vpop.f32.mrf.mxu1 }
 0x1f3   : > { %v4972_v41 = vpop.f32.mrf.mxu0 }
 0x1f4   : > { %v6860_v48 = vadd.f32 %v4972_v41, %v6725_v19 }
 0x1f5   : > { %v2857_v52 = vpop.f32.mrf.mxu0 }
 0x1f6   : > { %v6865_v44 = vadd.f32 %v2857_v52, %v6730_v32 }
 0x1f7   : > { %v4973_v23 = vpop.f32.mrf.mxu0 }
 0x1f8   : > { %v6868_v14 = vadd.f32 %v4973_v23, %v6732_v2  ;;  %v6894_v23 = vpop.f32.mrf.mxu1 }
 0x1f9   : > { %v2860_v15 = vpop.f32.mrf.mxu0 }
 0x1fa   : > { %v6873_v13 = vadd.f32 %v2860_v15, %v6735_v55 }
 0x1fb   : > { %v4976_v60 = vpop.f32.mrf.mxu0 }
 0x1fc   : > { %v6876_v19 = vadd.f32 %v4976_v60, %v6738_v17 }
 0x1fd   : > { %v2873_v35 = vpop.f32.mrf.mxu0 }
 0x1fe   : > { %v6881_v32 = vadd.f32 %v2873_v35, %v6743_v28  ;;  %v6902_v35 = vpop.f32.mrf.mxu1 }
 0x1ff   : > { %v4977_v6 = vpop.f32.mrf.mxu0 }
 0x200   : > { %7447 = vst [vmem:[#allocation10_spill] sm:$0xff] %v6881_v32  ;;  %v6884_v2 = vadd.f32 %v4977_v6, %v6745_v36 }
 0x201   : > { %v2876_v41 = vpop.f32.mrf.mxu0 }
 0x202   : > { %7448 = vst [vmem:[#allocation5_spill] sm:$0xff] %v6884_v2  ;;  %v6889_v55 = vadd.f32 %v2876_v41, %v6748_v11 }
 0x203   : > { %v4980_v52 = vpop.f32.mrf.mxu0 }
 0x204   : > { %7449 = vst [vmem:[#allocation7_spill] sm:$0xff] %v6889_v55  ;;  %v6892_v17 = vadd.f32 %v4980_v52, %v6751_v3  ;;  %v6907_v55 = vpop.f32.mrf.mxu1  ;;  %v3355_v52 = vadd.f32 %v6756_v59, %v6764_v43 }
 0x205   : > { %v2889_v15 = vpop.f32.mrf.mxu0 }
 0x206   : > { %7450 = vst [vmem:[#allocation13_spill] sm:$0xff] %v6892_v17  ;;  %v6897_v28 = vadd.f32 %v2889_v15, %v6754_v62  ;;  %v3356_v62 = vadd.f32 %v6774_v40, %v6772_v25  ;;  %v3359_v40 = vadd.f32 %v6790_v30, %v6780_v54 }
 0x207   : > { %v4981_v60 = vpop.f32.mrf.mxu0 }
 0x208   : > { %7451 = vst [vmem:[#allocation12_spill] sm:$0xff] %v6897_v28  ;;  %v6900_v36 = vadd.f32 %v4981_v60, %v6759_v33  ;;  %v3353_v33 = vadd.f32 %v6766_v34, %v6769_v57  ;;  %v3354_v60 = vadd.f32 %v6782_v26, %v6777_v29  ;;  %v3360_v34 = vadd.f32 %v6806_v63, %v6788_v7 }
 0x209   : > { %v2892_v6 = vpop.f32.mrf.mxu0  ;;  %v3357_v29 = vadd.f32 %v6798_v20, %v6785_v4  ;;  %v3358_v26 = vadd.f32 %v6814_v61, %v6793_v5  ;;  %v3364_v4 = vadd.f32 %v6838_v0, %v6804_v39  ;;  %v3361_v20 = vadd.f32 %v6830_v53, %v6801_v8 }
 0x20a   : > { %7452 = vst [vmem:[#allocation16_spill] sm:$0xff] %v6900_v36  ;;  %v6905_v11 = vadd.f32 %v2892_v6, %v6761_v27  ;;  %v6917_v6 = vpop.f32.mrf.mxu1  ;;  %v3362_v61 = vadd.f32 %v6846_v22, %v6809_v24  ;;  %v3368_v8 = vadd.f32 %v6870_v10, %v6820_v47  ;;  %v3365_v53 = vadd.f32 %v6862_v51, %v6817_v56 }
 0x20b   : > { %v5024_v41 = vpop.f32.mrf.mxu0  ;;  %v3366_v22 = vadd.f32 %v6878_v18, %v6825_v45  ;;  %v3372_v56 = vadd.f32 %v6902_v35, %v6836_v9  ;;  %v3369_v51 = vadd.f32 %v6894_v23, %v6833_v42  ;;  %v3370_v18 = vadd.f32 %v6907_v55, %v6841_v1 }
 0x20c   : > { %7453 = vst [vmem:[#allocation6_spill] sm:$0xff] %v6905_v11  ;;  %v3667_v28 = vadd.f32 %v5024_v41, %v3355_v52  ;;  %v6919_v43 = vpop.f32.mrf.mxu1 }
 0x20d   : > { %v3522_v3 = vpop.f32.mrf.mxu0  ;;  %v3373_v55 = vadd.f32 %v6919_v43, %v6849_v12 }
 0x20e   : > { %v3665_v36 = vadd.f32 %v3522_v3, %v3353_v33 }
 0x20f   : > { %v5025_v15 = vpop.f32.mrf.mxu0 }
 0x210   : > { %v3668_v27 = vadd.f32 %v5025_v15, %v3356_v62 }
 0x211   : > { %v3525_v11 = vpop.f32.mrf.mxu0 }
 0x212   : > { %v3702_v17 = vpack.c.bf16 %v3668_v27, %v3667_v28  ;;  %v3666_v32 = vadd.f32 %v3525_v11, %v3354_v60 }
 0x213   : > { %v5028_v2 = vpop.f32.mrf.mxu0 }
 0x214   : > { %v3701_v59 = vpack.c.bf16 %v3666_v32, %v3665_v36  ;;  %v3671_v32 = vadd.f32 %v5028_v2, %v3359_v40  ;;  %v6931_v36 = vpop.f32.mrf.mxu1 }
 0x215   : > { %v3538_v25 = vpop.f32.mrf.mxu0  ;;  %v3376_v42 = vadd.f32 %v6931_v36, %v6852_v31 }
 0x216   : > { %5060 = vmatprep.mubr.msk.bf16.mxu1 %vm537_vm1, %v3701_v59  ;;  %v3669_v54 = vadd.f32 %v3538_v25, %v3357_v29  ;;  %v3293_v3 = vpop.f32.mrf.mxu1  ;;  %v3367_v25 = vadd.f32 %v6854_v38, %v6812_v58 }
 0x217   : > { %v5029_v57 = vpop.f32.mrf.mxu0  ;;  %5061 = vmatmul.mubr.msk.bf16.vlgmr.msra.gmra.mxu1 %vm537_vm1, %v3702_v17  ;;  %v3363_v17 = vadd.f32 %v6822_v16, %v6796_v50  ;;  %v3374_v23 = vadd.f32 %v3293_v3, %v6857_v49 }
 0x218   : > { %v3672_v28 = vadd.f32 %v5029_v57, %v3360_v34  ;;  %v6943_v15 = vpop.f32.mrf.mxu1 }
 0x219   : > { %v3541_v11 = vpop.f32.mrf.mxu0 }
 0x21a   : > { %v3704_v30 = vpack.c.bf16 %v3672_v28, %v3671_v32  ;;  %v3670_v41 = vadd.f32 %v3541_v11, %v3358_v26  ;;  %v3306_v27 = vpop.f32.mrf.mxu1  ;;  %v3371_v11 = vadd.f32 %v6886_v21, %v6828_v37 }
 0x21b   : > { %v5032_v7 = vpop.f32.mrf.mxu0  ;;  %v3377_v49 = vadd.f32 %v3306_v27, %v6865_v44 }
 0x21c   : > { %v3703_v63 = vpack.c.bf16 %v3670_v41, %v3669_v54  ;;  %v3675_v2 = vadd.f32 %v5032_v7, %v3363_v17  ;;  %v5011_v57 = vpop.f32.mrf.mxu1 }
 0x21d   : > { %v3554_v52 = vpop.f32.mrf.mxu0 }
 0x21e   : > { %5064 = vmatprep.mubr.msk.bf16.mxu1 %vm537_vm1, %v3703_v63  ;;  %v3673_v50 = vadd.f32 %v3554_v52, %v3361_v20  ;;  %v3309_v10 = vpop.f32.mrf.mxu1 }
 0x21f   : > { %v5033_v5 = vpop.f32.mrf.mxu0  ;;  %5065 = vmatmul.mubr.msk.bf16.gmra.mxu1 %vm537_vm1, %v3704_v30  ;;  %v3378_v43 = vadd.f32 %v3309_v10, %v6873_v13  ;;  %v7455_v13 = vld [vmem:[#allocation10_spill] sm:$0xff] }
 0x220   : > { %v3676_v62 = vadd.f32 %v5033_v5, %v3364_v4  ;;  %v5014_v41 = vpop.f32.mrf.mxu1  ;;  %v3375_v4 = vadd.f32 %v6917_v6, %v6844_v46 }
 0x221   : > { %v3557_v33 = vpop.f32.mrf.mxu0 }
 0x222   : > { %v3706_v16 = vpack.c.bf16 %v3676_v62, %v3675_v2  ;;  %v3674_v60 = vadd.f32 %v3557_v33, %v3362_v61  ;;  %v3322_v35 = vpop.f32.mrf.mxu1 }
 0x223   : > { %v5036_v39 = vpop.f32.mrf.mxu0  ;;  %v3381_v27 = vadd.f32 %v3322_v35, %v7455_v13 }
 0x224   : > { %v3705_v0 = vpack.c.bf16 %v3674_v60, %v3673_v50  ;;  %v3679_v40 = vadd.f32 %v5036_v39, %v3367_v25  ;;  %v5015_v61 = vpop.f32.mrf.mxu1  ;;  %v3380_v60 = vadd.f32 %v5011_v57, %v6868_v14  ;;  %v7456_v57 = vld [vmem:[#allocation7_spill] sm:$0xff] }
 0x225   : > { %v3570_v59 = vpop.f32.mrf.mxu0 }
 0x226   : > { %5068 = vmatprep.mubr.msk.bf16.mxu1 %vm537_vm1, %v3705_v0  ;;  %v3677_v26 = vadd.f32 %v3570_v59, %v3365_v53  ;;  %v3325_v31 = vpop.f32.mrf.mxu1 }
 0x227   : > { %v5037_v24 = vpop.f32.mrf.mxu0  ;;  %5069 = vmatmul.mubr.msk.bf16.gmra.mxu1 %vm537_vm1, %v3706_v16  ;;  %v3379_v16 = vadd.f32 %v6943_v15, %v6860_v48 }
 0x228   : > { %v3680_v34 = vadd.f32 %v5037_v24, %v3368_v8  ;;  %v5018_v0 = vpop.f32.mrf.mxu1 }
 0x229   : > { %v3573_v29 = vpop.f32.mrf.mxu0 }
 0x22a   : > { %v3708_v58 = vpack.c.bf16 %v3680_v34, %v3679_v40  ;;  %v3678_v38 = vadd.f32 %v3573_v29, %v3366_v22  ;;  %v3338_v15 = vpop.f32.mrf.mxu1  ;;  %v3383_v22 = vadd.f32 %v5014_v41, %v6876_v19  ;;  %v7454_v40 = vld [vmem:[#allocation5_spill] sm:$0xff]  ;;  %v3382_v29 = vadd.f32 %v3325_v31, %v7456_v57 }
 0x22b   : > { %v5040_v32 = vpop.f32.mrf.mxu0  ;;  %v3384_v34 = vadd.f32 %v5015_v61, %v7454_v40 }
 0x22c   : > { %v3707_v47 = vpack.c.bf16 %v3678_v38, %v3677_v26  ;;  %v3683_v54 = vadd.f32 %v5040_v32, %v3371_v11  ;;  %v5019_v38 = vpop.f32.mrf.mxu1 }
 0x22d   : > { %v3586_v28 = vpop.f32.mrf.mxu0 }
 0x22e   : > { %5072 = vmatprep.mubr.msk.bf16.mxu1 %vm537_vm1, %v3707_v47  ;;  %v3681_v63 = vadd.f32 %v3586_v28, %v3369_v51  ;;  %v7457_v51 = vld [vmem:[#allocation13_spill] sm:$0xff] }
 0x22f   : > { %v5041_v45 = vpop.f32.mrf.mxu0  ;;  %5073 = vmatmul.mubr.msk.bf16.gmra.mxu1 %vm537_vm1, %v3708_v58 }
 0x230   : > { %v3684_v30 = vadd.f32 %v5041_v45, %v3372_v56  ;;  %v3341_v56 = vpop.f32.mrf.mxu1 }
 0x231   : > { %v3589_v7 = vpop.f32.mrf.mxu0 }
 0x232   : > { %v3710_v37 = vpack.c.bf16 %v3684_v30, %v3683_v54  ;;  %v3682_v21 = vadd.f32 %v3589_v7, %v3370_v18  ;;  %v3387_v18 = vadd.f32 %v5018_v0, %v7457_v51  ;;  %v7458_v54 = vld [vmem:[#allocation16_spill] sm:$0xff] }
 0x233   : > { %v5044_v52 = vpop.f32.mrf.mxu0  ;;  %v3388_v30 = vadd.f32 %v5019_v38, %v7458_v54  ;;  %v7459_v7 = vld [vmem:[#allocation12_spill] sm:$0xff] }
 0x234   : > { %v3709_v9 = vpack.c.bf16 %v3682_v21, %v3681_v63  ;;  %v3687_v5 = vadd.f32 %v5044_v52, %v3375_v4  ;;  %v3385_v63 = vadd.f32 %v3338_v15, %v7459_v7 }
 0x235   : > { %v3602_v17 = vpop.f32.mrf.mxu0 }
 0x236   : > { %5076 = vmatprep.mubr.msk.bf16.mxu1 %vm537_vm1, %v3709_v9  ;;  %v3685_v62 = vadd.f32 %v3602_v17, %v3373_v55 }
 0x237   : > { %v5045_v1 = vpop.f32.mrf.mxu0  ;;  %5077 = vmatmul.mubr.msk.bf16.gmra.mxu1 %vm537_vm1, %v3710_v37  ;;  %v7460_v37 = vld [vmem:[#allocation6_spill] sm:$0xff] }
 0x238   : > { %v3688_v20 = vadd.f32 %v5045_v1, %v3376_v42  ;;  %v3386_v21 = vadd.f32 %v3341_v56, %v7460_v37 }
 0x239   : > { %v3605_v2 = vpop.f32.mrf.mxu0 }
 0x23a   : > { %v3712_v33 = vpack.c.bf16 %v3688_v20, %v3687_v5  ;;  %v3686_v46 = vadd.f32 %v3605_v2, %v3374_v23 }
 0x23b   : > { %v5048_v6 = vpop.f32.mrf.mxu0 }
 0x23c   : > { %v3711_v50 = vpack.c.bf16 %v3686_v46, %v3685_v62  ;;  %v3691_v3 = vadd.f32 %v5048_v6, %v3379_v16 }
 0x23d   : > { %v3618_v36 = vpop.f32.mrf.mxu0 }
 0x23e   : > { %5080 = vmatprep.mubr.msk.bf16.mxu1 %vm537_vm1, %v3711_v50  ;;  %v3689_v25 = vadd.f32 %v3618_v36, %v3377_v49 }
 0x23f   : > { %v5049_v12 = vpop.f32.mrf.mxu0  ;;  %5081 = vmatmul.mubr.msk.bf16.gmra.mxu1 %vm537_vm1, %v3712_v33 }
 0x240   : > { %v3692_v39 = vadd.f32 %v5049_v12, %v3380_v60 }
 0x241   : > { %v3621_v59 = vpop.f32.mrf.mxu0 }
 0x242   : > { %v3714_v8 = vpack.c.bf16 %v3692_v39, %v3691_v3  ;;  %v3690_v24 = vadd.f32 %v3621_v59, %v3378_v43 }
 0x243   : > { %v5052_v53 = vpop.f32.mrf.mxu0 }
 0x244   : > { %v3713_v48 = vpack.c.bf16 %v3690_v24, %v3689_v25  ;;  %v3695_v26 = vadd.f32 %v5052_v53, %v3383_v22 }
 0x245   : > { %v3634_v14 = vpop.f32.mrf.mxu0 }
 0x246   : > { %5084 = vmatprep.mubr.msk.bf16.mxu1 %vm537_vm1, %v3713_v48  ;;  %v3693_v47 = vadd.f32 %v3634_v14, %v3381_v27 }
 0x247   : > { %v5053_v44 = vpop.f32.mrf.mxu0  ;;  %5085 = vmatmul.mubr.msk.bf16.gmra.mxu1 %vm537_vm1, %v3714_v8 }
 0x248   : > { %v3696_v58 = vadd.f32 %v5053_v44, %v3384_v34 }
 0x249   : > { %v3637_v32 = vpop.f32.mrf.mxu0 }
 0x24a   : > { %v3716_v10 = vpack.c.bf16 %v3696_v58, %v3695_v26  ;;  %v3694_v28 = vadd.f32 %v3637_v32, %v3382_v29 }
 0x24b   : > { %v5056_v11 = vpop.f32.mrf.mxu0 }
 0x24c   : > { %v3715_v19 = vpack.c.bf16 %v3694_v28, %v3693_v47  ;;  %v3699_v52 = vadd.f32 %v5056_v11, %v3387_v18 }
 0x24d   : > { %v3650_v45 = vpop.f32.mrf.mxu0 }
 0x24e   : > { %5088 = vmatprep.mubr.msk.bf16.mxu1 %vm537_vm1, %v3715_v19  ;;  %v3697_v17 = vadd.f32 %v3650_v45, %v3385_v63 }
 0x24f   : > { %v5057_v41 = vpop.f32.mrf.mxu0  ;;  %5089 = vmatmul.mubr.msk.bf16.gmra.mxu1 %vm537_vm1, %v3716_v10 }
 0x250   : > { %v3700_v9 = vadd.f32 %v5057_v41, %v3388_v30 }
 0x251   : > { %v3653_v35 = vpop.f32.mrf.mxu0 }
 0x252   : > { %v3718_v4 = vpack.c.bf16 %v3700_v9, %v3699_v52  ;;  %v3698_v42 = vadd.f32 %v3653_v35, %v3386_v21 }
 0x254   : > { %v3717_v1 = vpack.c.bf16 %v3698_v42, %v3697_v17 }
 0x256   : > { %5092 = vmatprep.mubr.msk.bf16.mxu1 %vm537_vm1, %v3717_v1 }
 0x257   : > { %5093 = vmatmul.mubr.msk.bf16.gmra.mxu1 %vm537_vm1, %v3718_v4 }
 0x2d7   : > { %v6995_v55 = vpop.f32.mrf.mxu1 }
 0x2d9   : > { %v6997_v23 = vpop.f32.mrf.mxu1 }
 0x2db   : > { %v6999_v5 = vpop.f32.mrf.mxu1 }
 0x2dd   : > { %v7001_v20 = vpop.f32.mrf.mxu1 }
 0x2df   : > { %v7003_v61 = vpop.f32.mrf.mxu1 }
 0x2e1   : > { %v7005_v2 = vpop.f32.mrf.mxu1 }
 0x2e3   : > { %v7007_v62 = vpop.f32.mrf.mxu1 }
 0x2e5   : > { %v7009_v33 = vpop.f32.mrf.mxu1 }
 0x2e7   : > { %v7011_v46 = vpop.f32.mrf.mxu1 }
 0x2e9   : > { %v7013_v6 = vpop.f32.mrf.mxu1 }
 0x2eb   : > { %v7015_v50 = vpop.f32.mrf.mxu1 }
 0x2ed   : > { %v7017_v31 = vpop.f32.mrf.mxu1 }
 0x2ef   : > { %v7019_v36 = vpop.f32.mrf.mxu1 }
 0x2f1   : > { %v7021_v16 = vpop.f32.mrf.mxu1 }
 0x2f3   : > { %v7023_v60 = vpop.f32.mrf.mxu1 }
 0x2f5   : > { %v7025_v12 = vpop.f32.mrf.mxu1 }
 0x2f7   : > { %v7027_v49 = vpop.f32.mrf.mxu1 }
 0x2f9   : > { %v7029_v43 = vpop.f32.mrf.mxu1 }
 0x2fb   : > { %v7031_v3 = vpop.f32.mrf.mxu1 }
 0x2fd   : > { %v7033_v39 = vpop.f32.mrf.mxu1 }
 0x2ff   : > { %v7035_v0 = vpop.f32.mrf.mxu1 }
 0x301   : > { %v7037_v59 = vpop.f32.mrf.mxu1 }
 0x303   : > { %v7039_v25 = vpop.f32.mrf.mxu1 }
 0x305   : > { %v7041_v8 = vpop.f32.mrf.mxu1 }
 0x307   : > { %v7043_v24 = vpop.f32.mrf.mxu1 }
 0x309   : > { %v7045_v53 = vpop.f32.mrf.mxu1 }
 0x30b   : > { %v7047_v48 = vpop.f32.mrf.mxu1 }
 0x30d   : > { %v7049_v15 = vpop.f32.mrf.mxu1 }
 0x30f   : > { %v7051_v14 = vpop.f32.mrf.mxu1 }
 0x311   : > { %v7053_v22 = vpop.f32.mrf.mxu1 }
 0x313   : > { %v7055_v40 = vpop.f32.mrf.mxu1 }
 0x315   : > { %v7057_v34 = vpop.f32.mrf.mxu1 }
 0x317   : > { %v7059_v44 = vpop.f32.mrf.mxu1 }
 0x319   : > { %v7061_v13 = vpop.f32.mrf.mxu1  ;;  %3959 = sbr.rel (%p4519_p0) target bundleno = 819 (0x333), region = 40 }
 0x31b   : > { %v7063_v27 = vpop.f32.mrf.mxu1 }
 0x31d   : > { %v7065_v57 = vpop.f32.mrf.mxu1 }
 0x31e   : > { %v7074_v29 = vld [vmem:[%s7358_s3] ss:$0 sm:$0xff] }
 0x31f   : > { %v3967_v26 = vadd.f32 %v7074_v29, %v6997_v23  ;;  %v3968_v58 = vadd.f32 %v7074_v29, %v7001_v20  ;;  %v3969_v38 = vadd.f32 %v6995_v55, %v7074_v29  ;;  %v3970_v32 = vadd.f32 %v6999_v5, %v7074_v29 }
 0x320   : > { %v3971_v47 = vadd.f32 %v7074_v29, %v7005_v2  ;;  %v3972_v10 = vadd.f32 %v7074_v29, %v7009_v33  ;;  %v3973_v28 = vadd.f32 %v7003_v61, %v7074_v29  ;;  %v3974_v11 = vadd.f32 %v7007_v62, %v7074_v29 }
 0x321   : > { %4003 = vst [vmem:[%s7068_s14] sm:$0xff] %v3967_v26  ;;  %4004 = vst [vmem:[%s7068_s14 + $0x8] sm:$0xff] %v3968_v58  ;;  %v3975_v19 = vadd.f32 %v7074_v29, %v7013_v6  ;;  %v3976_v56 = vadd.f32 %v7074_v29, %v7017_v31  ;;  %v3977_v45 = vadd.f32 %v7011_v46, %v7074_v29 }
 0x322   : > { %4005 = vst [vmem:[%s7068_s14 + $0x10] sm:$0xff] %v3969_v38  ;;  %4006 = vst [vmem:[%s7068_s14 + $0x18] sm:$0xff] %v3970_v32  ;;  %v3978_v51 = vadd.f32 %v7015_v50, %v7074_v29  ;;  %v3979_v18 = vadd.f32 %v7074_v29, %v7021_v16  ;;  %v3980_v54 = vadd.f32 %v7074_v29, %v7025_v12 }
 0x323   : > { %4007 = vst [vmem:[%s7068_s14 + $0x20] sm:$0xff] %v3971_v47  ;;  %4008 = vst [vmem:[%s7068_s14 + $0x28] sm:$0xff] %v3972_v10  ;;  %v3981_v30 = vadd.f32 %v7019_v36, %v7074_v29  ;;  %v3982_v41 = vadd.f32 %v7023_v60, %v7074_v29  ;;  %v3983_v7 = vadd.f32 %v7074_v29, %v7029_v43 }
 0x324   : > { %4009 = vst [vmem:[%s7068_s14 + $0x30] sm:$0xff] %v3973_v28  ;;  %4010 = vst [vmem:[%s7068_s14 + $0x38] sm:$0xff] %v3974_v11  ;;  %v3984_v63 = vadd.f32 %v7074_v29, %v7033_v39  ;;  %v3985_v37 = vadd.f32 %v7027_v49, %v7074_v29  ;;  %v3986_v21 = vadd.f32 %v7031_v3, %v7074_v29 }
 0x325   : > { %4011 = vst [vmem:[%s7068_s14 + $0x40] sm:$0xff] %v3975_v19  ;;  %4012 = vst [vmem:[%s7068_s14 + $0x48] sm:$0xff] %v3976_v56  ;;  %v3987_v52 = vadd.f32 %v7074_v29, %v7037_v59  ;;  %v3988_v9 = vadd.f32 %v7074_v29, %v7041_v8  ;;  %v3989_v35 = vadd.f32 %v7035_v0, %v7074_v29 }
 0x326   : > { %4013 = vst [vmem:[%s7068_s14 + $0x50] sm:$0xff] %v3977_v45  ;;  %4014 = vst [vmem:[%s7068_s14 + $0x58] sm:$0xff] %v3978_v51  ;;  %v3990_v17 = vadd.f32 %v7039_v25, %v7074_v29  ;;  %v3991_v4 = vadd.f32 %v7074_v29, %v7045_v53  ;;  %v3992_v42 = vadd.f32 %v7074_v29, %v7049_v15 }
 0x327   : > { %4015 = vst [vmem:[%s7068_s14 + $0x60] sm:$0xff] %v3979_v18  ;;  %4016 = vst [vmem:[%s7068_s14 + $0x68] sm:$0xff] %v3980_v54  ;;  %v3993_v1 = vadd.f32 %v7043_v24, %v7074_v29  ;;  %v3994_v26 = vadd.f32 %v7047_v48, %v7074_v29  ;;  %v3995_v58 = vadd.f32 %v7074_v29, %v7053_v22 }
 0x328   : > { %4017 = vst [vmem:[%s7068_s14 + $0x70] sm:$0xff] %v3981_v30  ;;  %4018 = vst [vmem:[%s7068_s14 + $0x78] sm:$0xff] %v3982_v41  ;;  %v3996_v38 = vadd.f32 %v7074_v29, %v7057_v34  ;;  %v3997_v32 = vadd.f32 %v7051_v14, %v7074_v29  ;;  %v3998_v47 = vadd.f32 %v7055_v40, %v7074_v29 }
 0x329   : > { %4019 = vst [vmem:[%s7068_s14 + $0x80] sm:$0xff] %v3983_v7  ;;  %4020 = vst [vmem:[%s7068_s14 + $0x88] sm:$0xff] %v3984_v63  ;;  %v3999_v10 = vadd.f32 %v7074_v29, %v7061_v13  ;;  %v4000_v28 = vadd.f32 %v7074_v29, %v7065_v57  ;;  %v4001_v11 = vadd.f32 %v7059_v44, %v7074_v29 }
 0x32a   : > { %4021 = vst [vmem:[%s7068_s14 + $0x90] sm:$0xff] %v3985_v37  ;;  %4022 = vst [vmem:[%s7068_s14 + $0x98] sm:$0xff] %v3986_v21  ;;  %v4002_v19 = vadd.f32 %v7063_v27, %v7074_v29 }
 0x32b   : > { %4023 = vst [vmem:[%s7068_s14 + $0xa0] sm:$0xff] %v3987_v52  ;;  %4024 = vst [vmem:[%s7068_s14 + $0xa8] sm:$0xff] %v3988_v9 }
 0x32c   : > { %4025 = vst [vmem:[%s7068_s14 + $0xb0] sm:$0xff] %v3989_v35  ;;  %4026 = vst [vmem:[%s7068_s14 + $0xb8] sm:$0xff] %v3990_v17 }
 0x32d   : > { %4027 = vst [vmem:[%s7068_s14 + $0xc0] sm:$0xff] %v3991_v4  ;;  %4028 = vst [vmem:[%s7068_s14 + $0xc8] sm:$0xff] %v3992_v42 }
 0x32e   : > { %4029 = vst [vmem:[%s7068_s14 + $0xd0] sm:$0xff] %v3993_v1  ;;  %4030 = vst [vmem:[%s7068_s14 + $0xd8] sm:$0xff] %v3994_v26 }
 0x32f   : > { %4031 = vst [vmem:[%s7068_s14 + $0xe0] sm:$0xff] %v3995_v58  ;;  %4032 = vst [vmem:[%s7068_s14 + $0xe8] sm:$0xff] %v3996_v38 }
 0x330   : > { %4033 = vst [vmem:[%s7068_s14 + $0xf0] sm:$0xff] %v3997_v32  ;;  %4034 = vst [vmem:[%s7068_s14 + $0xf8] sm:$0xff] %v3998_v47 }
 0x331   : > { %4035 = vst [vmem:[%s7068_s14 + $0x100] sm:$0xff] %v3999_v10  ;;  %4036 = vst [vmem:[%s7068_s14 + $0x108] sm:$0xff] %v4000_v28 }
 0x332   : > { %4037 = vst [vmem:[%s7068_s14 + $0x110] sm:$0xff] %v4001_v11  ;;  %4038 = vst [vmem:[%s7068_s14 + $0x118] sm:$0xff] %v4002_v19 }
 0x333 PF: > { %p4521_p1 = scmp.le.s32.totalorder %s5325_s18, 0 }
 0x335   : > { %4042 = sbr.rel (%p4521_p1) target bundleno = 847 (0x34f), region = 44 }
 0x33a   : > { %v4043_v29 = vld [vmem:[%s7068_s14] sm:$0xff]  ;;  %v4044_v56 = vld [vmem:[%s7068_s14 + $0x8] sm:$0xff]  ;;  %v4045_v45 = vld [vmem:[%s7068_s14 + $0x10] sm:$0xff] }
 0x33b   : > { %v4079_v51 = vadd.f32 %v4043_v29, %v6997_v23  ;;  %v4080_v18 = vadd.f32 %v4044_v56, %v7001_v20  ;;  %v4081_v54 = vadd.f32 %v6995_v55, %v4045_v45  ;;  %v4046_v30 = vld [vmem:[%s7068_s14 + $0x18] sm:$0xff]  ;;  %v4047_v41 = vld [vmem:[%s7068_s14 + $0x20] sm:$0xff]  ;;  %v4048_v7 = vld [vmem:[%s7068_s14 + $0x28] sm:$0xff] }
 0x33c   : > { %v4082_v63 = vadd.f32 %v6999_v5, %v4046_v30  ;;  %v4083_v37 = vadd.f32 %v4047_v41, %v7005_v2  ;;  %v4084_v21 = vadd.f32 %v4048_v7, %v7009_v33  ;;  %v4049_v23 = vld [vmem:[%s7068_s14 + $0x30] sm:$0xff]  ;;  %v4050_v52 = vld [vmem:[%s7068_s14 + $0x38] sm:$0xff]  ;;  %v4051_v20 = vld [vmem:[%s7068_s14 + $0x40] sm:$0xff] }
 0x33d   : > { %4115 = vst [vmem:[%s7068_s14] sm:$0xff] %v4079_v51  ;;  %4116 = vst [vmem:[%s7068_s14 + $0x8] sm:$0xff] %v4080_v18  ;;  %v4085_v55 = vadd.f32 %v7003_v61, %v4049_v23  ;;  %v4086_v5 = vadd.f32 %v7007_v62, %v4050_v52  ;;  %v4087_v2 = vadd.f32 %v4051_v20, %v7013_v6  ;;  %v4052_v9 = vld [vmem:[%s7068_s14 + $0x48] sm:$0xff]  ;;  %v4053_v33 = vld [vmem:[%s7068_s14 + $0x50] sm:$0xff] }
 0x33e   : > { %4117 = vst [vmem:[%s7068_s14 + $0x10] sm:$0xff] %v4081_v54  ;;  %v4054_v35 = vld [vmem:[%s7068_s14 + $0x58] sm:$0xff]  ;;  %4118 = vst [vmem:[%s7068_s14 + $0x18] sm:$0xff] %v4082_v63  ;;  %v4088_v17 = vadd.f32 %v4052_v9, %v7017_v31  ;;  %v4089_v61 = vadd.f32 %v7011_v46, %v4053_v33  ;;  %v4055_v4 = vld [vmem:[%s7068_s14 + $0x60] sm:$0xff] }
 0x33f   : > { %4119 = vst [vmem:[%s7068_s14 + $0x20] sm:$0xff] %v4083_v37  ;;  %4120 = vst [vmem:[%s7068_s14 + $0x28] sm:$0xff] %v4084_v21  ;;  %v4090_v62 = vadd.f32 %v7015_v50, %v4054_v35  ;;  %v4056_v6 = vld [vmem:[%s7068_s14 + $0x68] sm:$0xff]  ;;  %v4057_v42 = vld [vmem:[%s7068_s14 + $0x70] sm:$0xff]  ;;  %v4091_v1 = vadd.f32 %v4055_v4, %v7021_v16 }
 0x340   : > { %4121 = vst [vmem:[%s7068_s14 + $0x30] sm:$0xff] %v4085_v55  ;;  %4122 = vst [vmem:[%s7068_s14 + $0x38] sm:$0xff] %v4086_v5  ;;  %v4092_v31 = vadd.f32 %v4056_v6, %v7025_v12  ;;  %v4093_v46 = vadd.f32 %v7019_v36, %v4057_v42  ;;  %v4058_v26 = vld [vmem:[%s7068_s14 + $0x78] sm:$0xff]  ;;  %v4059_v50 = vld [vmem:[%s7068_s14 + $0x80] sm:$0xff] }
 0x341   : > { %4123 = vst [vmem:[%s7068_s14 + $0x40] sm:$0xff] %v4087_v2  ;;  %v4060_v58 = vld [vmem:[%s7068_s14 + $0x88] sm:$0xff]  ;;  %4124 = vst [vmem:[%s7068_s14 + $0x48] sm:$0xff] %v4088_v17  ;;  %v4094_v38 = vadd.f32 %v7023_v60, %v4058_v26  ;;  %v4095_v16 = vadd.f32 %v4059_v50, %v7029_v43  ;;  %v4061_v32 = vld [vmem:[%s7068_s14 + $0x90] sm:$0xff] }
 0x342   : > { %4125 = vst [vmem:[%s7068_s14 + $0x50] sm:$0xff] %v4089_v61  ;;  %4126 = vst [vmem:[%s7068_s14 + $0x58] sm:$0xff] %v4090_v62  ;;  %v4096_v12 = vadd.f32 %v4060_v58, %v7033_v39  ;;  %v4062_v36 = vld [vmem:[%s7068_s14 + $0x98] sm:$0xff]  ;;  %v4063_v47 = vld [vmem:[%s7068_s14 + $0xa0] sm:$0xff]  ;;  %v4097_v10 = vadd.f32 %v7027_v49, %v4061_v32 }
 0x343   : > { %4127 = vst [vmem:[%s7068_s14 + $0x60] sm:$0xff] %v4091_v1  ;;  %4128 = vst [vmem:[%s7068_s14 + $0x68] sm:$0xff] %v4092_v31  ;;  %v4098_v60 = vadd.f32 %v7031_v3, %v4062_v36  ;;  %v4099_v43 = vadd.f32 %v4063_v47, %v7037_v59  ;;  %v4064_v28 = vld [vmem:[%s7068_s14 + $0xa8] sm:$0xff]  ;;  %v4065_v39 = vld [vmem:[%s7068_s14 + $0xb0] sm:$0xff] }
 0x344   : > { %4129 = vst [vmem:[%s7068_s14 + $0x70] sm:$0xff] %v4093_v46  ;;  %v4066_v11 = vld [vmem:[%s7068_s14 + $0xb8] sm:$0xff]  ;;  %4130 = vst [vmem:[%s7068_s14 + $0x78] sm:$0xff] %v4094_v38  ;;  %v4100_v19 = vadd.f32 %v4064_v28, %v7041_v8  ;;  %v4101_v49 = vadd.f32 %v7035_v0, %v4065_v39  ;;  %v4067_v29 = vld [vmem:[%s7068_s14 + $0xc0] sm:$0xff] }
 0x345   : > { %4131 = vst [vmem:[%s7068_s14 + $0x80] sm:$0xff] %v4095_v16  ;;  %4132 = vst [vmem:[%s7068_s14 + $0x88] sm:$0xff] %v4096_v12  ;;  %v4102_v3 = vadd.f32 %v7039_v25, %v4066_v11  ;;  %v4068_v59 = vld [vmem:[%s7068_s14 + $0xc8] sm:$0xff]  ;;  %v4069_v56 = vld [vmem:[%s7068_s14 + $0xd0] sm:$0xff]  ;;  %v4103_v45 = vadd.f32 %v4067_v29, %v7045_v53 }
 0x346   : > { %4133 = vst [vmem:[%s7068_s14 + $0x90] sm:$0xff] %v4097_v10  ;;  %4134 = vst [vmem:[%s7068_s14 + $0x98] sm:$0xff] %v4098_v60  ;;  %v4104_v8 = vadd.f32 %v4068_v59, %v7049_v15  ;;  %v4105_v0 = vadd.f32 %v7043_v24, %v4069_v56  ;;  %v4070_v51 = vld [vmem:[%s7068_s14 + $0xd8] sm:$0xff]  ;;  %v4071_v25 = vld [vmem:[%s7068_s14 + $0xe0] sm:$0xff] }
 0x347   : > { %4135 = vst [vmem:[%s7068_s14 + $0xa0] sm:$0xff] %v4099_v43  ;;  %v4072_v18 = vld [vmem:[%s7068_s14 + $0xe8] sm:$0xff]  ;;  %4136 = vst [vmem:[%s7068_s14 + $0xa8] sm:$0xff] %v4100_v19  ;;  %v4106_v54 = vadd.f32 %v7047_v48, %v4070_v51  ;;  %v4107_v53 = vadd.f32 %v4071_v25, %v7053_v22  ;;  %v4073_v30 = vld [vmem:[%s7068_s14 + $0xf0] sm:$0xff] }
 0x348   : > { %4137 = vst [vmem:[%s7068_s14 + $0xb0] sm:$0xff] %v4101_v49  ;;  %4138 = vst [vmem:[%s7068_s14 + $0xb8] sm:$0xff] %v4102_v3  ;;  %v4108_v15 = vadd.f32 %v4072_v18, %v7057_v34  ;;  %v4074_v24 = vld [vmem:[%s7068_s14 + $0xf8] sm:$0xff]  ;;  %v4075_v41 = vld [vmem:[%s7068_s14 + $0x100] sm:$0xff]  ;;  %v4109_v7 = vadd.f32 %v7051_v14, %v4073_v30 }
 0x349   : > { %4139 = vst [vmem:[%s7068_s14 + $0xc0] sm:$0xff] %v4103_v45  ;;  %4140 = vst [vmem:[%s7068_s14 + $0xc8] sm:$0xff] %v4104_v8  ;;  %v4110_v48 = vadd.f32 %v7055_v40, %v4074_v24  ;;  %v4111_v22 = vadd.f32 %v4075_v41, %v7061_v13  ;;  %v4076_v63 = vld [vmem:[%s7068_s14 + $0x108] sm:$0xff]  ;;  %v4077_v34 = vld [vmem:[%s7068_s14 + $0x110] sm:$0xff] }
 0x34a   : > { %4141 = vst [vmem:[%s7068_s14 + $0xd0] sm:$0xff] %v4105_v0  ;;  %v4078_v37 = vld [vmem:[%s7068_s14 + $0x118] sm:$0xff]  ;;  %4142 = vst [vmem:[%s7068_s14 + $0xd8] sm:$0xff] %v4106_v54  ;;  %v4112_v21 = vadd.f32 %v4076_v63, %v7065_v57  ;;  %v4113_v23 = vadd.f32 %v7059_v44, %v4077_v34 }
 0x34b   : > { %4143 = vst [vmem:[%s7068_s14 + $0xe0] sm:$0xff] %v4107_v53  ;;  %4144 = vst [vmem:[%s7068_s14 + $0xe8] sm:$0xff] %v4108_v15  ;;  %v4114_v52 = vadd.f32 %v7063_v27, %v4078_v37 }
 0x34c   : > { %4145 = vst [vmem:[%s7068_s14 + $0xf0] sm:$0xff] %v4109_v7  ;;  %4146 = vst [vmem:[%s7068_s14 + $0xf8] sm:$0xff] %v4110_v48 }
 0x34d   : > { %4147 = vst [vmem:[%s7068_s14 + $0x100] sm:$0xff] %v4111_v22  ;;  %4148 = vst [vmem:[%s7068_s14 + $0x108] sm:$0xff] %v4112_v21 }
 0x34e   : > { %4149 = vst [vmem:[%s7068_s14 + $0x110] sm:$0xff] %v4113_v23  ;;  %4150 = vst [vmem:[%s7068_s14 + $0x118] sm:$0xff] %v4114_v52 }
 0x34f PF: > { %s5109_s18 = smul.u32 4608, %s5329_s19  ;;  %s4167_s8 = sshll.u32 %s7068_s14, 4  ;;  %s7300_s8 = int_to_ptr.vmem [resolvable:$true] %s4167_s8 }
 0x350   : > { %s7304_s9 = scalar_lea.sflag [#allocation3], %s229_s6  ;;  %s5249_s10 = scalar_lea.vmem %s7300_s8, 4608 }
 0x351   : > { %s7298_s7 = scalar_lea.hbm %s7359_s4, %s5109_s18  ;;  %p5250_p2 = scmp.ne.s32.totalorder %s7300_s8, %s5249_s10 }
 0x352   : > { %s5343_s19 = smov [#allocation2]  }
 0x353   : > { %p5251_p4 = pnand %p5250_p2, %p5420_p3  ;;  %s5253_s11 = sshll.u32 %s5343_s19, 4  ;;  %s5254_s11 = int_to_ptr.vmem [resolvable:$false] %s5253_s11 }
 0x354   : > { %s5255_s12 = scalar_lea.vmem %s5254_s11, 9216  ;;  %p5256_p6 = scmp.lt.s32.totalorder %s7300_s8, %s5254_s11 }
 0x355   : > { %p5252_p5 = pneg %p5251_p4  ;;  %p5257_p7 = scmp.lt.s32.totalorder %s5255_s12, %s5249_s10 }
 0x357   : > { %p5258_p8 = por %p5257_p7, %p5256_p6 }
 0x359   : > { %p5259_p10 = pnand %p5258_p8, %p5252_p5 }
 0x35b   : > { %5262 = shalt.err (!%p5259_p10)
}
 0x35c   : > { %s5263_s6 = scalar_lea.hbm %s7298_s7, 4608  ;;  %s5267_s23 = scalar_lea.hbm %s7359_s4, 9216 }
 0x35d   : > { %p5264_p11 = scmp.ne.s32.totalorder %s7298_s7, %s5263_s6  ;;  %p5268_p0 = scmp.lt.s32.totalorder %s7298_s7, %s7359_s4 }
 0x35e   : > { %p5269_p1 = scmp.lt.s32.totalorder %s5267_s23, %s5263_s6 }
 0x35f   : > { %p5265_p12 = pnand %p5264_p11, %p5420_p3 }
 0x360   : > { %p5270_p2 = por %p5269_p1, %p5268_p0 }
 0x361   : > { %p5266_p13 = pneg %p5265_p12 }
 0x363   : > { %p5271_p4 = pnand %p5270_p2, %p5266_p13 }
 0x365   : > { %5274 = shalt.err (!%p5271_p4)
}
 0x366   : > { %s5344_s29 = smov 128   ;;  %s5345_s30 = smov 8  }
 0x367   : > { %5110 = dma.vmem_to_hbm [thread:$0]  (%p5420_p3), %s7300_s8, 4608, %s7298_s7, %s7304_s9, %s5344_s29, %s5344_s29, %s5345_s30  }
 0x368 PF: > { %p5116_p5 = scmp.ge.s32.totalorder %s5341_s22, 2  ;;  %s4182_s10 = sand.u32 1, %s5313_s15  }
 0x369   : > { %s4183_s19 = scalar_lea.sflag [#allocation3], %s4182_s10 }
 0x36a   : > { %p5113_p6 = pnand %p5116_p5, %p5430_p9 }
 0x36c   : > { %p5114_p7 = pneg %p5113_p6 }
 0x36e   : > { %5308 = dma.done.wait (%p5114_p7), %s4183_s19, 4608  }
 0x36f   : > { %5310 = vsyncadd (%p5114_p7), %s4183_s19, 4294962688  ;;  %s17_s22 = sadd.s32 1, %s5341_s22   ;;  %s7461_s15 = smov %s5317_s16 }
 0x370   : > { %p14_p8 = scmp.ge.s32.totalorder %s17_s22, 6   ;;  %s7462_s16 = smov %s5321_s17 }
 0x371   : > { %s7463_s17 = smov %s5438_s5  ;;  %s7464_s18 = smov %s5333_s20 }
 0x372   : > { %s7465_s19 = smov %s5337_s21  ;;  %s7466_s20 = smov %s7469_s25 }
 0x373   : > { %s7467_s21 = smov %s7473_s26  ;;  %16 = sbr.rel (!%p14_p8) target bundleno = 5 (0x5), region = 81 }
 0x378   :  { %4188 = vsyncpa [#allocation3], 1 }
 0x379   :  { %4190 = vsyncpa [#allocation3 + $0x1], 1 }

</bundles_post_ra>
